<compile_context>
chip_gen: v5e
topology: v5e:2x2
jax: 0.10.0
libtpu: 0.0.40
codegen_flags: <defaults>
</compile_context>

<pallas_src>
import math
import jax
import jax.numpy as jnp
from jax.experimental import pallas as pl
from jax.experimental.pallas import tpu as pltpu

# ------------------------- small model config -------------------------------
IMG = 16          # img_size
PATCH = 4         # patch_size
IN_CH = 3         # in_chans
EMBED = 32        # embed_dim
DEPTH = 2         # number of transformer blocks
HEADS = 4         # num_heads
MLP_RATIO = 4
NUM_CLASSES = 10
BATCH = 2

NUM_PATCHES = (IMG // PATCH) * (IMG // PATCH)   # 16
SEQ = NUM_PATCHES + 1                           # 17 (cls + patches)
SEQ_PAD = 24                                    # padded to a multiple of 8
ROWS = BATCH * SEQ_PAD                          # 48 token rows (8-aligned)
HEAD_DIM = EMBED // HEADS                       # 8
SCALE = HEAD_DIM ** (-0.5)
HIDDEN = int(EMBED * MLP_RATIO)                 # 128
PATCH_DIM = IN_CH * PATCH * PATCH               # 48
LN_EPS = 1e-6
CLS_PAD = 128                                   # lane-dense logits store
VEC_W = 128                                     # width of the bias/LN blob
NEG_INF = -1e30

# w32 blob row layout: [Wp (48) | per depth: Wproj (32), Wfc2 (128)]
def _off32(d):
    return PATCH_DIM + d * (EMBED + HIDDEN)

# vec blob row layout: [norm_w, norm_b, head_b | per depth: ln1w, ln1b, bqkv,
#                       bproj, ln2w, ln2b, bfc1, bfc2]
def _vrow(d):
    return 3 + 8 * d


# ------------------------- in-kernel helpers --------------------------------
def _layernorm(x, w, b):
    mu = jnp.mean(x, axis=-1, keepdims=True)
    var = jnp.mean(jnp.square(x - mu), axis=-1, keepdims=True)
    return (x - mu) * jax.lax.rsqrt(var + LN_EPS) * w + b


def _gelu(x):
    # tanh-approx GELU: one EUP tanh instead of a ~12-op VALU erf polynomial.
    c = math.sqrt(2.0 / math.pi)
    return 0.5 * x * (1.0 + jnp.tanh(c * (x + 0.044715 * x * x * x)))


# ------------------------- fused Pallas kernel ------------------------------
def vit_kernel(xp_ref, base_ref, mask_ref, w96_ref, w32_ref, w128_ref,
               vec_ref, o_ref):
    f32 = jnp.float32
    bf16 = jnp.bfloat16

    # ---- patch embedding + additive (cls | pos | conv-bias) base ------------
    wp = w32_ref[0:PATCH_DIM, :]                                  # (48,32) bf16
    x = jnp.dot(xp_ref[...], wp, preferred_element_type=f32) + base_ref[...]

    mask = mask_ref[...]                                          # (48,48) f32

    # ---- transformer blocks (statically unrolled over depth) ---------------
    for d in range(DEPTH):
        rb = _vrow(d)
        off32 = _off32(d)

        # ---------------- attention ----------------
        h = _layernorm(x, vec_ref[rb + 0:rb + 1, :EMBED],
                       vec_ref[rb + 1:rb + 2, :EMBED])
        qkv = jnp.dot(h.astype(bf16), w96_ref[d * EMBED:(d + 1) * EMBED, :],
                      preferred_element_type=f32) \
              + vec_ref[rb + 2:rb + 3, :3 * EMBED]                # (48, 96)
        qkv = qkv.astype(bf16)

        # per-head tensors (HEADS, ROWS, HEAD_DIM); static lane slices, heads
        # stacked along a cheap leading axis
        q3 = jnp.stack([qkv[:, i * HEAD_DIM:(i + 1) * HEAD_DIM]
                        for i in range(HEADS)], axis=0)
        k3 = jnp.stack([qkv[:, EMBED + i * HEAD_DIM:EMBED + (i + 1) * HEAD_DIM]
                        for i in range(HEADS)], axis=0)
        v3 = jnp.stack([qkv[:, 2 * EMBED + i * HEAD_DIM:
                            2 * EMBED + (i + 1) * HEAD_DIM]
                        for i in range(HEADS)], axis=0)

        # batched einsums over heads; cross-batch / padded keys masked out
        scores = jnp.einsum('hqe,hke->hqk', q3, k3,
                            preferred_element_type=f32) * SCALE + mask[None]
        m = jnp.max(scores, axis=-1, keepdims=True)
        e = jnp.exp(scores - m)
        attn = e * pl.reciprocal(jnp.sum(e, axis=-1, keepdims=True),
                                 approx=True)
        out3 = jnp.einsum('hqk,hke->hqe', attn.astype(bf16), v3,
                          preferred_element_type=f32)             # (H,48,8)

        # output projection: accumulate per head from aligned 8-row weight
        # slices (no lane concatenation of head outputs)
        proj = vec_ref[rb + 3:rb + 4, :EMBED]                     # bproj (1,32)
        for i in range(HEADS):
            w_h = w32_ref[off32 + i * HEAD_DIM: off32 + (i + 1) * HEAD_DIM, :]
            proj = proj + jnp.dot(out3[i].astype(bf16), w_h,
                                  preferred_element_type=f32)
        x = x + proj

        # ---------------- MLP ----------------
        h = _layernorm(x, vec_ref[rb + 4:rb + 5, :EMBED],
                       vec_ref[rb + 5:rb + 6, :EMBED])
        h = jnp.dot(h.astype(bf16), w128_ref[d * EMBED:(d + 1) * EMBED, :],
                    preferred_element_type=f32) \
            + vec_ref[rb + 6:rb + 7, :HIDDEN]
        h = _gelu(h)
        h = jnp.dot(h.astype(bf16),
                    w32_ref[off32 + EMBED: off32 + EMBED + HIDDEN, :],
                    preferred_element_type=f32) \
            + vec_ref[rb + 7:rb + 8, :EMBED]
        x = x + h

    # ---- final LayerNorm + head on ALL rows -> one unmasked (48,128) store --
    hf = _layernorm(x, vec_ref[0:1, :EMBED], vec_ref[1:2, :EMBED])
    head_w = w128_ref[DEPTH * EMBED:(DEPTH + 1) * EMBED, :]
    o_ref[...] = jnp.dot(hf.astype(bf16), head_w,
                         preferred_element_type=jnp.float32) + vec_ref[2:3, :]


# ------------------------- wrapper -------------------------------------------
def vit_forward(x, params):
    """x: (B, C, H, W) float32 (NCHW, like the PyTorch module)."""
    B = x.shape[0]
    assert B == BATCH
    f32, bf16 = jnp.float32, jnp.bfloat16

    # non-overlapping patch extraction (== Conv2d stride=kernel=patch)
    patches = x.reshape(B, IN_CH, IMG // PATCH, PATCH, IMG // PATCH, PATCH)
    patches = patches.transpose(0, 2, 4, 1, 3, 5).reshape(B, NUM_PATCHES,
                                                          PATCH_DIM)
    # zero rows at the cls position (row 0) and the 7 pad rows per image
    xp = jnp.pad(patches, ((0, 0), (1, SEQ_PAD - SEQ), (0, 0)))
    xp = xp.reshape(ROWS, PATCH_DIM).astype(bf16)

    # additive base: cls+pos[0] on cls rows, pos[1:]+conv_b on patch rows
    cls = params['cls'].reshape(1, EMBED)
    pos = params['pos'].reshape(SEQ, EMBED)
    base_one = jnp.concatenate(
        [cls + pos[0:1],
         pos[1:] + params['conv_b'][None, :],
         jnp.zeros((SEQ_PAD - SEQ, EMBED), f32)], axis=0)          # (24, 32)
    base = jnp.broadcast_to(base_one[None], (B, SEQ_PAD, EMBED))
    base = base.reshape(ROWS, EMBED).astype(f32)

    # additive attention mask: 0 for same-batch valid keys, -1e30 otherwise
    ridx = jnp.arange(ROWS)
    same_batch = (ridx[:, None] // SEQ_PAD) == (ridx[None, :] // SEQ_PAD)
    valid_key = (ridx % SEQ_PAD) < SEQ
    mask = jnp.where(same_batch & valid_key[None, :], 0.0, NEG_INF).astype(f32)

    # ---- packed bf16 matmul-weight blobs ------------------------------------
    wp = params['conv_w'].reshape(EMBED, PATCH_DIM).T              # (48, 32)
    w96 = params['wqkv'].reshape(DEPTH * EMBED, 3 * EMBED).astype(bf16)
    w32 = jnp.concatenate(
        [wp] + [jnp.concatenate([params['wproj'][d], params['wfc2'][d]], axis=0)
                for d in range(DEPTH)], axis=0).astype(bf16)       # (368, 32)
    head_w = jnp.pad(params['head_w'],
                     ((0, 0), (0, CLS_PAD - NUM_CLASSES)))         # (32, 128)
    w128 = jnp.concatenate(
        [params['wfc1'].reshape(DEPTH * EMBED, HIDDEN), head_w],
        axis=0).astype(bf16)                                       # (96, 128)

    # ---- packed f32 bias / LayerNorm blob (one param per 128-wide row) -----
    def vrow(v):
        v = v.reshape(1, -1)
        return jnp.pad(v, ((0, 0), (0, VEC_W - v.shape[1])))
    rows = [vrow(params['norm_w']), vrow(params['norm_b']),
            vrow(params['head_b'])]
    for d in range(DEPTH):
        rows += [vrow(params['ln1w'][d]), vrow(params['ln1b'][d]),
                 vrow(params['bqkv'][d]), vrow(params['bproj'][d]),
                 vrow(params['ln2w'][d]), vrow(params['ln2b'][d]),
                 vrow(params['bfc1'][d]), vrow(params['bfc2'][d])]
    vec = jnp.concatenate(rows, axis=0).astype(f32)                # (19, 128)

    vmem = pltpu.MemorySpace.VMEM
    out = pl.pallas_call(
        vit_kernel,
        out_shape=jax.ShapeDtypeStruct((ROWS, CLS_PAD), jnp.float32),
        in_specs=[pl.BlockSpec(memory_space=vmem) for _ in range(7)],
        out_specs=pl.BlockSpec(memory_space=vmem),
    )(xp, base, mask, w96, w32, w128, vec)

    # cls rows sit at the start of each SEQ_PAD-row batch block
    return out.reshape(B, SEQ_PAD, CLS_PAD)[:, 0, :NUM_CLASSES]


# ------------------------- parameter init (deterministic) --------------------
def init_params(key):
    keys = jax.random.split(key, 4 + 4 * DEPTH)

    def tn(k, shape):  # trunc_normal(std=0.02) ~ normal*0.02 (synthetic)
        return 0.02 * jax.random.normal(k, shape, jnp.float32)

    params = {
        'conv_w': tn(keys[0], (EMBED, IN_CH, PATCH, PATCH)),
        'conv_b': jnp.zeros((EMBED,), jnp.float32),
        'cls':    tn(keys[1], (1, 1, EMBED)),
        'pos':    tn(keys[2], (1, SEQ, EMBED)),
        'norm_w': jnp.ones((1, EMBED), jnp.float32),
        'norm_b': jnp.zeros((1, EMBED), jnp.float32),
        'head_w': tn(keys[3], (NUM_CLASSES, EMBED)).T,   # (EMBED, NUM_CLASSES)
        'head_b': jnp.zeros((1, NUM_CLASSES), jnp.float32),
    }
    wqkv, wproj, wfc1, wfc2 = [], [], [], []
    kidx = 4
    for _ in range(DEPTH):
        wqkv.append(tn(keys[kidx], (3 * EMBED, EMBED)).T); kidx += 1  # (D, 3D)
        wproj.append(tn(keys[kidx], (EMBED, EMBED)).T);    kidx += 1  # (D, D)
        wfc1.append(tn(keys[kidx], (HIDDEN, EMBED)).T);    kidx += 1  # (D, H)
        wfc2.append(tn(keys[kidx], (EMBED, HIDDEN)).T);    kidx += 1  # (H, D)
    params.update(
        ln1w=jnp.ones((DEPTH, 1, EMBED), jnp.float32),
        ln1b=jnp.zeros((DEPTH, 1, EMBED), jnp.float32),
        wqkv=jnp.stack(wqkv),
        bqkv=jnp.zeros((DEPTH, 1, 3 * EMBED), jnp.float32),
        wproj=jnp.stack(wproj),
        bproj=jnp.zeros((DEPTH, 1, EMBED), jnp.float32),
        ln2w=jnp.ones((DEPTH, 1, EMBED), jnp.float32),
        ln2b=jnp.zeros((DEPTH, 1, EMBED), jnp.float32),
        wfc1=jnp.stack(wfc1),
        bfc1=jnp.zeros((DEPTH, 1, HIDDEN), jnp.float32),
        wfc2=jnp.stack(wfc2),
        bfc2=jnp.zeros((DEPTH, 1, EMBED), jnp.float32),
    )
    return params


# ------------------------- pure-JAX reference (sanity check) -----------------
def _ref_ln(x, w, b):
    mu = jnp.mean(x, axis=-1, keepdims=True)
    var = jnp.mean(jnp.square(x - mu), axis=-1, keepdims=True)
    return (x - mu) / jnp.sqrt(var + LN_EPS) * w + b


def reference_forward(x, params):
    B = x.shape[0]
    xp = x.reshape(B, IN_CH, IMG // PATCH, PATCH, IMG // PATCH, PATCH)
    xp = xp.transpose(0, 2, 4, 1, 3, 5).reshape(B * NUM_PATCHES, -1)
    tok = xp @ params['conv_w'].reshape(EMBED, -1).T + params['conv_b']
    tok = tok.reshape(B, NUM_PATCHES, EMBED)
    seq = jnp.concatenate(
        [jnp.broadcast_to(params['cls'], (B, 1, EMBED)), tok], axis=1)
    seq = seq + params['pos']
    for d in range(DEPTH):
        h = _ref_ln(seq, params['ln1w'][d], params['ln1b'][d])
        qkv = h @ params['wqkv'][d] + params['bqkv'][d]
        q, k, v = (qkv[..., :EMBED], qkv[..., EMBED:2 * EMBED],
                   qkv[..., 2 * EMBED:])
        q = q.reshape(B, SEQ, HEADS, HEAD_DIM).transpose(0, 2, 1, 3)
        k = k.reshape(B, SEQ, HEADS, HEAD_DIM).transpose(0, 2, 1, 3)
        v = v.reshape(B, SEQ, HEADS, HEAD_DIM).transpose(0, 2, 1, 3)
        dots = jnp.einsum('bhid,bhjd->bhij', q, k) * SCALE
        attn = jax.nn.softmax(dots, axis=-1)
        out = jnp.einsum('bhij,bhjd->bhid', attn, v)
        out = out.transpose(0, 2, 1, 3).reshape(B, SEQ, EMBED)
        seq = seq + (out @ params['wproj'][d] + params['bproj'][d])
        h = _ref_ln(seq, params['ln2w'][d], params['ln2b'][d])
        h = jax.nn.gelu(h @ params['wfc1'][d] + params['bfc1'][d],
                        approximate=False)
        seq = seq + (h @ params['wfc2'][d] + params['bfc2'][d])
    cls_tok = _ref_ln(seq, params['norm_w'], params['norm_b'])[:, 0, :]
    return cls_tok @ params['head_w'] + params['head_b']


# ------------------------- main ----------------------------------------------
if __name__ == "__main__":
    key = jax.random.PRNGKey(0)
    k_x, k_p = jax.random.split(key)
    x = jax.random.normal(k_x, (BATCH, IN_CH, IMG, IMG), jnp.float32)
    params = init_params(k_p)

    fwd = jax.jit(vit_forward)
    out = jax.block_until_ready(fwd(x, params))

    ref = reference_forward(x, params)
    assert out.shape == (BATCH, NUM_CLASSES)
    max_err = float(jnp.max(jnp.abs(out - ref)))
    # bf16 MXU operands + tanh-GELU + approx reciprocal are deliberate,
    # documented numerics deltas; tolerance set accordingly.
    assert jnp.allclose(out, ref, atol=2e-2, rtol=2e-2), (
        f"mismatch: max abs err {max_err}")

    print("KERNEL_OK")
</pallas_src>

<mosaic_0001>
module attributes {stable_mosaic.version = 11 : i64} {
  func.func @vit_kernel(%arg0: memref<48x48xbf16, #tpu.memory_space<vmem>>, %arg1: memref<48x32xf32, #tpu.memory_space<vmem>>, %arg2: memref<48x48xf32, #tpu.memory_space<vmem>>, %arg3: memref<64x96xbf16, #tpu.memory_space<vmem>>, %arg4: memref<368x32xbf16, #tpu.memory_space<vmem>>, %arg5: memref<96x128xbf16, #tpu.memory_space<vmem>>, %arg6: memref<19x128xf32, #tpu.memory_space<vmem>>, %arg7: memref<48x128xf32, #tpu.memory_space<vmem>>) attributes {dimension_semantics = [], scalar_prefetch = 0 : i64, scratch_operands = 0 : i64, tpu.core_type = #tpu.core_type<tc>} {
    %c0 = arith.constant 0 : index
    %c0_0 = arith.constant 0 : index
    %0 = vector.load %arg4[%c0, %c0_0] : memref<368x32xbf16, #tpu.memory_space<vmem>>, vector<48x32xbf16>
    %c0_1 = arith.constant 0 : index
    %c0_2 = arith.constant 0 : index
    %1 = vector.load %arg0[%c0_1, %c0_2] : memref<48x48xbf16, #tpu.memory_space<vmem>>, vector<48x48xbf16>
    %cst = arith.constant dense<0.000000e+00> : vector<48x32xf32>
    %2 = tpu.matmul %1, %0, %cst {dimension_numbers = #tpu.dot_dimension_numbers<[1], [0], [0], [1], [0, 0, 1, 1], [], []>} : vector<48x48xbf16>, vector<48x32xbf16>, vector<48x32xf32> -> vector<48x32xf32>
    %c0_3 = arith.constant 0 : index
    %c0_4 = arith.constant 0 : index
    %3 = vector.load %arg1[%c0_3, %c0_4] : memref<48x32xf32, #tpu.memory_space<vmem>>, vector<48x32xf32>
    %4 = arith.addf %2, %3 : vector<48x32xf32>
    %c0_5 = arith.constant 0 : index
    %c0_6 = arith.constant 0 : index
    %5 = vector.load %arg2[%c0_5, %c0_6] : memref<48x48xf32, #tpu.memory_space<vmem>>, vector<48x48xf32>
    %c3 = arith.constant 3 : index
    %c0_7 = arith.constant 0 : index
    %6 = vector.load %arg6[%c3, %c0_7] : memref<19x128xf32, #tpu.memory_space<vmem>>, vector<1x32xf32>
    %c4 = arith.constant 4 : index
    %c0_8 = arith.constant 0 : index
    %7 = vector.load %arg6[%c4, %c0_8] : memref<19x128xf32, #tpu.memory_space<vmem>>, vector<1x32xf32>
    %cst_9 = arith.constant dense<0.000000e+00> : vector<48xf32>
    %8 = vector.multi_reduction <add>, %4, %cst_9 [1] : vector<48x32xf32> to vector<48xf32>
    %9 = vector.shape_cast %8 : vector<48xf32> to vector<48x1xf32>
    %cst_10 = arith.constant 3.200000e+01 : f32
    %10 = vector.broadcast %cst_10 : f32 to vector<48x1xf32>
    %11 = arith.divf %9, %10 : vector<48x1xf32>
    %12 = vector.broadcast %11 : vector<48x1xf32> to vector<48x32xf32>
    %13 = arith.subf %4, %12 : vector<48x32xf32>
    %14 = arith.mulf %13, %13 : vector<48x32xf32>
    %cst_11 = arith.constant dense<0.000000e+00> : vector<48xf32>
    %15 = vector.multi_reduction <add>, %14, %cst_11 [1] : vector<48x32xf32> to vector<48xf32>
    %16 = vector.shape_cast %15 : vector<48xf32> to vector<48x1xf32>
    %cst_12 = arith.constant 3.200000e+01 : f32
    %17 = vector.broadcast %cst_12 : f32 to vector<48x1xf32>
    %18 = arith.divf %16, %17 : vector<48x1xf32>
    %19 = vector.broadcast %11 : vector<48x1xf32> to vector<48x32xf32>
    %20 = arith.subf %4, %19 : vector<48x32xf32>
    %cst_13 = arith.constant 9.99999997E-7 : f32
    %21 = vector.broadcast %cst_13 : f32 to vector<48x1xf32>
    %22 = arith.addf %18, %21 : vector<48x1xf32>
    %23 = math.rsqrt %22 : vector<48x1xf32>
    %24 = vector.broadcast %23 : vector<48x1xf32> to vector<48x32xf32>
    %25 = arith.mulf %20, %24 : vector<48x32xf32>
    %26 = vector.broadcast %6 : vector<1x32xf32> to vector<48x32xf32>
    %27 = arith.mulf %25, %26 : vector<48x32xf32>
    %28 = vector.broadcast %7 : vector<1x32xf32> to vector<48x32xf32>
    %29 = arith.addf %27, %28 : vector<48x32xf32>
    %30 = arith.truncf %29 : vector<48x32xf32> to vector<48x32xbf16>
    %c0_14 = arith.constant 0 : index
    %c0_15 = arith.constant 0 : index
    %31 = vector.load %arg3[%c0_14, %c0_15] : memref<64x96xbf16, #tpu.memory_space<vmem>>, vector<32x96xbf16>
    %cst_16 = arith.constant dense<0.000000e+00> : vector<48x96xf32>
    %32 = tpu.matmul %30, %31, %cst_16 {dimension_numbers = #tpu.dot_dimension_numbers<[1], [0], [0], [1], [0, 0, 1, 1], [], []>} : vector<48x32xbf16>, vector<32x96xbf16>, vector<48x96xf32> -> vector<48x96xf32>
    %c5 = arith.constant 5 : index
    %c0_17 = arith.constant 0 : index
    %33 = vector.load %arg6[%c5, %c0_17] : memref<19x128xf32, #tpu.memory_space<vmem>>, vector<1x96xf32>
    %34 = vector.broadcast %33 : vector<1x96xf32> to vector<48x96xf32>
    %35 = arith.addf %32, %34 : vector<48x96xf32>
    %36 = arith.truncf %35 : vector<48x96xf32> to vector<48x96xbf16>
    %37 = vector.extract_strided_slice %36 {offsets = [0, 0], sizes = [48, 8], strides = [1, 1]} : vector<48x96xbf16> to vector<48x8xbf16>
    %38 = vector.extract_strided_slice %36 {offsets = [0, 8], sizes = [48, 8], strides = [1, 1]} : vector<48x96xbf16> to vector<48x8xbf16>
    %39 = vector.extract_strided_slice %36 {offsets = [0, 16], sizes = [48, 8], strides = [1, 1]} : vector<48x96xbf16> to vector<48x8xbf16>
    %40 = vector.extract_strided_slice %36 {offsets = [0, 24], sizes = [48, 8], strides = [1, 1]} : vector<48x96xbf16> to vector<48x8xbf16>
    %41 = vector.shape_cast %37 : vector<48x8xbf16> to vector<1x48x8xbf16>
    %42 = vector.shape_cast %38 : vector<48x8xbf16> to vector<1x48x8xbf16>
    %43 = vector.shape_cast %39 : vector<48x8xbf16> to vector<1x48x8xbf16>
    %44 = vector.shape_cast %40 : vector<48x8xbf16> to vector<1x48x8xbf16>
    %45 = tpu.concatenate %41, %42, %43, %44 in 0 : vector<1x48x8xbf16>, vector<1x48x8xbf16>, vector<1x48x8xbf16>, vector<1x48x8xbf16> -> vector<4x48x8xbf16>
    %46 = vector.extract_strided_slice %36 {offsets = [0, 32], sizes = [48, 8], strides = [1, 1]} : vector<48x96xbf16> to vector<48x8xbf16>
    %47 = vector.extract_strided_slice %36 {offsets = [0, 40], sizes = [48, 8], strides = [1, 1]} : vector<48x96xbf16> to vector<48x8xbf16>
    %48 = vector.extract_strided_slice %36 {offsets = [0, 48], sizes = [48, 8], strides = [1, 1]} : vector<48x96xbf16> to vector<48x8xbf16>
    %49 = vector.extract_strided_slice %36 {offsets = [0, 56], sizes = [48, 8], strides = [1, 1]} : vector<48x96xbf16> to vector<48x8xbf16>
    %50 = vector.shape_cast %46 : vector<48x8xbf16> to vector<1x48x8xbf16>
    %51 = vector.shape_cast %47 : vector<48x8xbf16> to vector<1x48x8xbf16>
    %52 = vector.shape_cast %48 : vector<48x8xbf16> to vector<1x48x8xbf16>
    %53 = vector.shape_cast %49 : vector<48x8xbf16> to vector<1x48x8xbf16>
    %54 = tpu.concatenate %50, %51, %52, %53 in 0 : vector<1x48x8xbf16>, vector<1x48x8xbf16>, vector<1x48x8xbf16>, vector<1x48x8xbf16> -> vector<4x48x8xbf16>
    %55 = vector.extract_strided_slice %36 {offsets = [0, 64], sizes = [48, 8], strides = [1, 1]} : vector<48x96xbf16> to vector<48x8xbf16>
    %56 = vector.extract_strided_slice %36 {offsets = [0, 72], sizes = [48, 8], strides = [1, 1]} : vector<48x96xbf16> to vector<48x8xbf16>
    %57 = vector.extract_strided_slice %36 {offsets = [0, 80], sizes = [48, 8], strides = [1, 1]} : vector<48x96xbf16> to vector<48x8xbf16>
    %58 = vector.extract_strided_slice %36 {offsets = [0, 88], sizes = [48, 8], strides = [1, 1]} : vector<48x96xbf16> to vector<48x8xbf16>
    %59 = vector.shape_cast %55 : vector<48x8xbf16> to vector<1x48x8xbf16>
    %60 = vector.shape_cast %56 : vector<48x8xbf16> to vector<1x48x8xbf16>
    %61 = vector.shape_cast %57 : vector<48x8xbf16> to vector<1x48x8xbf16>
    %62 = vector.shape_cast %58 : vector<48x8xbf16> to vector<1x48x8xbf16>
    %63 = tpu.concatenate %59, %60, %61, %62 in 0 : vector<1x48x8xbf16>, vector<1x48x8xbf16>, vector<1x48x8xbf16>, vector<1x48x8xbf16> -> vector<4x48x8xbf16>
    "tpu.trace_start"() <{level = 10 : i32, message = "hqe,hke->hqk"}> : () -> ()
    %cst_18 = arith.constant dense<0.000000e+00> : vector<4x48x48xf32>
    %64 = tpu.matmul %45, %54, %cst_18 {dimension_numbers = #tpu.dot_dimension_numbers<[2], [2], [1], [1], [0, 0, 0, 1, 1, 1], [0], [0]>} : vector<4x48x8xbf16>, vector<4x48x8xbf16>, vector<4x48x48xf32> -> vector<4x48x48xf32>
    "tpu.trace_stop"() : () -> ()
    %cst_19 = arith.constant 0.353553385 : f32
    %65 = vector.broadcast %cst_19 : f32 to vector<4x48x48xf32>
    %66 = arith.mulf %64, %65 : vector<4x48x48xf32>
    %67 = vector.shape_cast %5 : vector<48x48xf32> to vector<1x48x48xf32>
    %68 = vector.broadcast %67 : vector<1x48x48xf32> to vector<4x48x48xf32>
    %69 = arith.addf %66, %68 : vector<4x48x48xf32>
    %cst_20 = arith.constant dense<0xFF800000> : vector<4x48xf32>
    %70 = vector.multi_reduction <maximumf>, %69, %cst_20 [2] : vector<4x48x48xf32> to vector<4x48xf32>
    %71 = vector.shape_cast %70 : vector<4x48xf32> to vector<4x48x1xf32>
    %72 = vector.broadcast %71 : vector<4x48x1xf32> to vector<4x48x48xf32>
    %73 = arith.subf %69, %72 : vector<4x48x48xf32>
    %74 = math.exp %73 : vector<4x48x48xf32>
    %cst_21 = arith.constant dense<0.000000e+00> : vector<4x48xf32>
    %75 = vector.multi_reduction <add>, %74, %cst_21 [2] : vector<4x48x48xf32> to vector<4x48xf32>
    %76 = vector.shape_cast %75 : vector<4x48xf32> to vector<4x48x1xf32>
    %77 = tpu.reciprocal %76 {approx = true} : vector<4x48x1xf32> -> vector<4x48x1xf32>
    %78 = vector.broadcast %77 : vector<4x48x1xf32> to vector<4x48x48xf32>
    %79 = arith.mulf %74, %78 : vector<4x48x48xf32>
    %80 = arith.truncf %79 : vector<4x48x48xf32> to vector<4x48x48xbf16>
    "tpu.trace_start"() <{level = 10 : i32, message = "hqk,hke->hqe"}> : () -> ()
    %cst_22 = arith.constant dense<0.000000e+00> : vector<4x48x8xf32>
    %81 = tpu.matmul %80, %63, %cst_22 {dimension_numbers = #tpu.dot_dimension_numbers<[2], [1], [1], [2], [0, 0, 0, 1, 1, 2], [0], [0]>} : vector<4x48x48xbf16>, vector<4x48x8xbf16>, vector<4x48x8xf32> -> vector<4x48x8xf32>
    "tpu.trace_stop"() : () -> ()
    %c6 = arith.constant 6 : index
    %c0_23 = arith.constant 0 : index
    %82 = vector.load %arg6[%c6, %c0_23] : memref<19x128xf32, #tpu.memory_space<vmem>>, vector<1x32xf32>
    %c48 = arith.constant 48 : index
    %c0_24 = arith.constant 0 : index
    %83 = vector.load %arg4[%c48, %c0_24] : memref<368x32xbf16, #tpu.memory_space<vmem>>, vector<8x32xbf16>
    %84 = vector.extract_strided_slice %81 {offsets = [0, 0, 0], sizes = [1, 48, 8], strides = [1, 1, 1]} : vector<4x48x8xf32> to vector<1x48x8xf32>
    %85 = vector.shape_cast %84 : vector<1x48x8xf32> to vector<48x8xf32>
    %86 = arith.truncf %85 : vector<48x8xf32> to vector<48x8xbf16>
    %cst_25 = arith.constant dense<0.000000e+00> : vector<48x32xf32>
    %87 = tpu.matmul %86, %83, %cst_25 {dimension_numbers = #tpu.dot_dimension_numbers<[1], [0], [0], [1], [0, 0, 1, 1], [], []>} : vector<48x8xbf16>, vector<8x32xbf16>, vector<48x32xf32> -> vector<48x32xf32>
    %88 = vector.broadcast %82 : vector<1x32xf32> to vector<48x32xf32>
    %89 = arith.addf %88, %87 : vector<48x32xf32>
    %c56 = arith.constant 56 : index
    %c0_26 = arith.constant 0 : index
    %90 = vector.load %arg4[%c56, %c0_26] : memref<368x32xbf16, #tpu.memory_space<vmem>>, vector<8x32xbf16>
    %91 = vector.extract_strided_slice %81 {offsets = [1, 0, 0], sizes = [1, 48, 8], strides = [1, 1, 1]} : vector<4x48x8xf32> to vector<1x48x8xf32>
    %92 = vector.shape_cast %91 : vector<1x48x8xf32> to vector<48x8xf32>
    %93 = arith.truncf %92 : vector<48x8xf32> to vector<48x8xbf16>
    %cst_27 = arith.constant dense<0.000000e+00> : vector<48x32xf32>
    %94 = tpu.matmul %93, %90, %cst_27 {dimension_numbers = #tpu.dot_dimension_numbers<[1], [0], [0], [1], [0, 0, 1, 1], [], []>} : vector<48x8xbf16>, vector<8x32xbf16>, vector<48x32xf32> -> vector<48x32xf32>
    %95 = arith.addf %89, %94 : vector<48x32xf32>
    %c64 = arith.constant 64 : index
    %c0_28 = arith.constant 0 : index
    %96 = vector.load %arg4[%c64, %c0_28] : memref<368x32xbf16, #tpu.memory_space<vmem>>, vector<8x32xbf16>
    %97 = vector.extract_strided_slice %81 {offsets = [2, 0, 0], sizes = [1, 48, 8], strides = [1, 1, 1]} : vector<4x48x8xf32> to vector<1x48x8xf32>
    %98 = vector.shape_cast %97 : vector<1x48x8xf32> to vector<48x8xf32>
    %99 = arith.truncf %98 : vector<48x8xf32> to vector<48x8xbf16>
    %cst_29 = arith.constant dense<0.000000e+00> : vector<48x32xf32>
    %100 = tpu.matmul %99, %96, %cst_29 {dimension_numbers = #tpu.dot_dimension_numbers<[1], [0], [0], [1], [0, 0, 1, 1], [], []>} : vector<48x8xbf16>, vector<8x32xbf16>, vector<48x32xf32> -> vector<48x32xf32>
    %101 = arith.addf %95, %100 : vector<48x32xf32>
    %c72 = arith.constant 72 : index
    %c0_30 = arith.constant 0 : index
    %102 = vector.load %arg4[%c72, %c0_30] : memref<368x32xbf16, #tpu.memory_space<vmem>>, vector<8x32xbf16>
    %103 = vector.extract_strided_slice %81 {offsets = [3, 0, 0], sizes = [1, 48, 8], strides = [1, 1, 1]} : vector<4x48x8xf32> to vector<1x48x8xf32>
    %104 = vector.shape_cast %103 : vector<1x48x8xf32> to vector<48x8xf32>
    %105 = arith.truncf %104 : vector<48x8xf32> to vector<48x8xbf16>
    %cst_31 = arith.constant dense<0.000000e+00> : vector<48x32xf32>
    %106 = tpu.matmul %105, %102, %cst_31 {dimension_numbers = #tpu.dot_dimension_numbers<[1], [0], [0], [1], [0, 0, 1, 1], [], []>} : vector<48x8xbf16>, vector<8x32xbf16>, vector<48x32xf32> -> vector<48x32xf32>
    %107 = arith.addf %101, %106 : vector<48x32xf32>
    %108 = arith.addf %4, %107 : vector<48x32xf32>
    %c7 = arith.constant 7 : index
    %c0_32 = arith.constant 0 : index
    %109 = vector.load %arg6[%c7, %c0_32] : memref<19x128xf32, #tpu.memory_space<vmem>>, vector<1x32xf32>
    %c8 = arith.constant 8 : index
    %c0_33 = arith.constant 0 : index
    %110 = vector.load %arg6[%c8, %c0_33] : memref<19x128xf32, #tpu.memory_space<vmem>>, vector<1x32xf32>
    %cst_34 = arith.constant dense<0.000000e+00> : vector<48xf32>
    %111 = vector.multi_reduction <add>, %108, %cst_34 [1] : vector<48x32xf32> to vector<48xf32>
    %112 = vector.shape_cast %111 : vector<48xf32> to vector<48x1xf32>
    %cst_35 = arith.constant 3.200000e+01 : f32
    %113 = vector.broadcast %cst_35 : f32 to vector<48x1xf32>
    %114 = arith.divf %112, %113 : vector<48x1xf32>
    %115 = vector.broadcast %114 : vector<48x1xf32> to vector<48x32xf32>
    %116 = arith.subf %108, %115 : vector<48x32xf32>
    %117 = arith.mulf %116, %116 : vector<48x32xf32>
    %cst_36 = arith.constant dense<0.000000e+00> : vector<48xf32>
    %118 = vector.multi_reduction <add>, %117, %cst_36 [1] : vector<48x32xf32> to vector<48xf32>
    %119 = vector.shape_cast %118 : vector<48xf32> to vector<48x1xf32>
    %cst_37 = arith.constant 3.200000e+01 : f32
    %120 = vector.broadcast %cst_37 : f32 to vector<48x1xf32>
    %121 = arith.divf %119, %120 : vector<48x1xf32>
    %122 = vector.broadcast %114 : vector<48x1xf32> to vector<48x32xf32>
    %123 = arith.subf %108, %122 : vector<48x32xf32>
    %cst_38 = arith.constant 9.99999997E-7 : f32
    %124 = vector.broadcast %cst_38 : f32 to vector<48x1xf32>
    %125 = arith.addf %121, %124 : vector<48x1xf32>
    %126 = math.rsqrt %125 : vector<48x1xf32>
    %127 = vector.broadcast %126 : vector<48x1xf32> to vector<48x32xf32>
    %128 = arith.mulf %123, %127 : vector<48x32xf32>
    %129 = vector.broadcast %109 : vector<1x32xf32> to vector<48x32xf32>
    %130 = arith.mulf %128, %129 : vector<48x32xf32>
    %131 = vector.broadcast %110 : vector<1x32xf32> to vector<48x32xf32>
    %132 = arith.addf %130, %131 : vector<48x32xf32>
    %133 = arith.truncf %132 : vector<48x32xf32> to vector<48x32xbf16>
    %c0_39 = arith.constant 0 : index
    %c0_40 = arith.constant 0 : index
    %134 = vector.load %arg5[%c0_39, %c0_40] : memref<96x128xbf16, #tpu.memory_space<vmem>>, vector<32x128xbf16>
    %cst_41 = arith.constant dense<0.000000e+00> : vector<48x128xf32>
    %135 = tpu.matmul %133, %134, %cst_41 {dimension_numbers = #tpu.dot_dimension_numbers<[1], [0], [0], [1], [0, 0, 1, 1], [], []>} : vector<48x32xbf16>, vector<32x128xbf16>, vector<48x128xf32> -> vector<48x128xf32>
    %c9 = arith.constant 9 : index
    %c0_42 = arith.constant 0 : index
    %136 = vector.load %arg6[%c9, %c0_42] : memref<19x128xf32, #tpu.memory_space<vmem>>, vector<1x128xf32>
    %137 = vector.broadcast %136 : vector<1x128xf32> to vector<48x128xf32>
    %138 = arith.addf %135, %137 : vector<48x128xf32>
    %cst_43 = arith.constant 5.000000e-01 : f32
    %139 = vector.broadcast %cst_43 : f32 to vector<48x128xf32>
    %140 = arith.mulf %139, %138 : vector<48x128xf32>
    %cst_44 = arith.constant 4.471500e-02 : f32
    %141 = vector.broadcast %cst_44 : f32 to vector<48x128xf32>
    %142 = arith.mulf %141, %138 : vector<48x128xf32>
    %143 = arith.mulf %142, %138 : vector<48x128xf32>
    %144 = arith.mulf %143, %138 : vector<48x128xf32>
    %145 = arith.addf %138, %144 : vector<48x128xf32>
    %cst_45 = arith.constant 0.797884583 : f32
    %146 = vector.broadcast %cst_45 : f32 to vector<48x128xf32>
    %147 = arith.mulf %146, %145 : vector<48x128xf32>
    %148 = math.tanh %147 : vector<48x128xf32>
    %cst_46 = arith.constant 1.000000e+00 : f32
    %149 = vector.broadcast %cst_46 : f32 to vector<48x128xf32>
    %150 = arith.addf %149, %148 : vector<48x128xf32>
    %151 = arith.mulf %140, %150 : vector<48x128xf32>
    %152 = arith.truncf %151 : vector<48x128xf32> to vector<48x128xbf16>
    %c80 = arith.constant 80 : index
    %c0_47 = arith.constant 0 : index
    %153 = vector.load %arg4[%c80, %c0_47] : memref<368x32xbf16, #tpu.memory_space<vmem>>, vector<128x32xbf16>
    %cst_48 = arith.constant dense<0.000000e+00> : vector<48x32xf32>
    %154 = tpu.matmul %152, %153, %cst_48 {dimension_numbers = #tpu.dot_dimension_numbers<[1], [0], [0], [1], [0, 0, 1, 1], [], []>} : vector<48x128xbf16>, vector<128x32xbf16>, vector<48x32xf32> -> vector<48x32xf32>
    %c10 = arith.constant 10 : index
    %c0_49 = arith.constant 0 : index
    %155 = vector.load %arg6[%c10, %c0_49] : memref<19x128xf32, #tpu.memory_space<vmem>>, vector<1x32xf32>
    %156 = vector.broadcast %155 : vector<1x32xf32> to vector<48x32xf32>
    %157 = arith.addf %154, %156 : vector<48x32xf32>
    %158 = arith.addf %108, %157 : vector<48x32xf32>
    %c11 = arith.constant 11 : index
    %c0_50 = arith.constant 0 : index
    %159 = vector.load %arg6[%c11, %c0_50] : memref<19x128xf32, #tpu.memory_space<vmem>>, vector<1x32xf32>
    %c12 = arith.constant 12 : index
    %c0_51 = arith.constant 0 : index
    %160 = vector.load %arg6[%c12, %c0_51] : memref<19x128xf32, #tpu.memory_space<vmem>>, vector<1x32xf32>
    %cst_52 = arith.constant dense<0.000000e+00> : vector<48xf32>
    %161 = vector.multi_reduction <add>, %158, %cst_52 [1] : vector<48x32xf32> to vector<48xf32>
    %162 = vector.shape_cast %161 : vector<48xf32> to vector<48x1xf32>
    %cst_53 = arith.constant 3.200000e+01 : f32
    %163 = vector.broadcast %cst_53 : f32 to vector<48x1xf32>
    %164 = arith.divf %162, %163 : vector<48x1xf32>
    %165 = vector.broadcast %164 : vector<48x1xf32> to vector<48x32xf32>
    %166 = arith.subf %158, %165 : vector<48x32xf32>
    %167 = arith.mulf %166, %166 : vector<48x32xf32>
    %cst_54 = arith.constant dense<0.000000e+00> : vector<48xf32>
    %168 = vector.multi_reduction <add>, %167, %cst_54 [1] : vector<48x32xf32> to vector<48xf32>
    %169 = vector.shape_cast %168 : vector<48xf32> to vector<48x1xf32>
    %cst_55 = arith.constant 3.200000e+01 : f32
    %170 = vector.broadcast %cst_55 : f32 to vector<48x1xf32>
    %171 = arith.divf %169, %170 : vector<48x1xf32>
    %172 = vector.broadcast %164 : vector<48x1xf32> to vector<48x32xf32>
    %173 = arith.subf %158, %172 : vector<48x32xf32>
    %cst_56 = arith.constant 9.99999997E-7 : f32
    %174 = vector.broadcast %cst_56 : f32 to vector<48x1xf32>
    %175 = arith.addf %171, %174 : vector<48x1xf32>
    %176 = math.rsqrt %175 : vector<48x1xf32>
    %177 = vector.broadcast %176 : vector<48x1xf32> to vector<48x32xf32>
    %178 = arith.mulf %173, %177 : vector<48x32xf32>
    %179 = vector.broadcast %159 : vector<1x32xf32> to vector<48x32xf32>
    %180 = arith.mulf %178, %179 : vector<48x32xf32>
    %181 = vector.broadcast %160 : vector<1x32xf32> to vector<48x32xf32>
    %182 = arith.addf %180, %181 : vector<48x32xf32>
    %183 = arith.truncf %182 : vector<48x32xf32> to vector<48x32xbf16>
    %c32 = arith.constant 32 : index
    %c0_57 = arith.constant 0 : index
    %184 = vector.load %arg3[%c32, %c0_57] : memref<64x96xbf16, #tpu.memory_space<vmem>>, vector<32x96xbf16>
    %cst_58 = arith.constant dense<0.000000e+00> : vector<48x96xf32>
    %185 = tpu.matmul %183, %184, %cst_58 {dimension_numbers = #tpu.dot_dimension_numbers<[1], [0], [0], [1], [0, 0, 1, 1], [], []>} : vector<48x32xbf16>, vector<32x96xbf16>, vector<48x96xf32> -> vector<48x96xf32>
    %c13 = arith.constant 13 : index
    %c0_59 = arith.constant 0 : index
    %186 = vector.load %arg6[%c13, %c0_59] : memref<19x128xf32, #tpu.memory_space<vmem>>, vector<1x96xf32>
    %187 = vector.broadcast %186 : vector<1x96xf32> to vector<48x96xf32>
    %188 = arith.addf %185, %187 : vector<48x96xf32>
    %189 = arith.truncf %188 : vector<48x96xf32> to vector<48x96xbf16>
    %190 = vector.extract_strided_slice %189 {offsets = [0, 0], sizes = [48, 8], strides = [1, 1]} : vector<48x96xbf16> to vector<48x8xbf16>
    %191 = vector.extract_strided_slice %189 {offsets = [0, 8], sizes = [48, 8], strides = [1, 1]} : vector<48x96xbf16> to vector<48x8xbf16>
    %192 = vector.extract_strided_slice %189 {offsets = [0, 16], sizes = [48, 8], strides = [1, 1]} : vector<48x96xbf16> to vector<48x8xbf16>
    %193 = vector.extract_strided_slice %189 {offsets = [0, 24], sizes = [48, 8], strides = [1, 1]} : vector<48x96xbf16> to vector<48x8xbf16>
    %194 = vector.shape_cast %190 : vector<48x8xbf16> to vector<1x48x8xbf16>
    %195 = vector.shape_cast %191 : vector<48x8xbf16> to vector<1x48x8xbf16>
    %196 = vector.shape_cast %192 : vector<48x8xbf16> to vector<1x48x8xbf16>
    %197 = vector.shape_cast %193 : vector<48x8xbf16> to vector<1x48x8xbf16>
    %198 = tpu.concatenate %194, %195, %196, %197 in 0 : vector<1x48x8xbf16>, vector<1x48x8xbf16>, vector<1x48x8xbf16>, vector<1x48x8xbf16> -> vector<4x48x8xbf16>
    %199 = vector.extract_strided_slice %189 {offsets = [0, 32], sizes = [48, 8], strides = [1, 1]} : vector<48x96xbf16> to vector<48x8xbf16>
    %200 = vector.extract_strided_slice %189 {offsets = [0, 40], sizes = [48, 8], strides = [1, 1]} : vector<48x96xbf16> to vector<48x8xbf16>
    %201 = vector.extract_strided_slice %189 {offsets = [0, 48], sizes = [48, 8], strides = [1, 1]} : vector<48x96xbf16> to vector<48x8xbf16>
    %202 = vector.extract_strided_slice %189 {offsets = [0, 56], sizes = [48, 8], strides = [1, 1]} : vector<48x96xbf16> to vector<48x8xbf16>
    %203 = vector.shape_cast %199 : vector<48x8xbf16> to vector<1x48x8xbf16>
    %204 = vector.shape_cast %200 : vector<48x8xbf16> to vector<1x48x8xbf16>
    %205 = vector.shape_cast %201 : vector<48x8xbf16> to vector<1x48x8xbf16>
    %206 = vector.shape_cast %202 : vector<48x8xbf16> to vector<1x48x8xbf16>
    %207 = tpu.concatenate %203, %204, %205, %206 in 0 : vector<1x48x8xbf16>, vector<1x48x8xbf16>, vector<1x48x8xbf16>, vector<1x48x8xbf16> -> vector<4x48x8xbf16>
    %208 = vector.extract_strided_slice %189 {offsets = [0, 64], sizes = [48, 8], strides = [1, 1]} : vector<48x96xbf16> to vector<48x8xbf16>
    %209 = vector.extract_strided_slice %189 {offsets = [0, 72], sizes = [48, 8], strides = [1, 1]} : vector<48x96xbf16> to vector<48x8xbf16>
    %210 = vector.extract_strided_slice %189 {offsets = [0, 80], sizes = [48, 8], strides = [1, 1]} : vector<48x96xbf16> to vector<48x8xbf16>
    %211 = vector.extract_strided_slice %189 {offsets = [0, 88], sizes = [48, 8], strides = [1, 1]} : vector<48x96xbf16> to vector<48x8xbf16>
    %212 = vector.shape_cast %208 : vector<48x8xbf16> to vector<1x48x8xbf16>
    %213 = vector.shape_cast %209 : vector<48x8xbf16> to vector<1x48x8xbf16>
    %214 = vector.shape_cast %210 : vector<48x8xbf16> to vector<1x48x8xbf16>
    %215 = vector.shape_cast %211 : vector<48x8xbf16> to vector<1x48x8xbf16>
    %216 = tpu.concatenate %212, %213, %214, %215 in 0 : vector<1x48x8xbf16>, vector<1x48x8xbf16>, vector<1x48x8xbf16>, vector<1x48x8xbf16> -> vector<4x48x8xbf16>
    "tpu.trace_start"() <{level = 10 : i32, message = "hqe,hke->hqk"}> : () -> ()
    %cst_60 = arith.constant dense<0.000000e+00> : vector<4x48x48xf32>
    %217 = tpu.matmul %198, %207, %cst_60 {dimension_numbers = #tpu.dot_dimension_numbers<[2], [2], [1], [1], [0, 0, 0, 1, 1, 1], [0], [0]>} : vector<4x48x8xbf16>, vector<4x48x8xbf16>, vector<4x48x48xf32> -> vector<4x48x48xf32>
    "tpu.trace_stop"() : () -> ()
    %cst_61 = arith.constant 0.353553385 : f32
    %218 = vector.broadcast %cst_61 : f32 to vector<4x48x48xf32>
    %219 = arith.mulf %217, %218 : vector<4x48x48xf32>
    %220 = vector.shape_cast %5 : vector<48x48xf32> to vector<1x48x48xf32>
    %221 = vector.broadcast %220 : vector<1x48x48xf32> to vector<4x48x48xf32>
    %222 = arith.addf %219, %221 : vector<4x48x48xf32>
    %cst_62 = arith.constant dense<0xFF800000> : vector<4x48xf32>
    %223 = vector.multi_reduction <maximumf>, %222, %cst_62 [2] : vector<4x48x48xf32> to vector<4x48xf32>
    %224 = vector.shape_cast %223 : vector<4x48xf32> to vector<4x48x1xf32>
    %225 = vector.broadcast %224 : vector<4x48x1xf32> to vector<4x48x48xf32>
    %226 = arith.subf %222, %225 : vector<4x48x48xf32>
    %227 = math.exp %226 : vector<4x48x48xf32>
    %cst_63 = arith.constant dense<0.000000e+00> : vector<4x48xf32>
    %228 = vector.multi_reduction <add>, %227, %cst_63 [2] : vector<4x48x48xf32> to vector<4x48xf32>
    %229 = vector.shape_cast %228 : vector<4x48xf32> to vector<4x48x1xf32>
    %230 = tpu.reciprocal %229 {approx = true} : vector<4x48x1xf32> -> vector<4x48x1xf32>
    %231 = vector.broadcast %230 : vector<4x48x1xf32> to vector<4x48x48xf32>
    %232 = arith.mulf %227, %231 : vector<4x48x48xf32>
    %233 = arith.truncf %232 : vector<4x48x48xf32> to vector<4x48x48xbf16>
    "tpu.trace_start"() <{level = 10 : i32, message = "hqk,hke->hqe"}> : () -> ()
    %cst_64 = arith.constant dense<0.000000e+00> : vector<4x48x8xf32>
    %234 = tpu.matmul %233, %216, %cst_64 {dimension_numbers = #tpu.dot_dimension_numbers<[2], [1], [1], [2], [0, 0, 0, 1, 1, 2], [0], [0]>} : vector<4x48x48xbf16>, vector<4x48x8xbf16>, vector<4x48x8xf32> -> vector<4x48x8xf32>
    "tpu.trace_stop"() : () -> ()
    %c14 = arith.constant 14 : index
    %c0_65 = arith.constant 0 : index
    %235 = vector.load %arg6[%c14, %c0_65] : memref<19x128xf32, #tpu.memory_space<vmem>>, vector<1x32xf32>
    %c208 = arith.constant 208 : index
    %c0_66 = arith.constant 0 : index
    %236 = vector.load %arg4[%c208, %c0_66] : memref<368x32xbf16, #tpu.memory_space<vmem>>, vector<8x32xbf16>
    %237 = vector.extract_strided_slice %234 {offsets = [0, 0, 0], sizes = [1, 48, 8], strides = [1, 1, 1]} : vector<4x48x8xf32> to vector<1x48x8xf32>
    %238 = vector.shape_cast %237 : vector<1x48x8xf32> to vector<48x8xf32>
    %239 = arith.truncf %238 : vector<48x8xf32> to vector<48x8xbf16>
    %cst_67 = arith.constant dense<0.000000e+00> : vector<48x32xf32>
    %240 = tpu.matmul %239, %236, %cst_67 {dimension_numbers = #tpu.dot_dimension_numbers<[1], [0], [0], [1], [0, 0, 1, 1], [], []>} : vector<48x8xbf16>, vector<8x32xbf16>, vector<48x32xf32> -> vector<48x32xf32>
    %241 = vector.broadcast %235 : vector<1x32xf32> to vector<48x32xf32>
    %242 = arith.addf %241, %240 : vector<48x32xf32>
    %c216 = arith.constant 216 : index
    %c0_68 = arith.constant 0 : index
    %243 = vector.load %arg4[%c216, %c0_68] : memref<368x32xbf16, #tpu.memory_space<vmem>>, vector<8x32xbf16>
    %244 = vector.extract_strided_slice %234 {offsets = [1, 0, 0], sizes = [1, 48, 8], strides = [1, 1, 1]} : vector<4x48x8xf32> to vector<1x48x8xf32>
    %245 = vector.shape_cast %244 : vector<1x48x8xf32> to vector<48x8xf32>
    %246 = arith.truncf %245 : vector<48x8xf32> to vector<48x8xbf16>
    %cst_69 = arith.constant dense<0.000000e+00> : vector<48x32xf32>
    %247 = tpu.matmul %246, %243, %cst_69 {dimension_numbers = #tpu.dot_dimension_numbers<[1], [0], [0], [1], [0, 0, 1, 1], [], []>} : vector<48x8xbf16>, vector<8x32xbf16>, vector<48x32xf32> -> vector<48x32xf32>
    %248 = arith.addf %242, %247 : vector<48x32xf32>
    %c224 = arith.constant 224 : index
    %c0_70 = arith.constant 0 : index
    %249 = vector.load %arg4[%c224, %c0_70] : memref<368x32xbf16, #tpu.memory_space<vmem>>, vector<8x32xbf16>
    %250 = vector.extract_strided_slice %234 {offsets = [2, 0, 0], sizes = [1, 48, 8], strides = [1, 1, 1]} : vector<4x48x8xf32> to vector<1x48x8xf32>
    %251 = vector.shape_cast %250 : vector<1x48x8xf32> to vector<48x8xf32>
    %252 = arith.truncf %251 : vector<48x8xf32> to vector<48x8xbf16>
    %cst_71 = arith.constant dense<0.000000e+00> : vector<48x32xf32>
    %253 = tpu.matmul %252, %249, %cst_71 {dimension_numbers = #tpu.dot_dimension_numbers<[1], [0], [0], [1], [0, 0, 1, 1], [], []>} : vector<48x8xbf16>, vector<8x32xbf16>, vector<48x32xf32> -> vector<48x32xf32>
    %254 = arith.addf %248, %253 : vector<48x32xf32>
    %c232 = arith.constant 232 : index
    %c0_72 = arith.constant 0 : index
    %255 = vector.load %arg4[%c232, %c0_72] : memref<368x32xbf16, #tpu.memory_space<vmem>>, vector<8x32xbf16>
    %256 = vector.extract_strided_slice %234 {offsets = [3, 0, 0], sizes = [1, 48, 8], strides = [1, 1, 1]} : vector<4x48x8xf32> to vector<1x48x8xf32>
    %257 = vector.shape_cast %256 : vector<1x48x8xf32> to vector<48x8xf32>
    %258 = arith.truncf %257 : vector<48x8xf32> to vector<48x8xbf16>
    %cst_73 = arith.constant dense<0.000000e+00> : vector<48x32xf32>
    %259 = tpu.matmul %258, %255, %cst_73 {dimension_numbers = #tpu.dot_dimension_numbers<[1], [0], [0], [1], [0, 0, 1, 1], [], []>} : vector<48x8xbf16>, vector<8x32xbf16>, vector<48x32xf32> -> vector<48x32xf32>
    %260 = arith.addf %254, %259 : vector<48x32xf32>
    %261 = arith.addf %158, %260 : vector<48x32xf32>
    %c15 = arith.constant 15 : index
    %c0_74 = arith.constant 0 : index
    %262 = vector.load %arg6[%c15, %c0_74] : memref<19x128xf32, #tpu.memory_space<vmem>>, vector<1x32xf32>
    %c16 = arith.constant 16 : index
    %c0_75 = arith.constant 0 : index
    %263 = vector.load %arg6[%c16, %c0_75] : memref<19x128xf32, #tpu.memory_space<vmem>>, vector<1x32xf32>
    %cst_76 = arith.constant dense<0.000000e+00> : vector<48xf32>
    %264 = vector.multi_reduction <add>, %261, %cst_76 [1] : vector<48x32xf32> to vector<48xf32>
    %265 = vector.shape_cast %264 : vector<48xf32> to vector<48x1xf32>
    %cst_77 = arith.constant 3.200000e+01 : f32
    %266 = vector.broadcast %cst_77 : f32 to vector<48x1xf32>
    %267 = arith.divf %265, %266 : vector<48x1xf32>
    %268 = vector.broadcast %267 : vector<48x1xf32> to vector<48x32xf32>
    %269 = arith.subf %261, %268 : vector<48x32xf32>
    %270 = arith.mulf %269, %269 : vector<48x32xf32>
    %cst_78 = arith.constant dense<0.000000e+00> : vector<48xf32>
    %271 = vector.multi_reduction <add>, %270, %cst_78 [1] : vector<48x32xf32> to vector<48xf32>
    %272 = vector.shape_cast %271 : vector<48xf32> to vector<48x1xf32>
    %cst_79 = arith.constant 3.200000e+01 : f32
    %273 = vector.broadcast %cst_79 : f32 to vector<48x1xf32>
    %274 = arith.divf %272, %273 : vector<48x1xf32>
    %275 = vector.broadcast %267 : vector<48x1xf32> to vector<48x32xf32>
    %276 = arith.subf %261, %275 : vector<48x32xf32>
    %cst_80 = arith.constant 9.99999997E-7 : f32
    %277 = vector.broadcast %cst_80 : f32 to vector<48x1xf32>
    %278 = arith.addf %274, %277 : vector<48x1xf32>
    %279 = math.rsqrt %278 : vector<48x1xf32>
    %280 = vector.broadcast %279 : vector<48x1xf32> to vector<48x32xf32>
    %281 = arith.mulf %276, %280 : vector<48x32xf32>
    %282 = vector.broadcast %262 : vector<1x32xf32> to vector<48x32xf32>
    %283 = arith.mulf %281, %282 : vector<48x32xf32>
    %284 = vector.broadcast %263 : vector<1x32xf32> to vector<48x32xf32>
    %285 = arith.addf %283, %284 : vector<48x32xf32>
    %286 = arith.truncf %285 : vector<48x32xf32> to vector<48x32xbf16>
    %c32_81 = arith.constant 32 : index
    %c0_82 = arith.constant 0 : index
    %287 = vector.load %arg5[%c32_81, %c0_82] : memref<96x128xbf16, #tpu.memory_space<vmem>>, vector<32x128xbf16>
    %cst_83 = arith.constant dense<0.000000e+00> : vector<48x128xf32>
    %288 = tpu.matmul %286, %287, %cst_83 {dimension_numbers = #tpu.dot_dimension_numbers<[1], [0], [0], [1], [0, 0, 1, 1], [], []>} : vector<48x32xbf16>, vector<32x128xbf16>, vector<48x128xf32> -> vector<48x128xf32>
    %c17 = arith.constant 17 : index
    %c0_84 = arith.constant 0 : index
    %289 = vector.load %arg6[%c17, %c0_84] : memref<19x128xf32, #tpu.memory_space<vmem>>, vector<1x128xf32>
    %290 = vector.broadcast %289 : vector<1x128xf32> to vector<48x128xf32>
    %291 = arith.addf %288, %290 : vector<48x128xf32>
    %cst_85 = arith.constant 5.000000e-01 : f32
    %292 = vector.broadcast %cst_85 : f32 to vector<48x128xf32>
    %293 = arith.mulf %292, %291 : vector<48x128xf32>
    %cst_86 = arith.constant 4.471500e-02 : f32
    %294 = vector.broadcast %cst_86 : f32 to vector<48x128xf32>
    %295 = arith.mulf %294, %291 : vector<48x128xf32>
    %296 = arith.mulf %295, %291 : vector<48x128xf32>
    %297 = arith.mulf %296, %291 : vector<48x128xf32>
    %298 = arith.addf %291, %297 : vector<48x128xf32>
    %cst_87 = arith.constant 0.797884583 : f32
    %299 = vector.broadcast %cst_87 : f32 to vector<48x128xf32>
    %300 = arith.mulf %299, %298 : vector<48x128xf32>
    %301 = math.tanh %300 : vector<48x128xf32>
    %cst_88 = arith.constant 1.000000e+00 : f32
    %302 = vector.broadcast %cst_88 : f32 to vector<48x128xf32>
    %303 = arith.addf %302, %301 : vector<48x128xf32>
    %304 = arith.mulf %293, %303 : vector<48x128xf32>
    %305 = arith.truncf %304 : vector<48x128xf32> to vector<48x128xbf16>
    %c240 = arith.constant 240 : index
    %c0_89 = arith.constant 0 : index
    %306 = vector.load %arg4[%c240, %c0_89] : memref<368x32xbf16, #tpu.memory_space<vmem>>, vector<128x32xbf16>
    %cst_90 = arith.constant dense<0.000000e+00> : vector<48x32xf32>
    %307 = tpu.matmul %305, %306, %cst_90 {dimension_numbers = #tpu.dot_dimension_numbers<[1], [0], [0], [1], [0, 0, 1, 1], [], []>} : vector<48x128xbf16>, vector<128x32xbf16>, vector<48x32xf32> -> vector<48x32xf32>
    %c18 = arith.constant 18 : index
    %c0_91 = arith.constant 0 : index
    %308 = vector.load %arg6[%c18, %c0_91] : memref<19x128xf32, #tpu.memory_space<vmem>>, vector<1x32xf32>
    %309 = vector.broadcast %308 : vector<1x32xf32> to vector<48x32xf32>
    %310 = arith.addf %307, %309 : vector<48x32xf32>
    %311 = arith.addf %261, %310 : vector<48x32xf32>
    %c0_92 = arith.constant 0 : index
    %c0_93 = arith.constant 0 : index
    %312 = vector.load %arg6[%c0_92, %c0_93] : memref<19x128xf32, #tpu.memory_space<vmem>>, vector<1x32xf32>
    %c1 = arith.constant 1 : index
    %c0_94 = arith.constant 0 : index
    %313 = vector.load %arg6[%c1, %c0_94] : memref<19x128xf32, #tpu.memory_space<vmem>>, vector<1x32xf32>
    %cst_95 = arith.constant dense<0.000000e+00> : vector<48xf32>
    %314 = vector.multi_reduction <add>, %311, %cst_95 [1] : vector<48x32xf32> to vector<48xf32>
    %315 = vector.shape_cast %314 : vector<48xf32> to vector<48x1xf32>
    %cst_96 = arith.constant 3.200000e+01 : f32
    %316 = vector.broadcast %cst_96 : f32 to vector<48x1xf32>
    %317 = arith.divf %315, %316 : vector<48x1xf32>
    %318 = vector.broadcast %317 : vector<48x1xf32> to vector<48x32xf32>
    %319 = arith.subf %311, %318 : vector<48x32xf32>
    %320 = arith.mulf %319, %319 : vector<48x32xf32>
    %cst_97 = arith.constant dense<0.000000e+00> : vector<48xf32>
    %321 = vector.multi_reduction <add>, %320, %cst_97 [1] : vector<48x32xf32> to vector<48xf32>
    %322 = vector.shape_cast %321 : vector<48xf32> to vector<48x1xf32>
    %cst_98 = arith.constant 3.200000e+01 : f32
    %323 = vector.broadcast %cst_98 : f32 to vector<48x1xf32>
    %324 = arith.divf %322, %323 : vector<48x1xf32>
    %325 = vector.broadcast %317 : vector<48x1xf32> to vector<48x32xf32>
    %326 = arith.subf %311, %325 : vector<48x32xf32>
    %cst_99 = arith.constant 9.99999997E-7 : f32
    %327 = vector.broadcast %cst_99 : f32 to vector<48x1xf32>
    %328 = arith.addf %324, %327 : vector<48x1xf32>
    %329 = math.rsqrt %328 : vector<48x1xf32>
    %330 = vector.broadcast %329 : vector<48x1xf32> to vector<48x32xf32>
    %331 = arith.mulf %326, %330 : vector<48x32xf32>
    %332 = vector.broadcast %312 : vector<1x32xf32> to vector<48x32xf32>
    %333 = arith.mulf %331, %332 : vector<48x32xf32>
    %334 = vector.broadcast %313 : vector<1x32xf32> to vector<48x32xf32>
    %335 = arith.addf %333, %334 : vector<48x32xf32>
    %c64_100 = arith.constant 64 : index
    %c0_101 = arith.constant 0 : index
    %336 = vector.load %arg5[%c64_100, %c0_101] : memref<96x128xbf16, #tpu.memory_space<vmem>>, vector<32x128xbf16>
    %337 = arith.truncf %335 : vector<48x32xf32> to vector<48x32xbf16>
    %cst_102 = arith.constant dense<0.000000e+00> : vector<48x128xf32>
    %338 = tpu.matmul %337, %336, %cst_102 {dimension_numbers = #tpu.dot_dimension_numbers<[1], [0], [0], [1], [0, 0, 1, 1], [], []>} : vector<48x32xbf16>, vector<32x128xbf16>, vector<48x128xf32> -> vector<48x128xf32>
    %c2 = arith.constant 2 : index
    %c0_103 = arith.constant 0 : index
    %339 = vector.load %arg6[%c2, %c0_103] : memref<19x128xf32, #tpu.memory_space<vmem>>, vector<1x128xf32>
    %340 = vector.broadcast %339 : vector<1x128xf32> to vector<48x128xf32>
    %341 = arith.addf %338, %340 : vector<48x128xf32>
    %c0_104 = arith.constant 0 : index
    %c0_105 = arith.constant 0 : index
    %342 = vector.load %arg7[%c0_104, %c0_105] : memref<48x128xf32, #tpu.memory_space<vmem>>, vector<48x128xf32>
    tpu.vector_store %arg7[%c0_104, %c0_105], %341 {strides = array<i32>} : memref<48x128xf32, #tpu.memory_space<vmem>>, vector<48x128xf32>,
    return
  }
}

</mosaic_0001>

<bundles_post_ra>
// kernel: vit_forward.1
= control target key start
LH: loop header
LB: loop body
LE: loop exit
PB: predicated region body
PF: predicated region fallthrough
CT: control target
= control target key end

     0   :  { %vm78_vm0 = vcmask 392192   ;;  %vm120_vm1 = vcmask 261120   ;;  %v4077_v30 = vmov 32.0   ;;  %s4078_s10 = smov 120   ;;  %s4079_s11 = smov 112   ;;  %s5725_s4 = inlined_call_operand.vmem [shape: bf16[368,32], index: 4, kind: input, shape index: {}]   ;;  %s5726_s0 = inlined_call_operand.vmem [shape: bf16[48,48], index: 0, kind: input, shape index: {}]   ;;  %s5727_s1 = inlined_call_operand.vmem [shape: f32[48,32], index: 1, kind: input, shape index: {}]   ;;  %s5728_s6 = inlined_call_operand.vmem [shape: f32[19,128], index: 6, kind: input, shape index: {}]   ;;  %s5729_s3 = inlined_call_operand.vmem [shape: bf16[64,96], index: 3, kind: input, shape index: {}]   ;;  %s5730_s2 = inlined_call_operand.vmem [shape: f32[48,48], index: 2, kind: input, shape index: {}]   ;;  %s5731_s5 = inlined_call_operand.vmem [shape: bf16[96,128], index: 5, kind: input, shape index: {}]   ;;  %s5732_s7 = inlined_call_operand.vmem [shape: f32[48,128], index: 7, kind: output, shape index: {}]  }
   0x1   :  { %v3738_v0 = vld [vmem:[%s5725_s4 + $0x10] sm:$0xff]  ;;  %v3737_v1 = vld [vmem:[%s5725_s4 + $0x8] sm:$0xff]  ;;  %v3736_v2 = vld [vmem:[%s5725_s4] sm:$0xff]  ;;  %3793 = vrcp.f32 %v4077_v30  ;;  %s4080_s12 = smov 104   ;;  %s4081_s13 = smov 96  }
   0x2   :  { %93 = vmatpush.bf16.msra.mxu0 %v3738_v0  ;;  %v3739_v3 = vld [vmem:[%s5726_s0] sm:$0xff]  ;;  %v3740_v4 = vld [vmem:[%s5726_s0 + $0x8] sm:$0xff]  ;;  %v3741_v5 = vld [vmem:[%s5726_s0 + $0x10] sm:$0xff]  ;;  %s4082_s14 = smov 64  }
   0x3   :  { %v39_v6 = vld [vmem:[%s5727_s1] sm:$0xff]  ;;  %v40_v10 = vld [vmem:[%s5727_s1 + $0x8] sm:$0xff]  ;;  %v41_v14 = vld [vmem:[%s5727_s1 + $0x10] sm:$0xff] }
   0x4   :  { %v42_v18 = vld [vmem:[%s5727_s1 + $0x18] sm:$0xff]  ;;  %v43_v22 = vld [vmem:[%s5727_s1 + $0x20] sm:$0xff]  ;;  %v44_v26 = vld [vmem:[%s5727_s1 + $0x28] sm:$0xff] }
   0x6   :  { %94 = vmatpush.bf16.msra.mxu0 %v3737_v1 }
   0x7   :  { %v3794_v31 = vpop.eup %3793 }
   0x8   :  { %v140_v32 = vmul.f32 32.0, %v3794_v31  ;;  %vm144_vm2 = vweird.f32 %v3794_v31 }
   0xa   :  { %95 = vmatpush.bf16.msra.mxu0 %v3736_v2  ;;  %v141_v33 = vsub.f32 1.0, %v140_v32 }
   0xc   :  { %v142_v34 = vmul.f32 %v3794_v31, %v141_v33 }
   0xd   :  { %3542 = vmatmul.msk.bf16.vlgmr.msra.gmra.mxu0 %vm78_vm0, %v3739_v3  ;;  %v3743_v3 = vld [vmem:[%s5729_s3 + $0x8] sm:$0xff] }
   0xe   :  { %v143_v35 = vadd.f32 %v3794_v31, %v142_v34  ;;  %310 = vmatpush.bf16.msra.mxu1 %v3743_v3 }
  0x10   :  { %v4186_v36 = vsel %vm144_vm2, %v3794_v31, %v143_v35 }
  0x1d   :  { %3543 = vmatmul.msk.bf16.gmra.mxu0 %vm78_vm0, %v3740_v4 }
  0x2d   :  { %3544 = vmatmul.msk.bf16.gmra.mxu0 %vm78_vm0, %v3741_v5 }
  0x8a   :  { %v97_v7 = vpop.f32.mrf.mxu0 }
  0x8b   :  { %v4147_v8 = vadd.f32 %v97_v7, %v39_v6  ;;  %v3742_v6 = vld [vmem:[%s5729_s3] sm:$0xff] }
  0x8c   :  { %311 = vmatpush.bf16.msra.mxu1 %v3742_v6 }
  0x8d   :  { %v121_v9 = vsel %vm120_vm1, %v4147_v8, 0.0 }
  0x8e   :  { %122 = vadd.xlane.f32.xlu0 %v121_v9 }
  0x92   :  { %v99_v11 = vpop.f32.mrf.mxu0 }
  0x93   :  { %v4154_v12 = vadd.f32 %v99_v11, %v40_v10 }
  0x95   :  { %v124_v13 = vsel %vm120_vm1, %v4154_v12, 0.0 }
  0x96   :  { %125 = vadd.xlane.f32.xlu0 %v124_v13 }
  0x9a   :  { %v102_v15 = vpop.f32.mrf.mxu0 }
  0x9b   :  { %v4161_v16 = vadd.f32 %v102_v15, %v41_v14 }
  0x9d   :  { %v127_v17 = vsel %vm120_vm1, %v4161_v16, 0.0 }
  0x9e   :  { %128 = vadd.xlane.f32.xlu1 %v127_v17 }
  0xa2   :  { %v104_v19 = vpop.f32.mrf.mxu0 }
  0xa3   :  { %v4168_v20 = vadd.f32 %v104_v19, %v42_v18 }
  0xa5   :  { %v130_v21 = vsel %vm120_vm1, %v4168_v20, 0.0 }
  0xa6   :  { %131 = vadd.xlane.f32.xlu1 %v130_v21 }
  0xaa   :  { %v107_v23 = vpop.f32.mrf.mxu0 }
  0xab   :  { %v4175_v24 = vadd.f32 %v107_v23, %v43_v22 }
  0xad   :  { %v133_v25 = vsel %vm120_vm1, %v4175_v24, 0.0 }
  0xae   :  { %134 = vadd.xlane.f32.xlu2 %v133_v25 }
  0xb2   :  { %v109_v27 = vpop.f32.mrf.mxu0 }
  0xb3   :  { %v4182_v28 = vadd.f32 %v109_v27, %v44_v26 }
  0xb5   :  { %v136_v29 = vsel %vm120_vm1, %v4182_v28, 0.0 }
  0xb6   :  { %137 = vadd.xlane.f32.xlu2 %v136_v29 }
 0x101   :  { %v123_v37 = vpop.xlane.xlu0 %122 }
 0x102   :  { %v146_v38 = vmul.f32 %v4186_v36, %v123_v37 }
 0x104   :  { %v4190_v39 = vsub.f32 %v4147_v8, %v146_v38  ;;  %v4244_v38 = vld [vmem:[%s5728_s6 + $0x3] ss:$0 sm:$0xff] }
 0x106   :  { %v158_v40 = vmul.f32 %v4190_v39, %v4190_v39 }
 0x108   :  { %v164_v41 = vsel %vm120_vm1, %v158_v40, 0.0 }
 0x109   :  { %165 = vadd.xlane.f32.xlu0 %v164_v41  ;;  %v126_v42 = vpop.xlane.xlu0 %125 }
 0x10a   :  { %v147_v43 = vmul.f32 %v4186_v36, %v126_v42 }
 0x10c   :  { %v4197_v44 = vsub.f32 %v4154_v12, %v147_v43 }
 0x10e   :  { %v159_v45 = vmul.f32 %v4197_v44, %v4197_v44 }
 0x110   :  { %v167_v46 = vsel %vm120_vm1, %v159_v45, 0.0 }
 0x111   :  { %v129_v47 = vpop.xlane.xlu1 %128  ;;  %168 = vadd.xlane.f32.xlu1 %v167_v46 }
 0x112   :  { %v148_v48 = vmul.f32 %v4186_v36, %v129_v47 }
 0x114   :  { %v4204_v49 = vsub.f32 %v4161_v16, %v148_v48 }
 0x116   :  { %v160_v50 = vmul.f32 %v4204_v49, %v4204_v49 }
 0x118   :  { %v170_v51 = vsel %vm120_vm1, %v160_v50, 0.0 }
 0x119   :  { %171 = vadd.xlane.f32.xlu2 %v170_v51  ;;  %v132_v52 = vpop.xlane.xlu1 %131 }
 0x11a   :  { %v149_v53 = vmul.f32 %v4186_v36, %v132_v52 }
 0x11c   :  { %v4211_v54 = vsub.f32 %v4168_v20, %v149_v53 }
 0x11e   :  { %v161_v55 = vmul.f32 %v4211_v54, %v4211_v54 }
 0x120   :  { %v173_v56 = vsel %vm120_vm1, %v161_v55, 0.0 }
 0x121   :  { %v135_v57 = vpop.xlane.xlu2 %134  ;;  %174 = vadd.xlane.f32.xlu0 %v173_v56 }
 0x122   :  { %v150_v58 = vmul.f32 %v4186_v36, %v135_v57 }
 0x124   :  { %v4218_v59 = vsub.f32 %v4175_v24, %v150_v58 }
 0x126   :  { %v162_v60 = vmul.f32 %v4218_v59, %v4218_v59 }
 0x128   :  { %v176_v61 = vsel %vm120_vm1, %v162_v60, 0.0 }
 0x129   :  { %v138_v62 = vpop.xlane.xlu2 %137  ;;  %177 = vadd.xlane.f32.xlu1 %v176_v61 }
 0x12a   :  { %v151_v63 = vmul.f32 %v4186_v36, %v138_v62 }
 0x12c   :  { %v4225_v0 = vsub.f32 %v4182_v28, %v151_v63 }
 0x12e   :  { %v163_v1 = vmul.f32 %v4225_v0, %v4225_v0 }
 0x130   :  { %v179_v2 = vsel %vm120_vm1, %v163_v1, 0.0 }
 0x131   :  { %180 = vadd.xlane.f32.xlu2 %v179_v2 }
 0x17c   :  { %v166_v4 = vpop.xlane.xlu0 %165 }
 0x17d   :  { %v182_v5 = vmul.f32 %v166_v4, %v4186_v36 }
 0x17f   :  { %v188_v7 = vadd.f32 1e-06, %v182_v5 }
 0x181   :  { %3795 = vrsqrt.f32 %v188_v7  ;;  %vm200_vm4 = vweird.f32 %v188_v7 }
 0x184   :  { %v169_v9 = vpop.xlane.xlu1 %168 }
 0x185   :  { %v183_v10 = vmul.f32 %v169_v9, %v4186_v36 }
 0x187   :  { %v3796_v11 = vpop.eup %3795  ;;  %v189_v13 = vadd.f32 1e-06, %v183_v10 }
 0x188   :  { %v195_v14 = vmul.f32 %v3796_v11, %v188_v7  ;;  %vm201_vm3 = vweird.f32 %v3796_v11 }
 0x189   :  { %3797 = vrsqrt.f32 %v189_v13  ;;  %vm202_vm5 = vmor %vm200_vm4, %vm201_vm3  ;;  %vm210_vm7 = vweird.f32 %v189_v13 }
 0x18a   :  { %v196_v15 = vmul.f32 %v3796_v11, %v195_v14 }
 0x18c   :  { %v197_v17 = vmul.f32 0.5, %v196_v15  ;;  %v172_v18 = vpop.xlane.xlu2 %171 }
 0x18d   :  { %v184_v19 = vmul.f32 %v172_v18, %v4186_v36 }
 0x18e   :  { %v198_v21 = vsub.f32 1.5, %v197_v17 }
 0x18f   :  { %v3798_v22 = vpop.eup %3797  ;;  %v190_v23 = vadd.f32 1e-06, %v184_v19 }
 0x190   :  { %v199_v25 = vmul.f32 %v3796_v11, %v198_v21  ;;  %v205_v26 = vmul.f32 %v3798_v22, %v189_v13  ;;  %vm211_vm6 = vweird.f32 %v3798_v22 }
 0x191   :  { %3799 = vrsqrt.f32 %v190_v23  ;;  %vm212_vm8 = vmor %vm210_vm7, %vm211_vm6  ;;  %vm220_vm10 = vweird.f32 %v190_v23  ;;  %vm391_vm7 = vcmask 64512  }
 0x192   :  { %v206_v27 = vmul.f32 %v3798_v22, %v205_v26  ;;  %v203_v29 = vsel %vm202_vm5, %v3796_v11, %v199_v25 }
 0x193   :  { %v254_v37 = vmul.f32 %v203_v29, %v4190_v39  ;;  %v4251_v39 = vld [vmem:[%s5728_s6 + $0x4] ss:$0 sm:$0xff] }
 0x194   :  { %v207_v30 = vmul.f32 0.5, %v206_v27  ;;  %v175_v31 = vpop.xlane.xlu0 %174 }
 0x195   :  { %v185_v32 = vmul.f32 %v175_v31, %v4186_v36  ;;  %v261_v46 = vmul.f32 %v4244_v38, %v254_v37 }
 0x196   :  { %v208_v33 = vsub.f32 1.5, %v207_v30 }
 0x197   :  { %v3800_v34 = vpop.eup %3799  ;;  %v191_v35 = vadd.f32 1e-06, %v185_v32  ;;  %v268_v56 = vadd.f32 %v4251_v39, %v261_v46 }
 0x198   :  { %v209_v40 = vmul.f32 %v3798_v22, %v208_v33  ;;  %v215_v41 = vmul.f32 %v3800_v34, %v190_v23  ;;  %vm221_vm9 = vweird.f32 %v3800_v34 }
 0x199   :  { %3801 = vrsqrt.f32 %v191_v35  ;;  %vm222_vm11 = vmor %vm220_vm10, %vm221_vm9  ;;  %vm230_vm13 = vweird.f32 %v191_v35 }
 0x19a   :  { %v213_v42 = vsel %vm212_vm8, %v3798_v22, %v209_v40  ;;  %v216_v43 = vmul.f32 %v3800_v34, %v215_v41  ;;  %vm1183_vm8 = vcmask 1043456  }
 0x19b   :  { %v255_v45 = vmul.f32 %v213_v42, %v4197_v44 }
 0x19c   :  { %v217_v47 = vmul.f32 0.5, %v216_v43  ;;  %v178_v48 = vpop.xlane.xlu1 %177 }
 0x19d   :  { %v186_v50 = vmul.f32 %v178_v48, %v4186_v36  ;;  %v262_v51 = vmul.f32 %v4244_v38, %v255_v45 }
 0x19e   :  { %v218_v52 = vsub.f32 1.5, %v217_v47 }
 0x19f   :  { %v3802_v53 = vpop.eup %3801  ;;  %v192_v55 = vadd.f32 1e-06, %v186_v50  ;;  %v269_v44 = vadd.f32 %v4251_v39, %v262_v51 }
 0x1a0   :  { %v219_v57 = vmul.f32 %v3800_v34, %v218_v52  ;;  %v225_v58 = vmul.f32 %v3802_v53, %v191_v35  ;;  %vm231_vm12 = vweird.f32 %v3802_v53 }
 0x1a1   :  { %3803 = vrsqrt.f32 %v192_v55  ;;  %v274_v60 = vpack.c.bf16 %v269_v44, %v268_v56  ;;  %vm232_vm14 = vmor %vm230_vm13, %vm231_vm12  ;;  %vm240_vm2 = vweird.f32 %v192_v55 }
 0x1a2   :  { %v226_v61 = vmul.f32 %v3802_v53, %v225_v58  ;;  %v223_v62 = vsel %vm222_vm11, %v3800_v34, %v219_v57 }
 0x1a3   :  { %3553 = vmatmul.msk.bf16.vlgmr.msra.gmra.mxu1 %vm120_vm1, %v274_v60  ;;  %v256_v6 = vmul.f32 %v223_v62, %v4204_v49 }
 0x1a4   :  { %v227_v63 = vmul.f32 0.5, %v226_v61  ;;  %v181_v1 = vpop.xlane.xlu2 %180 }
 0x1a5   :  { %v187_v2 = vmul.f32 %v181_v1, %v4186_v36  ;;  %v263_v14 = vmul.f32 %v4244_v38, %v256_v6 }
 0x1a6   :  { %v228_v3 = vsub.f32 1.5, %v227_v63 }
 0x1a7   :  { %v3804_v4 = vpop.eup %3803  ;;  %v193_v5 = vadd.f32 1e-06, %v187_v2  ;;  %v270_v21 = vadd.f32 %v4251_v39, %v263_v14 }
 0x1a8   :  { %v229_v7 = vmul.f32 %v3802_v53, %v228_v3  ;;  %v235_v9 = vmul.f32 %v3804_v4, %v192_v55  ;;  %vm241_vm15 = vweird.f32 %v3804_v4 }
 0x1a9   :  { %3805 = vrsqrt.f32 %v193_v5  ;;  %vm242_vm3 = vmor %vm240_vm2, %vm241_vm15  ;;  %vm250_vm5 = vweird.f32 %v193_v5 }
 0x1aa   :  { %v233_v10 = vsel %vm232_vm14, %v3802_v53, %v229_v7  ;;  %v236_v11 = vmul.f32 %v3804_v4, %v235_v9 }
 0x1ab   :  { %v257_v13 = vmul.f32 %v233_v10, %v4211_v54 }
 0x1ac   :  { %v237_v15 = vmul.f32 0.5, %v236_v11 }
 0x1ad   :  { %v264_v17 = vmul.f32 %v4244_v38, %v257_v13 }
 0x1ae   :  { %v238_v18 = vsub.f32 1.5, %v237_v15 }
 0x1af   :  { %v3806_v19 = vpop.eup %3805  ;;  %v271_v49 = vadd.f32 %v4251_v39, %v264_v17 }
 0x1b0   :  { %v239_v22 = vmul.f32 %v3804_v4, %v238_v18  ;;  %v245_v23 = vmul.f32 %v3806_v19, %v193_v5  ;;  %vm251_vm4 = vweird.f32 %v3806_v19 }
 0x1b1   :  { %v275_v25 = vpack.c.bf16 %v271_v49, %v270_v21  ;;  %vm252_vm6 = vmor %vm250_vm5, %vm251_vm4 }
 0x1b2   :  { %v246_v26 = vmul.f32 %v3806_v19, %v245_v23  ;;  %v243_v54 = vsel %vm242_vm3, %v3804_v4, %v239_v22 }
 0x1b3   :  { %3554 = vmatmul.msk.bf16.gmra.mxu1 %vm120_vm1, %v275_v25  ;;  %v258_v30 = vmul.f32 %v243_v54, %v4218_v59  ;;  %v3776_v59 = vld [vmem:[%s5728_s6 + $0x5] ss:$0 sm:$0xff] }
 0x1b4   :  { %v247_v27 = vmul.f32 0.5, %v246_v26 }
 0x1b5   :  { %v265_v34 = vmul.f32 %v4244_v38, %v258_v30 }
 0x1b6   :  { %v248_v29 = vsub.f32 1.5, %v247_v27 }
 0x1b7   :  { %v272_v37 = vadd.f32 %v4251_v39, %v265_v34 }
 0x1b8   :  { %v249_v31 = vmul.f32 %v3806_v19, %v248_v29 }
 0x1ba   :  { %v253_v32 = vsel %vm252_vm6, %v3806_v19, %v249_v31 }
 0x1bb   :  { %v259_v33 = vmul.f32 %v253_v32, %v4225_v0 }
 0x1bd   :  { %v266_v35 = vmul.f32 %v4244_v38, %v259_v33 }
 0x1bf   :  { %v273_v40 = vadd.f32 %v4251_v39, %v266_v35 }
 0x1c1   :  { %v276_v41 = vpack.c.bf16 %v273_v40, %v272_v37 }
 0x1c3   :  { %3555 = vmatmul.msk.bf16.gmra.mxu1 %vm120_vm1, %v276_v41 }
 0x220   :  { %v313_v42 = vpop.f32.mrf.mxu1 }
 0x221   :  { %v314_v38 = vadd.f32 %v3776_v59, %v313_v42 }
 0x223   :  { %v4277_v48 = vpack.c.bf16 %v314_v38, %v314_v38 }
 0x225   :  { %v376_v22 = vunpack.c.l.b16 %v4277_v48 }
 0x228   :  { %v315_v43 = vpop.f32.mrf.mxu1 }
 0x229   :  { %v316_v57 = vadd.f32 %v3776_v59, %v315_v43 }
 0x22b   :  { %v329_v58 = vpack.c.bf16 %v316_v57, %v316_v57 }
 0x22d   :  { %v377_v19 = vunpack.c.l.b16 %v329_v58 }
 0x22f   :  { %v382_v30 = vpack.c.b16 %v377_v19, %v376_v22 }
 0x230   :  { %v318_v45 = vpop.f32.mrf.mxu1 }
 0x231   :  { %v319_v46 = vadd.f32 %v3776_v59, %v318_v45 }
 0x233   :  { %v330_v0 = vpack.c.bf16 %v319_v46, %v319_v46 }
 0x235   :  { %344 = vrot.lane.b32.xlu2 %v330_v0, %s4078_s10  ;;  %v378_v1 = vunpack.c.l.b16 %v330_v0 }
 0x238   :  { %v320_v47 = vpop.f32.mrf.mxu1 }
 0x239   :  { %v321_v52 = vadd.f32 %v3776_v59, %v320_v47 }
 0x23b   :  { %v331_v56 = vpack.c.bf16 %v321_v52, %v321_v52 }
 0x23d   :  { %340 = vrot.lane.b32.xlu2 %v4277_v48, %s4078_s10  ;;  %v379_v63 = vunpack.c.l.b16 %v331_v56 }
 0x23f   :  { %v4303_v2 = vpack.c.b16 %v379_v63, %v378_v1 }
 0x240   :  { %v323_v39 = vpop.f32.mrf.mxu1 }
 0x241   :  { %v324_v50 = vadd.f32 %v3776_v59, %v323_v39 }
 0x243   :  { %v332_v51 = vpack.c.bf16 %v324_v50, %v324_v50 }
 0x245   :  { %348 = vrot.lane.b32.xlu0 %v332_v51, %s4078_s10  ;;  %356 = vrot.lane.b32.xlu2 %v330_v0, %s4079_s11  ;;  %v380_v61 = vunpack.c.l.b16 %v332_v51 }
 0x248   :  { %v325_v53 = vpop.f32.mrf.mxu1 }
 0x249   :  { %v326_v55 = vadd.f32 %v3776_v59, %v325_v53 }
 0x24b   :  { %v333_v44 = vpack.c.bf16 %v326_v55, %v326_v55 }
 0x24d   :  { %350 = vrot.lane.b32.xlu1 %v333_v44, %s4078_s10  ;;  %346 = vrot.lane.b32.xlu0 %v331_v56, %s4078_s10  ;;  %v381_v60 = vunpack.c.l.b16 %v333_v44 }
 0x24e   :  { %362 = vrot.lane.b32.xlu2 %v333_v44, %s4079_s11 }
 0x24f   :  { %v4298_v62 = vpack.c.b16 %v381_v60, %v380_v61 }
 0x255   :  { %342 = vrot.lane.b32.xlu1 %v329_v58, %s4078_s10  ;;  %360 = vrot.lane.b32.xlu0 %v332_v51, %s4079_s11 }
 0x256   :  { %370 = vrot.lane.b32.xlu2 %v331_v56, %s4080_s12 }
 0x25d   :  { %372 = vrot.lane.b32.xlu1 %v332_v51, %s4080_s12  ;;  %374 = vrot.lane.b32.xlu0 %v333_v44, %s4080_s12 }
 0x25e   :  { %364 = vrot.lane.b32.xlu2 %v4277_v48, %s4080_s12 }
 0x265   :  { %358 = vrot.lane.b32.xlu1 %v331_v56, %s4079_s11  ;;  %368 = vrot.lane.b32.xlu0 %v330_v0, %s4080_s12 }
 0x26d   :  { %352 = vrot.lane.b32.xlu1 %v4277_v48, %s4079_s11  ;;  %354 = vrot.lane.b32.xlu0 %v329_v58, %s4079_s11 }
 0x275   :  { %366 = vrot.lane.b32.xlu1 %v329_v58, %s4080_s12  ;;  %389 = vrot.lane.b32.xlu0 %v4298_v62, %s4081_s13 }
 0x27d   :  { %387 = vrot.lane.b32.xlu1 %v4303_v2, %s4081_s13 }
 0x28f   :  { %v345_v3 = vpop.permute.xlu2 %344 }
 0x290   :  { %v436_v10 = vunpack.c.l.b16 %v345_v3 }
 0x297   :  { %v341_v4 = vpop.permute.xlu2 %340 }
 0x298   :  { %v434_v23 = vunpack.c.l.b16 %v341_v4 }
 0x29f   :  { %v357_v6 = vpop.permute.xlu2 %356 }
 0x2a0   :  { %v493_v42 = vunpack.c.l.b16 %v357_v6 }
 0x2a8   :  { %v363_v18 = vpop.permute.xlu2 %362 }
 0x2a9   :  { %v496_v25 = vunpack.c.l.b16 %v363_v18 }
 0x2b0   :  { %v371_v37 = vpop.permute.xlu2 %370 }
 0x2b1   :  { %v551_v43 = vunpack.c.l.b16 %v371_v37 }
 0x2b7   :  { %v349_v5 = vpop.permute.xlu0 %348 }
 0x2b8   :  { %v438_v11 = vunpack.c.l.b16 %v349_v5  ;;  %v365_v51 = vpop.permute.xlu2 %364 }
 0x2b9   :  { %v548_v55 = vunpack.c.l.b16 %v365_v51 }
 0x2bf   :  { %v351_v7 = vpop.permute.xlu1 %350  ;;  %v347_v9 = vpop.permute.xlu0 %346 }
 0x2c0   :  { %v439_v13 = vunpack.c.l.b16 %v351_v7  ;;  %v437_v14 = vunpack.c.l.b16 %v347_v9 }
 0x2c2   :  { %v4307_v15 = vpack.c.b16 %v439_v13, %v438_v11  ;;  %v4309_v17 = vpack.c.b16 %v437_v14, %v436_v10 }
 0x2c4   :  { %447 = vrot.lane.b32.xlu2 %v4307_v15, %s4081_s13  ;;  %445 = vrot.lane.b32.xlu0 %v4309_v17, %s4081_s13 }
 0x2c7   :  { %v343_v21 = vpop.permute.xlu1 %342  ;;  %v361_v49 = vpop.permute.xlu0 %360 }
 0x2c8   :  { %v435_v26 = vunpack.c.l.b16 %v343_v21  ;;  %v495_v54 = vunpack.c.l.b16 %v361_v49 }
 0x2ca   :  { %v4316_v27 = vpack.c.b16 %v435_v26, %v434_v23  ;;  %v4318_v29 = vpack.c.b16 %v496_v25, %v495_v54 }
 0x2cc   :  { %385 = vrot.lane.b32.xlu2 %v382_v30, %s4081_s13  ;;  %504 = vrot.lane.b32.xlu0 %v4318_v29, %s4081_s13 }
 0x2cd   :  { %443 = vrot.lane.b32.xlu1 %v4316_v27, %s4081_s13 }
 0x2cf   :  { %v373_v31 = vpop.permute.xlu1 %372  ;;  %v375_v32 = vpop.permute.xlu0 %374 }
 0x2d0   :  { %v552_v33 = vunpack.c.l.b16 %v373_v31  ;;  %v553_v34 = vunpack.c.l.b16 %v375_v32 }
 0x2d2   :  { %v4325_v35 = vpack.c.b16 %v553_v34, %v552_v33  ;;  %v112_v33 = vld [vmem:[%s5730_s2] sm:$0xff] }
 0x2d4   :  { %561 = vrot.lane.b32.xlu2 %v4325_v35, %s4081_s13 }
 0x2d7   :  { %v359_v40 = vpop.permute.xlu1 %358  ;;  %v369_v41 = vpop.permute.xlu0 %368 }
 0x2d8   :  { %v494_v59 = vunpack.c.l.b16 %v359_v40  ;;  %v550_v45 = vunpack.c.l.b16 %v369_v41 }
 0x2da   :  { %v4329_v46 = vpack.c.b16 %v494_v59, %v493_v42  ;;  %v4331_v0 = vpack.c.b16 %v551_v43, %v550_v45  ;;  %v4414_v45 = vld [vmem:[%s5730_s2 + $0x10] sm:$0xff] }
 0x2dc   :  { %559 = vrot.lane.b32.xlu0 %v4331_v0, %s4081_s13  ;;  %502 = vrot.lane.b32.xlu1 %v4329_v46, %s4081_s13 }
 0x2df   :  { %v353_v38 = vpop.permute.xlu1 %352  ;;  %v355_v47 = vpop.permute.xlu0 %354 }
 0x2e0   :  { %v491_v48 = vunpack.c.l.b16 %v353_v38  ;;  %v492_v39 = vunpack.c.l.b16 %v355_v47 }
 0x2e2   :  { %v4337_v50 = vpack.c.b16 %v492_v39, %v491_v48  ;;  %v4424_v39 = vld [vmem:[%s5730_s2 + $0x18] sm:$0xff] }
 0x2e4   :  { %500 = vrot.lane.b32.xlu2 %v4337_v50, %s4081_s13  ;;  %958 = vrot.lane.b32.xlu0 %v4303_v2, %s4082_s14 }
 0x2e7   :  { %v367_v52 = vpop.permute.xlu1 %366  ;;  %v390_v53 = vpop.permute.xlu0 %389 }
 0x2e8   :  { %v549_v56 = vunpack.c.l.b16 %v367_v52  ;;  %v408_v44 = vsel %vm391_vm7, %v390_v53, 0 }
 0x2e9   :  { %415 = vmatpush.bf16.xpose.msra.mxu2 %v408_v44 }
 0x2ea   :  { %v4344_v57 = vpack.c.b16 %v549_v56, %v548_v55 }
 0x2ec   :  { %960 = vrot.lane.b32.xlu2 %v4298_v62, %s4082_s14  ;;  %956 = vrot.lane.b32.xlu0 %v382_v30, %s4082_s14 }
 0x2ed   :  { %557 = vrot.lane.b32.xlu1 %v4344_v57, %s4081_s13 }
 0x2ef   :  { %v388_v58 = vpop.permute.xlu1 %387 }
 0x2f0   :  { %v405_v60 = vsel %vm391_vm7, %v388_v58, 0  ;;  %v4434_v58 = vld [vmem:[%s5730_s2 + $0x20] sm:$0xff] }
 0x2f1   :  { %416 = vmatpush.bf16.xpose.msra.mxu2 %v405_v60 }
 0x2f4   :  { %1015 = vrot.lane.b32.xlu2 %v4309_v17, %s4082_s14  ;;  %1072 = vrot.lane.b32.xlu0 %v4329_v46, %s4082_s14 }
 0x2f5   :  { %1013 = vrot.lane.b32.xlu1 %v4316_v27, %s4082_s14 }
 0x2fc   :  { %1131 = vrot.lane.b32.xlu2 %v4325_v35, %s4082_s14 }
 0x2fd   :  { %1017 = vrot.lane.b32.xlu1 %v4307_v15, %s4082_s14 }
 0x305   :  { %1074 = vrot.lane.b32.xlu1 %v4318_v29, %s4082_s14 }
 0x31e   :  { %v448_v61 = vpop.permute.xlu2 %447 }
 0x31f   :  { %v465_v63 = vsel %vm391_vm7, %v448_v61, 0 }
 0x320   :  { %472 = vmatpush.bf16.xpose.msra.mxu3 %v465_v63 }
 0x326   :  { %v386_v1 = vpop.permute.xlu2 %385 }
 0x327   :  { %v402_v3 = vsel %vm391_vm7, %v386_v1, 0 }
 0x328   :  { %417 = vmatpush.bf16.xpose.msra.mxu2 %v402_v3 }
 0x32e   :  { %v562_v4 = vpop.permute.xlu2 %561 }
 0x32f   :  { %3556 = vmatmul.msk.bf16.vlgmr.msra.gmra.mxu2 %vm391_vm7, %v382_v30  ;;  %v579_v5 = vsel %vm391_vm7, %v562_v4, 0 }
 0x330   :  { %586 = vmatpush.bf16.xpose.msrb.mxu0 %v579_v5  ;;  %v4448_v5 = vld [vmem:[%s5730_s2 + $0x28] sm:$0xff] }
 0x336   :  { %v446_v6 = vpop.permute.xlu0 %445 }
 0x337   :  { %v462_v7 = vsel %vm391_vm7, %v446_v6, 0 }
 0x338   :  { %473 = vmatpush.bf16.xpose.msra.mxu3 %v462_v7 }
 0x33e   :  { %v505_v9 = vpop.permute.xlu0 %504  ;;  %v501_v10 = vpop.permute.xlu2 %500 }
 0x33f   :  { %v444_v11 = vpop.permute.xlu1 %443  ;;  %3557 = vmatmul.msk.bf16.gmra.mxu2 %vm391_vm7, %v4303_v2  ;;  %v522_v13 = vsel %vm391_vm7, %v505_v9, 0  ;;  %v516_v25 = vsel %vm391_vm7, %v501_v10, 0 }
 0x340   :  { %v459_v14 = vsel %vm391_vm7, %v444_v11, 0  ;;  %529 = vmatpush.bf16.xpose.msrb.mxu1 %v522_v13 }
 0x341   :  { %474 = vmatpush.bf16.xpose.msra.mxu3 %v459_v14 }
 0x346   :  { %v961_v18 = vpop.permute.xlu2 %960 }
 0x347   :  { %979 = vmatpush.bf16.msrb.mxu2 %v961_v18 }
 0x348   :  { %3559 = vmatmul.msk.bf16.vlgmr.msra.gmra.mxu3 %vm391_vm7, %v4316_v27 }
 0x34e   :  { %v560_v19 = vpop.permute.xlu0 %559  ;;  %v503_v21 = vpop.permute.xlu1 %502 }
 0x34f   :  { %3558 = vmatmul.msk.bf16.gmra.mxu2 %vm391_vm7, %v4298_v62  ;;  %v576_v49 = vsel %vm391_vm7, %v560_v19, 0  ;;  %v519_v2 = vsel %vm391_vm7, %v503_v21, 0  ;;  %v1016_v23 = vpop.permute.xlu2 %1015 }
 0x350   :  { %587 = vmatpush.bf16.xpose.msrb.mxu0 %v576_v49  ;;  %530 = vmatpush.bf16.xpose.msrb.mxu1 %v519_v2 }
 0x356   :  { %v959_v22 = vpop.permute.xlu0 %958 }
 0x357   :  { %980 = vmatpush.bf16.msrb.mxu2 %v959_v22  ;;  %v1132_v27 = vpop.permute.xlu2 %1131 }
 0x358   :  { %3560 = vmatmul.msk.bf16.gmra.mxu3 %vm391_vm7, %v4309_v17  ;;  %531 = vmatpush.bf16.xpose.msrb.mxu1 %v516_v25 }
 0x35e   :  { %v957_v26 = vpop.permute.xlu0 %956 }
 0x35f   :  { %v558_v54 = vpop.permute.xlu1 %557  ;;  %981 = vmatpush.bf16.msrb.mxu2 %v957_v26  ;;  %3562 = vmatmul.msk.bf16.vlgmr.msrb.gmra.mxu1 %vm391_vm7, %v4337_v50 }
 0x360   :  { %v573_v62 = vsel %vm391_vm7, %v558_v54, 0 }
 0x361   :  { %588 = vmatpush.bf16.xpose.msrb.mxu0 %v573_v62 }
 0x366   :  { %v1073_v32 = vpop.permute.xlu0 %1072 }
 0x367   :  { %v1014_v30 = vpop.permute.xlu1 %1013 }
 0x368   :  { %3561 = vmatmul.msk.bf16.gmra.mxu3 %vm391_vm7, %v4307_v15  ;;  %3565 = vmatmul.msk.bf16.vlgmr.msrb.gmra.mxu0 %vm391_vm7, %v4344_v57 }
 0x369   :  { %1150 = vmatpush.bf16.msra.mxu0 %v1132_v27 }
 0x36f   :  { %v1018_v17 = vpop.permute.xlu1 %1017  ;;  %3563 = vmatmul.msk.bf16.gmra.mxu1 %vm391_vm7, %v4329_v46 }
 0x370   :  { %1036 = vmatpush.bf16.msrb.mxu3 %v1018_v17 }
 0x374   :  { %1037 = vmatpush.bf16.msrb.mxu3 %v1016_v23 }
 0x377   :  { %v1075_v31 = vpop.permute.xlu1 %1074 }
 0x378   :  { %3566 = vmatmul.msk.bf16.gmra.mxu0 %vm391_vm7, %v4331_v0  ;;  %1038 = vmatpush.bf16.msrb.mxu3 %v1014_v30 }
 0x379   :  { %1093 = vmatpush.bf16.msra.mxu1 %v1075_v31 }
 0x37d   :  { %1094 = vmatpush.bf16.msra.mxu1 %v1073_v32 }
 0x37f   :  { %3564 = vmatmul.msk.bf16.gmra.mxu1 %vm391_vm7, %v4318_v29  ;;  %v113_v29 = vld [vmem:[%s5730_s2 + $0x8] sm:$0xff] }
 0x388   :  { %3567 = vmatmul.msk.bf16.gmra.mxu0 %vm391_vm7, %v4325_v35 }
 0x3b2   :  { %v419_v15 = vpop.f32.mrf.mxu2 }
 0x3b3   :  { %v605_v34 = vmul.f32 0.35355338, %v419_v15 }
 0x3b5   :  { %v4400_v37 = vadd.f32 %v605_v34, %v112_v33 }
 0x3b7   :  { %v653_v40 = vsel %vm78_vm0, %v4400_v37, -inf }
 0x3b8   :  { %654 = vmax.xlane.f32.xlu0 %v653_v40 }
 0x3ba   :  { %v421_v41 = vpop.f32.mrf.mxu2 }
 0x3bb   :  { %v606_v42 = vmul.f32 0.35355338, %v421_v41 }
 0x3bd   :  { %v4407_v43 = vadd.f32 %v606_v42, %v113_v29 }
 0x3bf   :  { %v656_v35 = vsel %vm78_vm0, %v4407_v43, -inf }
 0x3c0   :  { %657 = vmax.xlane.f32.xlu2 %v656_v35 }
 0x3c2   :  { %v424_v59 = vpop.f32.mrf.mxu2 }
 0x3c3   :  { %v607_v46 = vmul.f32 0.35355338, %v424_v59 }
 0x3c5   :  { %v4417_v38 = vadd.f32 %v607_v46, %v4414_v45 }
 0x3c7   :  { %v659_v47 = vsel %vm78_vm0, %v4417_v38, -inf }
 0x3c8   :  { %660 = vmax.xlane.f32.xlu2 %v659_v47 }
 0x3ca   :  { %v426_v48 = vpop.f32.mrf.mxu2 }
 0x3cb   :  { %v608_v51 = vmul.f32 0.35355338, %v426_v48  ;;  %v476_v52 = vpop.f32.mrf.mxu3 }
 0x3cc   :  { %v611_v55 = vmul.f32 0.35355338, %v476_v52 }
 0x3cd   :  { %v4427_v53 = vadd.f32 %v608_v51, %v4424_v39 }
 0x3ce   :  { %v4436_v61 = vadd.f32 %v611_v55, %v112_v33 }
 0x3cf   :  { %v662_v56 = vsel %vm78_vm0, %v4427_v53, -inf }
 0x3d0   :  { %663 = vmax.xlane.f32.xlu1 %v662_v56  ;;  %v671_v3 = vsel %vm78_vm0, %v4436_v61, -inf }
 0x3d2   :  { %v429_v44 = vpop.f32.mrf.mxu2 }
 0x3d3   :  { %v609_v60 = vmul.f32 0.35355338, %v429_v44  ;;  %v478_v11 = vpop.f32.mrf.mxu3 }
 0x3d4   :  { %v612_v18 = vmul.f32 0.35355338, %v478_v11 }
 0x3d5   :  { %v4439_v63 = vadd.f32 %v609_v60, %v4434_v58 }
 0x3d6   :  { %v4459_v22 = vadd.f32 %v612_v18, %v113_v29 }
 0x3d7   :  { %v665_v1 = vsel %vm78_vm0, %v4439_v63, -inf }
 0x3d8   :  { %666 = vmax.xlane.f32.xlu0 %v665_v1  ;;  %672 = vmax.xlane.f32.xlu1 %v671_v3  ;;  %v674_v26 = vsel %vm78_vm0, %v4459_v22, -inf }
 0x3da   :  { %v431_v4 = vpop.f32.mrf.mxu2 }
 0x3db   :  { %v610_v6 = vmul.f32 0.35355338, %v431_v4  ;;  %v481_v32 = vpop.f32.mrf.mxu3 }
 0x3dc   :  { %v533_v7 = vpop.f32.mrf.mxu1 }
 0x3dd   :  { %v4451_v9 = vadd.f32 %v610_v6, %v4448_v5  ;;  %v617_v10 = vmul.f32 0.35355338, %v533_v7 }
 0x3df   :  { %v668_v13 = vsel %vm78_vm0, %v4451_v9, -inf  ;;  %v4455_v14 = vadd.f32 %v617_v10, %v112_v33 }
 0x3e0   :  { %669 = vmax.xlane.f32.xlu2 %v668_v13 }
 0x3e1   :  { %v689_v19 = vsel %vm78_vm0, %v4455_v14, -inf }
 0x3e2   :  { %690 = vmax.xlane.f32.xlu0 %v689_v19 }
 0x3e3   :  { %v483_v48 = vpop.f32.mrf.mxu3 }
 0x3e4   :  { %v535_v21 = vpop.f32.mrf.mxu1 }
 0x3e5   :  { %v590_v49 = vpop.f32.mrf.mxu0  ;;  %v618_v25 = vmul.f32 0.35355338, %v535_v21 }
 0x3e6   :  { %v623_v2 = vmul.f32 0.35355338, %v590_v49 }
 0x3e7   :  { %v4467_v17 = vadd.f32 %v618_v25, %v113_v29 }
 0x3e8   :  { %v4461_v23 = vadd.f32 %v623_v2, %v112_v33 }
 0x3e9   :  { %v692_v33 = vsel %vm78_vm0, %v4467_v17, -inf }
 0x3ea   :  { %v707_v54 = vsel %vm78_vm0, %v4461_v23, -inf  ;;  %675 = vmax.xlane.f32.xlu0 %v674_v26 }
 0x3eb   :  { %708 = vmax.xlane.f32.xlu2 %v707_v54  ;;  %v486_v4 = vpop.f32.mrf.mxu3 }
 0x3ec   :  { %v538_v62 = vpop.f32.mrf.mxu1 }
 0x3ed   :  { %v592_v27 = vpop.f32.mrf.mxu0  ;;  %v619_v15 = vmul.f32 0.35355338, %v538_v62 }
 0x3ee   :  { %v624_v30 = vmul.f32 0.35355338, %v592_v27 }
 0x3ef   :  { %v4476_v35 = vadd.f32 %v619_v15, %v4414_v45 }
 0x3f0   :  { %v4469_v31 = vadd.f32 %v624_v30, %v113_v29  ;;  %v613_v29 = vmul.f32 0.35355338, %v481_v32 }
 0x3f1   :  { %v695_v46 = vsel %vm78_vm0, %v4476_v35, -inf }
 0x3f2   :  { %v710_v34 = vsel %vm78_vm0, %v4469_v31, -inf  ;;  %v4486_v55 = vadd.f32 %v613_v29, %v4414_v45 }
 0x3f3   :  { %693 = vmax.xlane.f32.xlu2 %v692_v33  ;;  %711 = vmax.xlane.f32.xlu1 %v710_v34  ;;  %v488_v13 = vpop.f32.mrf.mxu3 }
 0x3f4   :  { %v540_v40 = vpop.f32.mrf.mxu1  ;;  %v677_v1 = vsel %vm78_vm0, %v4486_v55, -inf  ;;  %v616_v19 = vmul.f32 0.35355338, %v488_v13 }
 0x3f5   :  { %v595_v41 = vpop.f32.mrf.mxu0  ;;  %v620_v15 = vmul.f32 0.35355338, %v540_v40 }
 0x3f6   :  { %v625_v42 = vmul.f32 0.35355338, %v595_v41  ;;  %v4506_v49 = vadd.f32 %v616_v19, %v4448_v5 }
 0x3f8   :  { %v4479_v59 = vadd.f32 %v625_v42, %v4414_v45  ;;  %v686_v2 = vsel %vm78_vm0, %v4506_v49, -inf  ;;  %v614_v42 = vmul.f32 0.35355338, %v483_v48 }
 0x3fa   :  { %v713_v47 = vsel %vm78_vm0, %v4479_v59, -inf }
 0x3fb   :  { %696 = vmax.xlane.f32.xlu1 %v695_v46  ;;  %714 = vmax.xlane.f32.xlu0 %v713_v47 }
 0x3fc   :  { %v543_v56 = vpop.f32.mrf.mxu1 }
 0x3fd   :  { %v597_v51 = vpop.f32.mrf.mxu0  ;;  %v621_v60 = vmul.f32 0.35355338, %v543_v56 }
 0x3fe   :  { %v626_v52 = vmul.f32 0.35355338, %v597_v51  ;;  %v4529_v51 = vadd.f32 %v614_v42, %v4424_v39 }
 0x3ff   :  { %v4496_v7 = vadd.f32 %v621_v60, %v4434_v58 }
 0x400   :  { %v4489_v44 = vadd.f32 %v626_v52, %v4424_v39  ;;  %v680_v60 = vsel %vm78_vm0, %v4529_v51, -inf }
 0x401   :  { %v701_v45 = vsel %vm78_vm0, %v4496_v7, -inf }
 0x402   :  { %v716_v3 = vsel %vm78_vm0, %v4489_v44, -inf }
 0x403   :  { %678 = vmax.xlane.f32.xlu1 %v677_v1  ;;  %717 = vmax.xlane.f32.xlu2 %v716_v3 }
 0x404   :  { %v545_v56 = vpop.f32.mrf.mxu1 }
 0x405   :  { %v600_v6 = vpop.f32.mrf.mxu0  ;;  %v622_v48 = vmul.f32 0.35355338, %v545_v56 }
 0x406   :  { %v627_v29 = vmul.f32 0.35355338, %v600_v6 }
 0x408   :  { %v4532_v52 = vadd.f32 %v627_v29, %v4434_v58 }
 0x40a   :  { %v719_v1 = vsel %vm78_vm0, %v4532_v52, -inf }
 0x40b   :  { %702 = vmax.xlane.f32.xlu1 %v701_v45 }
 0x40d   :  { %v602_v10 = vpop.f32.mrf.mxu0 }
 0x40e   :  { %v628_v11 = vmul.f32 0.35355338, %v602_v10  ;;  %v615_v10 = vmul.f32 0.35355338, %v486_v4 }
 0x410   :  { %v4501_v18 = vadd.f32 %v628_v11, %v4448_v5  ;;  %v4549_v13 = vadd.f32 %v615_v10, %v4434_v58 }
 0x412   :  { %v722_v21 = vsel %vm78_vm0, %v4501_v18, -inf  ;;  %v683_v4 = vsel %vm78_vm0, %v4549_v13, -inf }
 0x413   :  { %723 = vmax.xlane.f32.xlu1 %v722_v21 }
 0x41b   :  { %687 = vmax.xlane.f32.xlu1 %v686_v2 }
 0x42b   :  { %v655_v25 = vpop.xlane.xlu0 %654 }
 0x42c   :  { %v725_v26 = vsub.f32 %v4400_v37, %v655_v25  ;;  %v4519_v37 = vadd.f32 %v620_v15, %v4424_v39  ;;  %v4540_v39 = vadd.f32 %v622_v48, %v4448_v5 }
 0x42e   :  { %v749_v54 = vmul.f32 1.442695, %v725_v26 }
 0x430   :  { %3807 = vpow2.f32 %v749_v54 }
 0x433   :  { %v658_v62 = vpop.xlane.xlu2 %657 }
 0x434   :  { %v726_v27 = vsub.f32 %v4407_v43, %v658_v62  ;;  %1129 = vrot.lane.b32.xlu1 %v4331_v0, %s4082_s14  ;;  %v698_v0 = vsel %vm78_vm0, %v4519_v37, -inf }
 0x436   :  { %v4514_v30 = vpop.eup %3807  ;;  %v751_v32 = vmul.f32 1.442695, %v726_v27 }
 0x437   :  { %v797_v33 = vsel %vm78_vm0, %v4514_v30, 0.0 }
 0x438   :  { %3809 = vpow2.f32 %v751_v32  ;;  %798 = vadd.xlane.f32.xlu0 %v797_v33 }
 0x43b   :  { %v661_v34 = vpop.xlane.xlu2 %660 }
 0x43c   :  { %v727_v43 = vsub.f32 %v4417_v38, %v661_v34 }
 0x43e   :  { %v4521_v41 = vpop.eup %3809  ;;  %v753_v46 = vmul.f32 1.442695, %v727_v43 }
 0x43f   :  { %v800_v40 = vsel %vm78_vm0, %v4521_v41, 0.0 }
 0x440   :  { %699 = vmax.xlane.f32.xlu0 %v698_v0  ;;  %801 = vadd.xlane.f32.xlu2 %v800_v40  ;;  %3811 = vpow2.f32 %v753_v46 }
 0x443   :  { %v664_v47 = vpop.xlane.xlu1 %663 }
 0x444   :  { %v728_v38 = vsub.f32 %v4427_v53, %v664_v47  ;;  %v704_v53 = vsel %vm78_vm0, %v4540_v39, -inf }
 0x446   :  { %v755_v3 = vmul.f32 1.442695, %v728_v38  ;;  %v4542_v6 = vpop.eup %3811 }
 0x447   :  { %v803_v11 = vsel %vm78_vm0, %v4542_v6, 0.0 }
 0x448   :  { %681 = vmax.xlane.f32.xlu0 %v680_v60  ;;  %720 = vmax.xlane.f32.xlu2 %v719_v1  ;;  %3813 = vpow2.f32 %v755_v3 }
 0x44b   :  { %v667_v45 = vpop.xlane.xlu0 %666  ;;  %v673_v5 = vpop.xlane.xlu1 %672 }
 0x44c   :  { %v731_v54 = vsub.f32 %v4436_v61, %v673_v5 }
 0x44e   :  { %v4551_v19 = vpop.eup %3813  ;;  %v761_v58 = vmul.f32 1.442695, %v731_v54 }
 0x44f   :  { %v806_v26 = vsel %vm78_vm0, %v4551_v19, 0.0 }
 0x450   :  { %705 = vmax.xlane.f32.xlu0 %v704_v53  ;;  %804 = vadd.xlane.f32.xlu2 %v803_v11 }
 0x453   :  { %v670_v21 = vpop.xlane.xlu2 %669 }
 0x454   :  { %v730_v5 = vsub.f32 %v4451_v9, %v670_v21 }
 0x455   :  { %v691_v2 = vpop.xlane.xlu0 %690 }
 0x456   :  { %v737_v25 = vsub.f32 %v4455_v14, %v691_v2  ;;  %v729_v14 = vsub.f32 %v4439_v63, %v667_v45 }
 0x458   :  { %684 = vmax.xlane.f32.xlu2 %v683_v4  ;;  %807 = vadd.xlane.f32.xlu0 %v806_v26  ;;  %v773_v62 = vmul.f32 1.442695, %v737_v25  ;;  %v757_v43 = vmul.f32 1.442695, %v729_v14 }
 0x45a   :  { %3815 = vpow2.f32 %v773_v62 }
 0x45b   :  { %3817 = vpow2.f32 %v761_v58 }
 0x45d   :  { %v676_v45 = vpop.xlane.xlu0 %675 }
 0x45e   :  { %v709_v27 = vpop.xlane.xlu2 %708 }
 0x45f   :  { %v743_v32 = vsub.f32 %v4461_v23, %v709_v27 }
 0x460   :  { %v4560_v15 = vpop.eup %3815 }
 0x461   :  { %v785_v33 = vmul.f32 1.442695, %v743_v32  ;;  %v833_v34 = vsel %vm78_vm0, %v4560_v15, 0.0  ;;  %v4565_v61 = vpop.eup %3817 }
 0x462   :  { %834 = vadd.xlane.f32.xlu1 %v833_v34  ;;  %v815_v63 = vsel %vm78_vm0, %v4565_v61, 0.0 }
 0x463   :  { %3819 = vpow2.f32 %v785_v33 }
 0x464   :  { %3821 = vpow2.f32 %v757_v43 }
 0x466   :  { %v694_v42 = vpop.xlane.xlu2 %693  ;;  %v712_v46 = vpop.xlane.xlu1 %711 }
 0x467   :  { %v738_v29 = vsub.f32 %v4467_v17, %v694_v42  ;;  %v744_v1 = vsub.f32 %v4469_v31, %v712_v46  ;;  %v759_v31 = vmul.f32 1.442695, %v730_v5 }
 0x469   :  { %v775_v0 = vmul.f32 1.442695, %v738_v29  ;;  %v4568_v23 = vpop.eup %3819  ;;  %v787_v3 = vmul.f32 1.442695, %v744_v1 }
 0x46a   :  { %v851_v40 = vsel %vm78_vm0, %v4568_v23, 0.0  ;;  %816 = vadd.xlane.f32.xlu1 %v815_v63  ;;  %v4576_v47 = vpop.eup %3821 }
 0x46b   :  { %3823 = vpow2.f32 %v775_v0  ;;  %852 = vadd.xlane.f32.xlu2 %v851_v40  ;;  %v809_v38 = vsel %vm78_vm0, %v4576_v47, 0.0 }
 0x46c   :  { %1070 = vrot.lane.b32.xlu0 %v4337_v50, %s4082_s14  ;;  %v732_v50 = vsub.f32 %v4459_v22, %v676_v45  ;;  %3825 = vpow2.f32 %v787_v3 }
 0x46e   :  { %v697_v48 = vpop.xlane.xlu1 %696  ;;  %v763_v53 = vmul.f32 1.442695, %v732_v50  ;;  %v715_v9 = vpop.xlane.xlu0 %714 }
 0x46f   :  { %v739_v21 = vsub.f32 %v4476_v35, %v697_v48 }
 0x470   :  { %3827 = vpow2.f32 %v763_v53 }
 0x471   :  { %v4578_v17 = vpop.eup %3823  ;;  %3829 = vpow2.f32 %v759_v31  ;;  %v777_v32 = vmul.f32 1.442695, %v739_v21 }
 0x472   :  { %v836_v56 = vsel %vm78_vm0, %v4578_v17, 0.0  ;;  %810 = vadd.xlane.f32.xlu1 %v809_v38  ;;  %v4588_v11 = vpop.eup %3825 }
 0x473   :  { %837 = vadd.xlane.f32.xlu2 %v836_v56  ;;  %v854_v25 = vsel %vm78_vm0, %v4588_v11, 0.0 }
 0x476   :  { %v679_v60 = vpop.xlane.xlu1 %678  ;;  %v4593_v4 = vpop.eup %3827 }
 0x477   :  { %v733_v22 = vsub.f32 %v4486_v55, %v679_v60  ;;  %v4598_v62 = vpop.eup %3829  ;;  %v4605_v14 = vpop.xlane.xlu2 %717 }
 0x478   :  { %v812_v58 = vsel %vm78_vm0, %v4598_v62, 0.0 }
 0x479   :  { %v765_v54 = vmul.f32 1.442695, %v733_v22 }
 0x47b   :  { %3831 = vpow2.f32 %v765_v54  ;;  %v745_v54 = vsub.f32 %v4479_v59, %v715_v9  ;;  %v746_v59 = vsub.f32 %v4489_v44, %v4605_v14 }
 0x47c   :  { %3833 = vpow2.f32 %v777_v32 }
 0x47e   :  { %v703_v10 = vpop.xlane.xlu1 %702 }
 0x47f   :  { %v741_v29 = vsub.f32 %v4496_v7, %v703_v10 }
 0x481   :  { %v4603_v55 = vpop.eup %3831 }
 0x482   :  { %v821_v43 = vsel %vm78_vm0, %v4603_v55, 0.0  ;;  %v4610_v42 = vpop.eup %3833 }
 0x483   :  { %v839_v46 = vsel %vm78_vm0, %v4610_v42, 0.0 }
 0x486   :  { %v724_v2 = vpop.xlane.xlu1 %723 }
 0x487   :  { %v748_v60 = vsub.f32 %v4501_v18, %v724_v2 }
 0x48b   :  { %1127 = vrot.lane.b32.xlu2 %v4344_v57, %s4082_s14  ;;  %v818_v57 = vsel %vm78_vm0, %v4593_v4, 0.0 }
 0x48e   :  { %v688_v26 = vpop.xlane.xlu1 %687 }
 0x48f   :  { %v736_v33 = vsub.f32 %v4506_v49, %v688_v26  ;;  %v781_v49 = vmul.f32 1.442695, %v741_v29 }
 0x491   :  { %v771_v35 = vmul.f32 1.442695, %v736_v33 }
 0x496   :  { %855 = vadd.xlane.f32.xlu0 %v854_v25  ;;  %v795_v25 = vmul.f32 1.442695, %v748_v60 }
 0x49e   :  { %819 = vadd.xlane.f32.xlu0 %v818_v57 }
 0x4a6   :  { %v1130_v27 = vpop.permute.xlu1 %1129  ;;  %813 = vadd.xlane.f32.xlu0 %v812_v58 }
 0x4a7   :  { %1151 = vmatpush.bf16.msra.mxu0 %v1130_v27  ;;  %v789_v27 = vmul.f32 1.442695, %v745_v54 }
 0x4ab   :  { %v799_v34 = vpop.xlane.xlu0 %798 }
 0x4ac   :  { %3835 = vrcp.f32 %v799_v34 }
 0x4ad   :  { %3837 = vpow2.f32 %v771_v35 }
 0x4ae   :  { %822 = vadd.xlane.f32.xlu0 %v821_v43 }
 0x4b2   :  { %v3836_v40 = vpop.eup %3835 }
 0x4b3   :  { %v700_v0 = vpop.xlane.xlu0 %699  ;;  %v802_v63 = vpop.xlane.xlu2 %801  ;;  %v893_v56 = vmul.f32 %v3836_v40, %v4514_v30 }
 0x4b4   :  { %3839 = vrcp.f32 %v802_v63  ;;  %840 = vadd.xlane.f32.xlu2 %v839_v46  ;;  %v4616_v38 = vpop.eup %3837  ;;  %v740_v53 = vsub.f32 %v4519_v37, %v700_v0 }
 0x4b5   :  { %3841 = vpow2.f32 %v781_v49  ;;  %v917_v1 = vpack.c.bf16 %v893_v56, %v893_v56  ;;  %v830_v50 = vsel %vm78_vm0, %v4616_v38, 0.0 }
 0x4b6   :  { %v779_v2 = vmul.f32 1.442695, %v740_v53 }
 0x4b7   :  { %v947_v31 = vunpack.c.l.b16 %v917_v1 }
 0x4ba   :  { %v3840_v48 = vpop.eup %3839 }
 0x4bb   :  { %v894_v7 = vmul.f32 %v3840_v48, %v4521_v41  ;;  %v682_v3 = vpop.xlane.xlu0 %681  ;;  %v721_v45 = vpop.xlane.xlu2 %720 }
 0x4bc   :  { %v734_v10 = vsub.f32 %v4529_v51, %v682_v3  ;;  %831 = vadd.xlane.f32.xlu2 %v830_v50  ;;  %v4624_v18 = vpop.eup %3841 }
 0x4bd   :  { %v918_v5 = vpack.c.bf16 %v894_v7, %v894_v7  ;;  %v845_v26 = vsel %vm78_vm0, %v4624_v18, 0.0 }
 0x4be   :  { %v767_v30 = vmul.f32 1.442695, %v734_v10 }
 0x4bf   :  { %v948_v22 = vunpack.c.l.b16 %v918_v5 }
 0x4c0   :  { %3843 = vpow2.f32 %v767_v30 }
 0x4c1   :  { %v953_v41 = vpack.c.b16 %v948_v22, %v947_v31  ;;  %3845 = vpow2.f32 %v795_v25 }
 0x4c2   :  { %3847 = vpow2.f32 %v779_v2 }
 0x4c3   :  { %v706_v57 = vpop.xlane.xlu0 %705  ;;  %3568 = vmatmul.msk.bf16.vlgmr.msrb.gmra.mxu2 %vm78_vm0, %v953_v41  ;;  %v805_v51 = vpop.xlane.xlu2 %804 }
 0x4c4   :  { %846 = vadd.xlane.f32.xlu2 %v845_v26  ;;  %3849 = vrcp.f32 %v805_v51  ;;  %v742_v9 = vsub.f32 %v4540_v39, %v706_v57  ;;  %v747_v39 = vsub.f32 %v4532_v52, %v721_v45 }
 0x4c6   :  { %v4629_v37 = vpop.eup %3843  ;;  %v783_v49 = vmul.f32 1.442695, %v742_v9  ;;  %v793_v10 = vmul.f32 1.442695, %v747_v39 }
 0x4c7   :  { %v824_v21 = vsel %vm78_vm0, %v4629_v37, 0.0  ;;  %v4634_v58 = vpop.eup %3845 }
 0x4c8   :  { %825 = vadd.xlane.f32.xlu1 %v824_v21  ;;  %v4636_v32 = vpop.eup %3847  ;;  %v866_v29 = vsel %vm78_vm0, %v4634_v58, 0.0 }
 0x4c9   :  { %v842_v63 = vsel %vm78_vm0, %v4636_v32, 0.0 }
 0x4ca   :  { %v3850_v43 = vpop.eup %3849 }
 0x4cb   :  { %v685_v33 = vpop.xlane.xlu2 %684  ;;  %v808_v34 = vpop.xlane.xlu0 %807  ;;  %v895_v40 = vmul.f32 %v3850_v43, %v4542_v6 }
 0x4cc   :  { %v735_v35 = vsub.f32 %v4549_v13, %v685_v33  ;;  %3851 = vrcp.f32 %v808_v34  ;;  %867 = vadd.xlane.f32.xlu2 %v866_v29  ;;  %v791_v13 = vmul.f32 1.442695, %v746_v59 }
 0x4cd   :  { %3853 = vpow2.f32 %v789_v27  ;;  %v919_v48 = vpack.c.bf16 %v895_v40, %v895_v40 }
 0x4ce   :  { %v769_v0 = vmul.f32 1.442695, %v735_v35 }
 0x4cf   :  { %v949_v7 = vunpack.c.l.b16 %v919_v48 }
 0x4d0   :  { %3855 = vpow2.f32 %v769_v0  ;;  %843 = vadd.xlane.f32.xlu1 %v842_v63 }
 0x4d1   :  { %3857 = vpow2.f32 %v791_v13 }
 0x4d2   :  { %v3852_v46 = vpop.eup %3851  ;;  %3859 = vpow2.f32 %v783_v49 }
 0x4d3   :  { %v896_v56 = vmul.f32 %v3852_v46, %v4551_v19  ;;  %v4648_v60 = vpop.eup %3853  ;;  %3861 = vpow2.f32 %v793_v10 }
 0x4d4   :  { %v857_v6 = vsel %vm78_vm0, %v4648_v60, 0.0 }
 0x4d5   :  { %v920_v44 = vpack.c.bf16 %v896_v56, %v896_v56  ;;  %v835_v45 = vpop.xlane.xlu1 %834 }
 0x4d6   :  { %v4650_v14 = vpop.eup %3855  ;;  %3863 = vrcp.f32 %v835_v45 }
 0x4d7   :  { %v827_v1 = vsel %vm78_vm0, %v4650_v14, 0.0  ;;  %v950_v3 = vunpack.c.l.b16 %v920_v44  ;;  %v4657_v50 = vpop.eup %3857 }
 0x4d8   :  { %858 = vadd.xlane.f32.xlu1 %v857_v6  ;;  %828 = vadd.xlane.f32.xlu0 %v827_v1  ;;  %v4660_v53 = vpop.eup %3859  ;;  %v860_v25 = vsel %vm78_vm0, %v4657_v50, 0.0 }
 0x4d9   :  { %v954_v19 = vpack.c.b16 %v950_v3, %v949_v7  ;;  %v848_v30 = vsel %vm78_vm0, %v4660_v53, 0.0  ;;  %v4666_v31 = vpop.eup %3861 }
 0x4da   :  { %v863_v2 = vsel %vm78_vm0, %v4666_v31, 0.0 }
 0x4db   :  { %3569 = vmatmul.msk.bf16.gmra.mxu2 %vm78_vm0, %v954_v19 }
 0x4dc   :  { %v3864_v41 = vpop.eup %3863 }
 0x4dd   :  { %v905_v57 = vmul.f32 %v3864_v41, %v4560_v15  ;;  %v817_v35 = vpop.xlane.xlu1 %816 }
 0x4de   :  { %v1071_v52 = vpop.permute.xlu0 %1070  ;;  %v853_v5 = vpop.xlane.xlu2 %852 }
 0x4df   :  { %1095 = vmatpush.bf16.msra.mxu1 %v1071_v52  ;;  %v929_v26 = vpack.c.bf16 %v905_v57, %v905_v57 }
 0x4e0   :  { %849 = vadd.xlane.f32.xlu1 %v848_v30  ;;  %861 = vadd.xlane.f32.xlu0 %v860_v25 }
 0x4e1   :  { %v1061_v33 = vunpack.c.l.b16 %v929_v26 }
 0x4e5   :  { %v811_v63 = vpop.xlane.xlu1 %810 }
 0x4e6   :  { %v838_v22 = vpop.xlane.xlu2 %837 }
 0x4e7   :  { %3865 = vrcp.f32 %v838_v22 }
 0x4e8   :  { %864 = vadd.xlane.f32.xlu0 %v863_v2  ;;  %3867 = vrcp.f32 %v853_v5  ;;  %v1170_v2 = vld [vmem:[%s5725_s4 + $0x18] sm:$0xf] }
 0x4ed   :  { %v3866_v51 = vpop.eup %3865 }
 0x4ee   :  { %v906_v54 = vmul.f32 %v3866_v51, %v4578_v17  ;;  %v1128_v21 = vpop.permute.xlu2 %1127  ;;  %v3868_v59 = vpop.eup %3867 }
 0x4ef   :  { %1152 = vmatpush.bf16.msra.mxu0 %v1128_v21  ;;  %v911_v15 = vmul.f32 %v3868_v59, %v4568_v23 }
 0x4f0   :  { %v930_v27 = vpack.c.bf16 %v906_v54, %v906_v54 }
 0x4f1   :  { %v935_v0 = vpack.c.bf16 %v911_v15, %v911_v15 }
 0x4f2   :  { %v1062_v34 = vunpack.c.l.b16 %v930_v27 }
 0x4f3   :  { %v1118_v49 = vunpack.c.l.b16 %v935_v0 }
 0x4f4   :  { %v1067_v43 = vpack.c.b16 %v1062_v34, %v1061_v33 }
 0x4f6   :  { %3574 = vmatmul.msk.bf16.vlgmr.msra.gmra.mxu1 %vm78_vm0, %v1067_v43 }
 0x509   :  { %v856_v29 = vpop.xlane.xlu0 %855 }
 0x50a   :  { %3869 = vrcp.f32 %v856_v29 }
 0x50b   :  { %3871 = vrcp.f32 %v817_v35 }
 0x510   :  { %v3870_v9 = vpop.eup %3869 }
 0x511   :  { %v912_v17 = vmul.f32 %v3870_v9, %v4588_v11  ;;  %v820_v40 = vpop.xlane.xlu0 %819  ;;  %v3872_v13 = vpop.eup %3871 }
 0x512   :  { %3873 = vrcp.f32 %v820_v40  ;;  %v899_v56 = vmul.f32 %v3872_v13, %v4565_v61 }
 0x513   :  { %v936_v46 = vpack.c.bf16 %v912_v17, %v912_v17  ;;  %3875 = vrcp.f32 %v811_v63 }
 0x514   :  { %v923_v6 = vpack.c.bf16 %v899_v56, %v899_v56 }
 0x515   :  { %v1119_v48 = vunpack.c.l.b16 %v936_v46 }
 0x516   :  { %v1004_v3 = vunpack.c.l.b16 %v923_v6 }
 0x517   :  { %v1124_v44 = vpack.c.b16 %v1119_v48, %v1118_v49 }
 0x518   :  { %v3874_v39 = vpop.eup %3873 }
 0x519   :  { %v900_v1 = vmul.f32 %v3874_v39, %v4593_v4  ;;  %v814_v23 = vpop.xlane.xlu0 %813  ;;  %3577 = vmatmul.msk.bf16.vlgmr.msra.gmra.mxu0 %vm78_vm0, %v1124_v44  ;;  %v3876_v7 = vpop.eup %3875 }
 0x51a   :  { %3877 = vrcp.f32 %v814_v23  ;;  %v897_v10 = vmul.f32 %v3876_v7, %v4576_v47  ;;  %v1185_v47 = vsel %vm1183_vm8, %v1170_v2, 0 }
 0x51b   :  { %v924_v11 = vpack.c.bf16 %v900_v1, %v900_v1  ;;  %1194 = vmatpush.bf16.msra.mxu2 %v1185_v47 }
 0x51c   :  { %v921_v5 = vpack.c.bf16 %v897_v10, %v897_v10 }
 0x51d   :  { %v1005_v19 = vunpack.c.l.b16 %v924_v11 }
 0x51e   :  { %v951_v25 = vunpack.c.l.b16 %v921_v5 }
 0x51f   :  { %v1010_v52 = vpack.c.b16 %v1005_v19, %v1004_v3 }
 0x520   :  { %v3878_v45 = vpop.eup %3877 }
 0x521   :  { %3571 = vmatmul.msk.bf16.vlgmr.msrb.gmra.mxu3 %vm78_vm0, %v1010_v52  ;;  %v898_v61 = vmul.f32 %v3878_v45, %v4598_v62  ;;  %v823_v41 = vpop.xlane.xlu0 %822 }
 0x522   :  { %3879 = vrcp.f32 %v823_v41 }
 0x523   :  { %v922_v30 = vpack.c.bf16 %v898_v61, %v898_v61 }
 0x525   :  { %v952_v4 = vunpack.c.l.b16 %v922_v30 }
 0x527   :  { %v955_v22 = vpack.c.b16 %v952_v4, %v951_v25  ;;  %v841_v57 = vpop.xlane.xlu2 %840  ;;  %v1264_v25 = vld [vmem:[%s5725_s4 + $0x20] sm:$0xf] }
 0x528   :  { %v3880_v62 = vpop.eup %3879  ;;  %v1278_v41 = vsel %vm1183_vm8, %v1264_v25, 0 }
 0x529   :  { %3570 = vmatmul.msk.bf16.gmra.mxu2 %vm78_vm0, %v955_v22  ;;  %v901_v26 = vmul.f32 %v3880_v62, %v4603_v55  ;;  %1287 = vmatpush.bf16.msrb.mxu1 %v1278_v41 }
 0x52b   :  { %v925_v43 = vpack.c.bf16 %v901_v26, %v901_v26 }
 0x52d   :  { %v1006_v15 = vunpack.c.l.b16 %v925_v43 }
 0x52f   :  { %v832_v21 = vpop.xlane.xlu2 %831 }
 0x53b   :  { %v826_v51 = vpop.xlane.xlu1 %825 }
 0x53c   :  { %3881 = vrcp.f32 %v826_v51 }
 0x53d   :  { %3883 = vrcp.f32 %v841_v57 }
 0x542   :  { %v3882_v54 = vpop.eup %3881 }
 0x543   :  { %v3884_v27 = vpop.eup %3883  ;;  %v844_v33 = vpop.xlane.xlu1 %843  ;;  %v902_v34 = vmul.f32 %v3882_v54, %v4629_v37 }
 0x544   :  { %3885 = vrcp.f32 %v844_v33  ;;  %v907_v59 = vmul.f32 %v3884_v27, %v4610_v42  ;;  %v847_v37 = vpop.xlane.xlu2 %846 }
 0x545   :  { %v926_v35 = vpack.c.bf16 %v902_v34, %v902_v34  ;;  %3887 = vrcp.f32 %v832_v21 }
 0x546   :  { %v983_v29 = vpop.f32.mrf.mxu2  ;;  %v931_v17 = vpack.c.bf16 %v907_v59, %v907_v59 }
 0x547   :  { %v1007_v9 = vunpack.c.l.b16 %v926_v35 }
 0x548   :  { %v1063_v48 = vunpack.c.l.b16 %v931_v17 }
 0x549   :  { %v1011_v0 = vpack.c.b16 %v1007_v9, %v1006_v15 }
 0x54a   :  { %v3886_v63 = vpop.eup %3885 }
 0x54b   :  { %v829_v40 = vpop.xlane.xlu0 %828  ;;  %3572 = vmatmul.msk.bf16.gmra.mxu3 %vm78_vm0, %v1011_v0  ;;  %v859_v55 = vpop.xlane.xlu1 %858  ;;  %v908_v13 = vmul.f32 %v3886_v63, %v4636_v32 }
 0x54c   :  { %v3888_v46 = vpop.eup %3887  ;;  %3889 = vrcp.f32 %v829_v40 }
 0x54d   :  { %v932_v49 = vpack.c.bf16 %v908_v13, %v908_v13  ;;  %3891 = vrcp.f32 %v859_v55  ;;  %v904_v39 = vmul.f32 %v3888_v46, %v4616_v38  ;;  %v1218_v46 = vld [vmem:[%s5725_s4 + $0x1c] sm:$0xf] }
 0x54e   :  { %v985_v56 = vpop.f32.mrf.mxu2  ;;  %3893 = vrcp.f32 %v847_v37  ;;  %v1232_v37 = vsel %vm1183_vm8, %v1218_v46, 0 }
 0x54f   :  { %v1171_v42 = vpack.c.bf16 %v985_v56, %v983_v29  ;;  %v1064_v44 = vunpack.c.l.b16 %v932_v49  ;;  %v928_v11 = vpack.c.bf16 %v904_v39, %v904_v39  ;;  %1241 = vmatpush.bf16.msra.mxu3 %v1232_v37 }
 0x551   :  { %3580 = vmatmul.msk.bf16.vlgmr.msra.gmra.mxu2 %vm391_vm7, %v1171_v42  ;;  %v1068_v6 = vpack.c.b16 %v1064_v44, %v1063_v48  ;;  %v1009_v45 = vunpack.c.l.b16 %v928_v11 }
 0x552   :  { %v3890_v1 = vpop.eup %3889 }
 0x553   :  { %v862_v23 = vpop.xlane.xlu0 %861  ;;  %3575 = vmatmul.msk.bf16.gmra.mxu1 %vm78_vm0, %v1068_v6  ;;  %v850_v32 = vpop.xlane.xlu1 %849  ;;  %v903_v7 = vmul.f32 %v3890_v1, %v4650_v14 }
 0x554   :  { %v3892_v3 = vpop.eup %3891  ;;  %3895 = vrcp.f32 %v862_v23  ;;  %v868_v14 = vpop.xlane.xlu2 %867 }
 0x555   :  { %v3894_v19 = vpop.eup %3893  ;;  %3897 = vrcp.f32 %v850_v32  ;;  %v927_v10 = vpack.c.bf16 %v903_v7, %v903_v7  ;;  %v913_v38 = vmul.f32 %v3892_v3, %v4648_v60 }
 0x556   :  { %v909_v61 = vmul.f32 %v3894_v19, %v4624_v18 }
 0x557   :  { %v1008_v52 = vunpack.c.l.b16 %v927_v10  ;;  %v937_v47 = vpack.c.bf16 %v913_v38, %v913_v38 }
 0x558   :  { %v933_v18 = vpack.c.bf16 %v909_v61, %v909_v61 }
 0x559   :  { %v1012_v5 = vpack.c.b16 %v1009_v45, %v1008_v52  ;;  %v1120_v26 = vunpack.c.l.b16 %v937_v47 }
 0x55a   :  { %v3896_v30 = vpop.eup %3895  ;;  %v1065_v21 = vunpack.c.l.b16 %v933_v18 }
 0x55b   :  { %v3898_v4 = vpop.eup %3897  ;;  %v865_v22 = vpop.xlane.xlu0 %864  ;;  %3573 = vmatmul.msk.bf16.gmra.mxu3 %vm78_vm0, %v1012_v5  ;;  %v914_v2 = vmul.f32 %v3896_v30, %v4657_v50 }
 0x55c   :  { %3899 = vrcp.f32 %v865_v22  ;;  %v910_v60 = vmul.f32 %v3898_v4, %v4660_v53 }
 0x55d   :  { %v938_v57 = vpack.c.bf16 %v914_v2, %v914_v2  ;;  %3901 = vrcp.f32 %v868_v14 }
 0x55e   :  { %v988_v51 = vpop.f32.mrf.mxu2  ;;  %v934_v62 = vpack.c.bf16 %v910_v60, %v910_v60  ;;  %v3777_v60 = vld [vmem:[%s5728_s6 + $0x6] ss:$0 sm:$0xff] }
 0x55f   :  { %v1121_v54 = vunpack.c.l.b16 %v938_v57 }
 0x560   :  { %v1066_v27 = vunpack.c.l.b16 %v934_v62 }
 0x561   :  { %v1125_v33 = vpack.c.b16 %v1121_v54, %v1120_v26 }
 0x562   :  { %v3900_v34 = vpop.eup %3899  ;;  %v1069_v43 = vpack.c.b16 %v1066_v27, %v1065_v21 }
 0x563   :  { %3578 = vmatmul.msk.bf16.gmra.mxu0 %vm78_vm0, %v1125_v33  ;;  %v3902_v50 = vpop.eup %3901  ;;  %v915_v53 = vmul.f32 %v3900_v34, %v4666_v31  ;;  %v1310_v31 = vld [vmem:[%s5725_s4 + $0x24] sm:$0xf] }
 0x564   :  { %3576 = vmatmul.msk.bf16.gmra.mxu1 %vm78_vm0, %v1069_v43  ;;  %v916_v59 = vmul.f32 %v3902_v50, %v4634_v58  ;;  %v1324_v58 = vsel %vm1183_vm8, %v1310_v31, 0 }
 0x565   :  { %v939_v15 = vpack.c.bf16 %v915_v53, %v915_v53  ;;  %1333 = vmatpush.bf16.msrb.mxu0 %v1324_v58 }
 0x566   :  { %v990_v35 = vpop.f32.mrf.mxu2  ;;  %v940_v9 = vpack.c.bf16 %v916_v59, %v916_v59 }
 0x567   :  { %v1172_v29 = vpack.c.bf16 %v990_v35, %v988_v51  ;;  %v1122_v0 = vunpack.c.l.b16 %v939_v15 }
 0x568   :  { %v1123_v63 = vunpack.c.l.b16 %v940_v9 }
 0x569   :  { %3581 = vmatmul.msk.bf16.gmra.mxu2 %vm391_vm7, %v1172_v29 }
 0x56a   :  { %v1126_v17 = vpack.c.b16 %v1123_v63, %v1122_v0 }
 0x573   :  { %3579 = vmatmul.msk.bf16.gmra.mxu0 %vm78_vm0, %v1126_v17  ;;  %v1097_v40 = vpop.f32.mrf.mxu1 }
 0x57b   :  { %v1099_v55 = vpop.f32.mrf.mxu1 }
 0x57c   :  { %v1265_v13 = vpack.c.bf16 %v1099_v55, %v1097_v40 }
 0x57e   :  { %3586 = vmatmul.msk.bf16.vlgmr.msrb.gmra.mxu1 %vm391_vm7, %v1265_v13 }
 0x596   :  { %v1154_v49 = vpop.f32.mrf.mxu0 }
 0x59e   :  { %v1156_v56 = vpop.f32.mrf.mxu0 }
 0x59f   :  { %v1311_v48 = vpack.c.bf16 %v1156_v56, %v1154_v49 }
 0x5a1   :  { %3589 = vmatmul.msk.bf16.vlgmr.msrb.gmra.mxu0 %vm391_vm7, %v1311_v48 }
 0x5a4   :  { %v1040_v42 = vpop.f32.mrf.mxu3 }
 0x5ac   :  { %v993_v44 = vpop.f32.mrf.mxu2  ;;  %v1042_v39 = vpop.f32.mrf.mxu3 }
 0x5ad   :  { %v1219_v6 = vpack.c.bf16 %v1042_v39, %v1040_v42 }
 0x5af   :  { %3583 = vmatmul.msk.bf16.vlgmr.msra.gmra.mxu3 %vm391_vm7, %v1219_v6 }
 0x5b4   :  { %v995_v1 = vpop.f32.mrf.mxu2 }
 0x5b5   :  { %v1173_v23 = vpack.c.bf16 %v995_v1, %v993_v44 }
 0x5b7   :  { %3582 = vmatmul.msk.bf16.gmra.mxu2 %vm391_vm7, %v1173_v23 }
 0x5ce   :  { %v1045_v32 = vpop.f32.mrf.mxu3 }
 0x5d0   :  { %v1102_v7 = vpop.f32.mrf.mxu1 }
 0x5d4   :  { %v1196_v41 = vpop.f32.mrf.mxu2 }
 0x5d5   :  { %v1212_v18 = vadd.f32 %v3777_v60, %v1196_v41 }
 0x5d6   :  { %v1047_v11 = vpop.f32.mrf.mxu3 }
 0x5d7   :  { %v1220_v3 = vpack.c.bf16 %v1047_v11, %v1045_v32 }
 0x5d8   :  { %v1104_v19 = vpop.f32.mrf.mxu1 }
 0x5d9   :  { %v1266_v10 = vpack.c.bf16 %v1104_v19, %v1102_v7  ;;  %3584 = vmatmul.msk.bf16.gmra.mxu3 %vm391_vm7, %v1220_v3 }
 0x5db   :  { %3587 = vmatmul.msk.bf16.gmra.mxu1 %vm391_vm7, %v1266_v10 }
 0x5dc   :  { %v1198_v21 = vpop.f32.mrf.mxu2 }
 0x5dd   :  { %v1213_v33 = vadd.f32 %v3777_v60, %v1198_v21 }
 0x5de   :  { %v1050_v52 = vpop.f32.mrf.mxu3 }
 0x5e0   :  { %v1159_v45 = vpop.f32.mrf.mxu0 }
 0x5e1   :  { %v1107_v38 = vpop.f32.mrf.mxu1 }
 0x5e6   :  { %v1052_v61 = vpop.f32.mrf.mxu3 }
 0x5e7   :  { %v1221_v5 = vpack.c.bf16 %v1052_v61, %v1050_v52 }
 0x5e8   :  { %v1161_v30 = vpop.f32.mrf.mxu0 }
 0x5e9   :  { %v1109_v25 = vpop.f32.mrf.mxu1  ;;  %v1312_v4 = vpack.c.bf16 %v1161_v30, %v1159_v45  ;;  %3585 = vmatmul.msk.bf16.gmra.mxu3 %vm391_vm7, %v1221_v5 }
 0x5ea   :  { %v1267_v14 = vpack.c.bf16 %v1109_v25, %v1107_v38 }
 0x5eb   :  { %3590 = vmatmul.msk.bf16.gmra.mxu0 %vm391_vm7, %v1312_v4 }
 0x5ec   :  { %3588 = vmatmul.msk.bf16.gmra.mxu1 %vm391_vm7, %v1267_v14  ;;  %v1201_v63 = vpop.f32.mrf.mxu2 }
 0x5ed   :  { %v1214_v40 = vadd.f32 %v3777_v60, %v1201_v63 }
 0x5f0   :  { %v1164_v22 = vpop.f32.mrf.mxu0 }
 0x5f4   :  { %v1203_v13 = vpop.f32.mrf.mxu2 }
 0x5f5   :  { %v1215_v37 = vadd.f32 %v3777_v60, %v1203_v13 }
 0x5f8   :  { %v1166_v2 = vpop.f32.mrf.mxu0 }
 0x5f9   :  { %v1313_v47 = vpack.c.bf16 %v1166_v2, %v1164_v22 }
 0x5fb   :  { %3591 = vmatmul.msk.bf16.gmra.mxu0 %vm391_vm7, %v1313_v47  ;;  %v1289_v57 = vpop.f32.mrf.mxu1 }
 0x603   :  { %v1291_v35 = vpop.f32.mrf.mxu1 }
 0x61e   :  { %v1335_v26 = vpop.f32.mrf.mxu0 }
 0x626   :  { %v1337_v59 = vpop.f32.mrf.mxu0 }
 0x632   :  { %v1243_v51 = vpop.f32.mrf.mxu3 }
 0x633   :  { %v1258_v62 = vadd.f32 %v1243_v51, %v1212_v18 }
 0x635   :  { %v1304_v54 = vadd.f32 %v1289_v57, %v1258_v62 }
 0x637   :  { %v1350_v27 = vadd.f32 %v1335_v26, %v1304_v54 }
 0x639   :  { %v4732_v34 = vadd.f32 %v1350_v27, %v4147_v8 }
 0x63a   :  { %v1245_v43 = vpop.f32.mrf.mxu3  ;;  %v1206_v42 = vpop.f32.mrf.mxu2 }
 0x63b   :  { %v1259_v50 = vadd.f32 %v1245_v43, %v1213_v33  ;;  %v1364_v53 = vsel %vm120_vm1, %v4732_v34, 0.0  ;;  %v1216_v23 = vadd.f32 %v3777_v60, %v1206_v42  ;;  %v3744_v42 = vld [vmem:[%s5731_s5] sm:$0xff] }
 0x63c   :  { %1365 = vadd.xlane.f32.xlu1 %v1364_v53 }
 0x63d   :  { %v1305_v29 = vadd.f32 %v1291_v35, %v1259_v50 }
 0x63f   :  { %v1351_v15 = vadd.f32 %v1337_v59, %v1305_v29 }
 0x641   :  { %v4737_v9 = vadd.f32 %v1351_v15, %v4154_v12 }
 0x643   :  { %v1367_v0 = vsel %vm120_vm1, %v4737_v9, 0.0 }
 0x644   :  { %1368 = vadd.xlane.f32.xlu0 %v1367_v0 }
 0x658   :  { %v1294_v17 = vpop.f32.mrf.mxu1 }
 0x65c   :  { %v1248_v8 = vpop.f32.mrf.mxu3 }
 0x65d   :  { %v1260_v55 = vadd.f32 %v1248_v8, %v1214_v40 }
 0x65f   :  { %v1306_v58 = vadd.f32 %v1294_v17, %v1260_v55 }
 0x660   :  { %v1296_v56 = vpop.f32.mrf.mxu1 }
 0x664   :  { %v1250_v31 = vpop.f32.mrf.mxu3 }
 0x665   :  { %v1261_v48 = vadd.f32 %v1250_v31, %v1215_v37 }
 0x667   :  { %v1307_v6 = vadd.f32 %v1296_v56, %v1261_v48 }
 0x668   :  { %v1340_v46 = vpop.f32.mrf.mxu0 }
 0x669   :  { %v1352_v49 = vadd.f32 %v1340_v46, %v1306_v58  ;;  %v1299_v3 = vpop.f32.mrf.mxu1 }
 0x66b   :  { %v4742_v12 = vadd.f32 %v1352_v49, %v4161_v16  ;;  %v1208_v16 = vpop.f32.mrf.mxu2  ;;  %v3745_v49 = vld [vmem:[%s5731_s5 + $0x8] sm:$0xff] }
 0x66c   :  { %v1253_v39 = vpop.f32.mrf.mxu3  ;;  %v1217_v38 = vadd.f32 %v3777_v60, %v1208_v16  ;;  %1546 = vmatpush.bf16.msrb.mxu2 %v3745_v49 }
 0x66d   :  { %v1370_v44 = vsel %vm120_vm1, %v4742_v12, 0.0  ;;  %v1262_v7 = vadd.f32 %v1253_v39, %v1216_v23 }
 0x66e   :  { %1371 = vadd.xlane.f32.xlu2 %v1370_v44 }
 0x66f   :  { %v1308_v10 = vadd.f32 %v1299_v3, %v1262_v7 }
 0x670   :  { %v1342_v1 = vpop.f32.mrf.mxu0  ;;  %1547 = vmatpush.bf16.msrb.mxu2 %v3744_v42 }
 0x671   :  { %v1353_v32 = vadd.f32 %v1342_v1, %v1307_v6 }
 0x673   :  { %v4747_v11 = vadd.f32 %v1353_v32, %v4168_v20  ;;  %v1301_v20 = vpop.f32.mrf.mxu1 }
 0x674   :  { %v1255_v52 = vpop.f32.mrf.mxu3 }
 0x675   :  { %v1373_v19 = vsel %vm120_vm1, %v4747_v11, 0.0  ;;  %v1263_v5 = vadd.f32 %v1255_v52, %v1217_v38 }
 0x676   :  { %1374 = vadd.xlane.f32.xlu1 %v1373_v19 }
 0x677   :  { %v1309_v4 = vadd.f32 %v1301_v20, %v1263_v5  ;;  %v4814_v5 = vld [vmem:[%s5728_s6 + $0x7] ss:$0 sm:$0xff] }
 0x678   :  { %v1345_v45 = vpop.f32.mrf.mxu0 }
 0x679   :  { %v1354_v61 = vadd.f32 %v1345_v45, %v1308_v10 }
 0x67b   :  { %v4752_v30 = vadd.f32 %v1354_v61, %v4175_v24 }
 0x67d   :  { %v1376_v25 = vsel %vm120_vm1, %v4752_v30, 0.0 }
 0x67e   :  { %1377 = vadd.xlane.f32.xlu0 %v1376_v25 }
 0x680   :  { %v1347_v14 = vpop.f32.mrf.mxu0 }
 0x681   :  { %v1355_v22 = vadd.f32 %v1347_v14, %v1309_v4  ;;  %v4820_v14 = vld [vmem:[%s5728_s6 + $0x8] ss:$0 sm:$0xff] }
 0x683   :  { %v4757_v2 = vadd.f32 %v1355_v22, %v4182_v28 }
 0x685   :  { %v1379_v47 = vsel %vm120_vm1, %v4757_v2, 0.0 }
 0x686   :  { %1380 = vadd.xlane.f32.xlu2 %v1379_v47 }
 0x6af   :  { %v1366_v41 = vpop.xlane.xlu1 %1365 }
 0x6b0   :  { %v1382_v60 = vmul.f32 %v1366_v41, %v4186_v36 }
 0x6b2   :  { %v4763_v24 = vsub.f32 %v4732_v34, %v1382_v60 }
 0x6b4   :  { %v1394_v18 = vmul.f32 %v4763_v24, %v4763_v24 }
 0x6b6   :  { %v1400_v57 = vsel %vm120_vm1, %v1394_v18, 0.0 }
 0x6b7   :  { %v1369_v51 = vpop.xlane.xlu0 %1368  ;;  %1401 = vadd.xlane.f32.xlu1 %v1400_v57 }
 0x6b8   :  { %v1383_v28 = vmul.f32 %v1369_v51, %v4186_v36 }
 0x6ba   :  { %v4770_v62 = vsub.f32 %v4737_v9, %v1383_v28 }
 0x6bc   :  { %v1395_v26 = vmul.f32 %v4770_v62, %v4770_v62 }
 0x6be   :  { %v1403_v54 = vsel %vm120_vm1, %v1395_v26, 0.0 }
 0x6bf   :  { %1404 = vadd.xlane.f32.xlu0 %v1403_v54 }
 0x6e1   :  { %v1372_v21 = vpop.xlane.xlu2 %1371 }
 0x6e2   :  { %v1384_v27 = vmul.f32 %v1372_v21, %v4186_v36 }
 0x6e4   :  { %v4777_v33 = vsub.f32 %v4742_v12, %v1384_v27 }
 0x6e6   :  { %v1396_v43 = vmul.f32 %v4777_v33, %v4777_v33 }
 0x6e8   :  { %v1406_v50 = vsel %vm120_vm1, %v1396_v43, 0.0 }
 0x6e9   :  { %v1375_v53 = vpop.xlane.xlu1 %1374  ;;  %1407 = vadd.xlane.f32.xlu2 %v1406_v50 }
 0x6ea   :  { %v1385_v35 = vmul.f32 %v1375_v53, %v4186_v36 }
 0x6ec   :  { %v4784_v29 = vsub.f32 %v4747_v11, %v1385_v35 }
 0x6ee   :  { %v1397_v59 = vmul.f32 %v4784_v29, %v4784_v29 }
 0x6f0   :  { %v1409_v15 = vsel %vm120_vm1, %v1397_v59, 0.0 }
 0x6f1   :  { %1410 = vadd.xlane.f32.xlu1 %v1409_v15  ;;  %v1378_v0 = vpop.xlane.xlu0 %1377 }
 0x6f2   :  { %v1386_v63 = vmul.f32 %v1378_v0, %v4186_v36 }
 0x6f4   :  { %v4791_v8 = vsub.f32 %v4752_v30, %v1386_v63 }
 0x6f6   :  { %v1398_v17 = vmul.f32 %v4791_v8, %v4791_v8 }
 0x6f8   :  { %v1412_v40 = vsel %vm120_vm1, %v1398_v17, 0.0 }
 0x6f9   :  { %1413 = vadd.xlane.f32.xlu0 %v1412_v40  ;;  %v1381_v55 = vpop.xlane.xlu2 %1380 }
 0x6fa   :  { %v1387_v13 = vmul.f32 %v1381_v55, %v4186_v36 }
 0x6fc   :  { %v4798_v31 = vsub.f32 %v4757_v2, %v1387_v13 }
 0x6fe   :  { %v1399_v58 = vmul.f32 %v4798_v31, %v4798_v31 }
 0x700   :  { %v1415_v46 = vsel %vm120_vm1, %v1399_v58, 0.0 }
 0x701   :  { %1416 = vadd.xlane.f32.xlu2 %v1415_v46 }
 0x72a   :  { %v1402_v37 = vpop.xlane.xlu1 %1401 }
 0x72b   :  { %v1418_v56 = vmul.f32 %v1402_v37, %v4186_v36 }
 0x72d   :  { %v1424_v48 = vadd.f32 1e-06, %v1418_v56 }
 0x72f   :  { %3903 = vrsqrt.f32 %v1424_v48  ;;  %vm1436_vm10 = vweird.f32 %v1424_v48 }
 0x732   :  { %v1405_v44 = vpop.xlane.xlu0 %1404 }
 0x733   :  { %v1419_v39 = vmul.f32 %v1405_v44, %v4186_v36 }
 0x735   :  { %v3904_v6 = vpop.eup %3903  ;;  %v1425_v1 = vadd.f32 1e-06, %v1419_v39 }
 0x736   :  { %v1431_v23 = vmul.f32 %v3904_v6, %v1424_v48  ;;  %vm1437_vm9 = vweird.f32 %v3904_v6 }
 0x737   :  { %3905 = vrsqrt.f32 %v1425_v1  ;;  %vm1438_vm11 = vmor %vm1436_vm10, %vm1437_vm9  ;;  %vm1446_vm13 = vweird.f32 %v1425_v1 }
 0x738   :  { %v1432_v32 = vmul.f32 %v3904_v6, %v1431_v23 }
 0x73a   :  { %v1433_v7 = vmul.f32 0.5, %v1432_v32 }
 0x73c   :  { %v1434_v3 = vsub.f32 1.5, %v1433_v7 }
 0x73d   :  { %v3906_v19 = vpop.eup %3905 }
 0x73e   :  { %v1435_v16 = vmul.f32 %v3904_v6, %v1434_v3  ;;  %v1441_v10 = vmul.f32 %v3906_v19, %v1425_v1  ;;  %vm1447_vm12 = vweird.f32 %v3906_v19 }
 0x73f   :  { %vm1448_vm14 = vmor %vm1446_vm13, %vm1447_vm12 }
 0x740   :  { %v1442_v52 = vmul.f32 %v3906_v19, %v1441_v10  ;;  %v1439_v45 = vsel %vm1438_vm11, %v3904_v6, %v1435_v16 }
 0x741   :  { %v1490_v25 = vmul.f32 %v1439_v45, %v4763_v24 }
 0x742   :  { %v1443_v38 = vmul.f32 0.5, %v1442_v52 }
 0x743   :  { %v1497_v22 = vmul.f32 %v4814_v5, %v1490_v25 }
 0x744   :  { %v1444_v61 = vsub.f32 1.5, %v1443_v38 }
 0x745   :  { %v1504_v60 = vadd.f32 %v4820_v14, %v1497_v22 }
 0x746   :  { %v1445_v20 = vmul.f32 %v3906_v19, %v1444_v61 }
 0x748   :  { %v1449_v4 = vsel %vm1448_vm14, %v3906_v19, %v1445_v20 }
 0x749   :  { %v1491_v47 = vmul.f32 %v1449_v4, %v4770_v62 }
 0x74b   :  { %v1498_v41 = vmul.f32 %v4814_v5, %v1491_v47 }
 0x74d   :  { %v1505_v18 = vadd.f32 %v4820_v14, %v1498_v41 }
 0x74f   :  { %v1510_v24 = vpack.c.bf16 %v1505_v18, %v1504_v60 }
 0x751   :  { %3600 = vmatmul.msk.bf16.vlgmr.msrb.gmra.mxu2 %vm120_vm1, %v1510_v24 }
 0x75c   :  { %v1408_v57 = vpop.xlane.xlu2 %1407 }
 0x75d   :  { %v1420_v51 = vmul.f32 %v1408_v57, %v4186_v36 }
 0x75f   :  { %v1426_v28 = vadd.f32 1e-06, %v1420_v51  ;;  %v3749_v51 = vld [vmem:[%s5725_s4 + $0x40] sm:$0xff] }
 0x761   :  { %3907 = vrsqrt.f32 %v1426_v28  ;;  %vm1456_vm2 = vweird.f32 %v1426_v28 }
 0x764   :  { %v1411_v26 = vpop.xlane.xlu1 %1410 }
 0x765   :  { %v1421_v54 = vmul.f32 %v1411_v26, %v4186_v36  ;;  %v3747_v26 = vld [vmem:[%s5725_s4 + $0x30] sm:$0xff] }
 0x767   :  { %v3908_v21 = vpop.eup %3907  ;;  %v1427_v27 = vadd.f32 1e-06, %v1421_v54  ;;  %v3780_v54 = vld [vmem:[%s5728_s6 + $0x9] ss:$0 sm:$0xff] }
 0x768   :  { %v1451_v62 = vmul.f32 %v3908_v21, %v1426_v28  ;;  %vm1457_vm15 = vweird.f32 %v3908_v21  ;;  %v3748_v28 = vld [vmem:[%s5725_s4 + $0x38] sm:$0xff] }
 0x769   :  { %3909 = vrsqrt.f32 %v1427_v27  ;;  %vm1458_vm3 = vmor %vm1456_vm2, %vm1457_vm15  ;;  %vm1466_vm5 = vweird.f32 %v1427_v27 }
 0x76a   :  { %v1452_v43 = vmul.f32 %v3908_v21, %v1451_v62 }
 0x76c   :  { %v1453_v50 = vmul.f32 0.5, %v1452_v43  ;;  %v1414_v53 = vpop.xlane.xlu0 %1413 }
 0x76d   :  { %v1422_v35 = vmul.f32 %v1414_v53, %v4186_v36 }
 0x76e   :  { %v1454_v59 = vsub.f32 1.5, %v1453_v50 }
 0x76f   :  { %v3910_v15 = vpop.eup %3909  ;;  %v1428_v0 = vadd.f32 1e-06, %v1422_v35 }
 0x770   :  { %v1455_v63 = vmul.f32 %v3908_v21, %v1454_v59  ;;  %v1461_v17 = vmul.f32 %v3910_v15, %v1427_v27  ;;  %vm1467_vm4 = vweird.f32 %v3910_v15 }
 0x771   :  { %3911 = vrsqrt.f32 %v1428_v0  ;;  %vm1468_vm6 = vmor %vm1466_vm5, %vm1467_vm4  ;;  %vm1476_vm10 = vweird.f32 %v1428_v0 }
 0x772   :  { %v1462_v40 = vmul.f32 %v3910_v15, %v1461_v17  ;;  %v1459_v55 = vsel %vm1458_vm3, %v3908_v21, %v1455_v63  ;;  %v3746_v21 = vld [vmem:[%s5725_s4 + $0x28] sm:$0xff] }
 0x773   :  { %v1492_v56 = vmul.f32 %v1459_v55, %v4777_v33 }
 0x774   :  { %v1463_v13 = vmul.f32 0.5, %v1462_v40  ;;  %v1417_v58 = vpop.xlane.xlu2 %1416 }
 0x775   :  { %v1423_v46 = vmul.f32 %v1417_v58, %v4186_v36  ;;  %v1499_v23 = vmul.f32 %v4814_v5, %v1492_v56 }
 0x776   :  { %v1464_v37 = vsub.f32 1.5, %v1463_v13 }
 0x777   :  { %v3912_v49 = vpop.eup %3911  ;;  %v1429_v48 = vadd.f32 1e-06, %v1423_v46  ;;  %v1506_v16 = vadd.f32 %v4820_v14, %v1499_v23 }
 0x778   :  { %v1465_v42 = vmul.f32 %v3910_v15, %v1464_v37  ;;  %v1471_v44 = vmul.f32 %v3912_v49, %v1428_v0  ;;  %vm1477_vm9 = vweird.f32 %v3912_v49 }
 0x779   :  { %3913 = vrsqrt.f32 %v1429_v48  ;;  %vm1478_vm11 = vmor %vm1476_vm10, %vm1477_vm9  ;;  %vm1486_vm13 = vweird.f32 %v1429_v48 }
 0x77a   :  { %v1469_v39 = vsel %vm1468_vm6, %v3910_v15, %v1465_v42  ;;  %v1472_v6 = vmul.f32 %v3912_v49, %v1471_v44 }
 0x77b   :  { %v1493_v1 = vmul.f32 %v1469_v39, %v4784_v29 }
 0x77c   :  { %v1473_v32 = vmul.f32 0.5, %v1472_v6 }
 0x77d   :  { %v1500_v7 = vmul.f32 %v4814_v5, %v1493_v1 }
 0x77e   :  { %v1474_v3 = vsub.f32 1.5, %v1473_v32 }
 0x77f   :  { %v3914_v19 = vpop.eup %3913  ;;  %v1507_v33 = vadd.f32 %v4820_v14, %v1500_v7 }
 0x780   :  { %v1475_v10 = vmul.f32 %v3912_v49, %v1474_v3  ;;  %v1481_v52 = vmul.f32 %v3914_v19, %v1429_v48  ;;  %vm1487_vm12 = vweird.f32 %v3914_v19 }
 0x781   :  { %v1511_v45 = vpack.c.bf16 %v1507_v33, %v1506_v16  ;;  %vm1488_vm14 = vmor %vm1486_vm13, %vm1487_vm12 }
 0x782   :  { %v1482_v38 = vmul.f32 %v3914_v19, %v1481_v52  ;;  %v1479_v29 = vsel %vm1478_vm11, %v3912_v49, %v1475_v10 }
 0x783   :  { %3601 = vmatmul.msk.bf16.gmra.mxu2 %vm120_vm1, %v1511_v45  ;;  %v1494_v20 = vmul.f32 %v1479_v29, %v4791_v8  ;;  %v3753_v8 = vld [vmem:[%s5725_s4 + $0x60] sm:$0xff] }
 0x784   :  { %v1483_v61 = vmul.f32 0.5, %v1482_v38  ;;  %1687 = vmatpush.bf16.msrb.mxu3 %v3753_v8 }
 0x785   :  { %v1501_v41 = vmul.f32 %v4814_v5, %v1494_v20 }
 0x786   :  { %v1484_v25 = vsub.f32 1.5, %v1483_v61 }
 0x787   :  { %v1508_v18 = vadd.f32 %v4820_v14, %v1501_v41 }
 0x788   :  { %v1485_v4 = vmul.f32 %v3914_v19, %v1484_v25 }
 0x78a   :  { %v1489_v22 = vsel %vm1488_vm14, %v3914_v19, %v1485_v4 }
 0x78b   :  { %v1495_v47 = vmul.f32 %v1489_v22, %v4798_v31  ;;  %v3752_v31 = vld [vmem:[%s5725_s4 + $0x58] sm:$0xff] }
 0x78c   :  { %1688 = vmatpush.bf16.msrb.mxu3 %v3752_v31 }
 0x78d   :  { %v1502_v60 = vmul.f32 %v4814_v5, %v1495_v47  ;;  %v3751_v5 = vld [vmem:[%s5725_s4 + $0x50] sm:$0xff] }
 0x78f   :  { %v1509_v24 = vadd.f32 %v4820_v14, %v1502_v60  ;;  %v3750_v14 = vld [vmem:[%s5725_s4 + $0x48] sm:$0xff] }
 0x790   :  { %1689 = vmatpush.bf16.msrb.mxu3 %v3751_v5 }
 0x791   :  { %v1512_v57 = vpack.c.bf16 %v1509_v24, %v1508_v18 }
 0x793   :  { %3602 = vmatmul.msk.bf16.gmra.mxu2 %vm120_vm1, %v1512_v57 }
 0x794   :  { %1690 = vmatpush.bf16.msrb.mxu3 %v3750_v14 }
 0x798   :  { %1691 = vmatpush.bf16.msrb.mxu3 %v3749_v51 }
 0x79c   :  { %1692 = vmatpush.bf16.msrb.mxu3 %v3748_v28 }
 0x7a0   :  { %1693 = vmatpush.bf16.msrb.mxu3 %v3747_v26 }
 0x7a4   :  { %1694 = vmatpush.bf16.msrb.mxu3 %v3746_v21 }
 0x7d4   :  { %v1549_v27 = vpop.f32.mrf.mxu2 }
 0x7d5   :  { %v1550_v62 = vadd.f32 %v3780_v54, %v1549_v27 }
 0x7d7   :  { %v1570_v43 = vmul.f32 0.044715, %v1550_v62  ;;  %v1564_v49 = vmul.f32 0.5, %v1550_v62 }
 0x7d9   :  { %v1576_v50 = vmul.f32 %v1570_v43, %v1550_v62 }
 0x7db   :  { %v1582_v53 = vmul.f32 %v1576_v50, %v1550_v62 }
 0x7dc   :  { %v1551_v35 = vpop.f32.mrf.mxu2 }
 0x7dd   :  { %v1588_v59 = vadd.f32 %v1582_v53, %v1550_v62  ;;  %v1552_v15 = vadd.f32 %v3780_v54, %v1551_v35 }
 0x7df   :  { %v1571_v0 = vmul.f32 0.044715, %v1552_v15  ;;  %v1594_v63 = vmul.f32 0.7978846, %v1588_v59  ;;  %v1565_v56 = vmul.f32 0.5, %v1552_v15 }
 0x7e1   :  { %v1577_v17 = vmul.f32 %v1571_v0, %v1552_v15  ;;  %3915 = vtanh.f32 %v1594_v63 }
 0x7e3   :  { %v1583_v40 = vmul.f32 %v1577_v17, %v1552_v15 }
 0x7e5   :  { %v1589_v55 = vadd.f32 %v1583_v40, %v1552_v15 }
 0x7e7   :  { %v1595_v13 = vmul.f32 0.7978846, %v1589_v55  ;;  %v3916_v58 = vpop.eup %3915  ;;  %v3781_v55 = vld [vmem:[%s5728_s6 + $0xa] ss:$0 sm:$0xff] }
 0x7e8   :  { %v1606_v46 = vadd.f32 1.0, %v3916_v58 }
 0x7e9   :  { %3917 = vtanh.f32 %v1595_v13 }
 0x7ea   :  { %v1612_v42 = vmul.f32 %v1606_v46, %v1564_v49 }
 0x7ef   :  { %v3918_v37 = vpop.eup %3917 }
 0x7f0   :  { %v1607_v48 = vadd.f32 1.0, %v3918_v37 }
 0x7f2   :  { %v1613_v44 = vmul.f32 %v1607_v48, %v1565_v56 }
 0x7f4   :  { %v1618_v39 = vpack.c.bf16 %v1613_v44, %v1612_v42 }
 0x7f6   :  { %1695 = vmatmul.bf16.vlgmr.msrb.gmra.mxu3 %v1618_v39 }
 0x806   :  { %v1554_v6 = vpop.f32.mrf.mxu2 }
 0x807   :  { %v1555_v1 = vadd.f32 %v3780_v54, %v1554_v6 }
 0x809   :  { %v1572_v23 = vmul.f32 0.044715, %v1555_v1  ;;  %v1566_v31 = vmul.f32 0.5, %v1555_v1 }
 0x80b   :  { %v1578_v32 = vmul.f32 %v1572_v23, %v1555_v1 }
 0x80d   :  { %v1584_v7 = vmul.f32 %v1578_v32, %v1555_v1 }
 0x80e   :  { %v1556_v3 = vpop.f32.mrf.mxu2 }
 0x80f   :  { %v1557_v19 = vadd.f32 %v3780_v54, %v1556_v3  ;;  %v1590_v16 = vadd.f32 %v1584_v7, %v1555_v1 }
 0x811   :  { %v1573_v33 = vmul.f32 0.044715, %v1557_v19  ;;  %v1596_v52 = vmul.f32 0.7978846, %v1590_v16  ;;  %v1567_v5 = vmul.f32 0.5, %v1557_v19 }
 0x813   :  { %v1579_v10 = vmul.f32 %v1573_v33, %v1557_v19  ;;  %3919 = vtanh.f32 %v1596_v52 }
 0x815   :  { %v1585_v45 = vmul.f32 %v1579_v10, %v1557_v19 }
 0x816   :  { %v1559_v38 = vpop.f32.mrf.mxu2 }
 0x817   :  { %v1560_v29 = vadd.f32 %v3780_v54, %v1559_v38  ;;  %v1591_v61 = vadd.f32 %v1585_v45, %v1557_v19 }
 0x819   :  { %v1574_v25 = vmul.f32 0.044715, %v1560_v29  ;;  %v1597_v20 = vmul.f32 0.7978846, %v1591_v61  ;;  %v3920_v22 = vpop.eup %3919  ;;  %v1568_v59 = vmul.f32 0.5, %v1560_v29 }
 0x81a   :  { %v1608_v24 = vadd.f32 1.0, %v3920_v22 }
 0x81b   :  { %3921 = vtanh.f32 %v1597_v20  ;;  %v1580_v4 = vmul.f32 %v1574_v25, %v1560_v29 }
 0x81c   :  { %v1614_v26 = vmul.f32 %v1608_v24, %v1566_v31 }
 0x81d   :  { %v1586_v47 = vmul.f32 %v1580_v4, %v1560_v29 }
 0x81e   :  { %v1561_v41 = vpop.f32.mrf.mxu2 }
 0x81f   :  { %v1562_v60 = vadd.f32 %v3780_v54, %v1561_v41  ;;  %v1592_v18 = vadd.f32 %v1586_v47, %v1560_v29 }
 0x821   :  { %v3922_v57 = vpop.eup %3921  ;;  %v1575_v8 = vmul.f32 0.044715, %v1562_v60  ;;  %v1598_v28 = vmul.f32 0.7978846, %v1592_v18  ;;  %v1569_v15 = vmul.f32 0.5, %v1562_v60 }
 0x822   :  { %v1609_v14 = vadd.f32 1.0, %v3922_v57 }
 0x823   :  { %v1581_v51 = vmul.f32 %v1575_v8, %v1562_v60  ;;  %3923 = vtanh.f32 %v1598_v28 }
 0x824   :  { %v1615_v21 = vmul.f32 %v1609_v14, %v1567_v5 }
 0x825   :  { %v1587_v27 = vmul.f32 %v1581_v51, %v1562_v60 }
 0x826   :  { %v1619_v62 = vpack.c.bf16 %v1615_v21, %v1614_v26 }
 0x827   :  { %v1593_v43 = vadd.f32 %v1587_v27, %v1562_v60 }
 0x828   :  { %1700 = vmatmul.bf16.gmra.mxu3 %v1619_v62 }
 0x829   :  { %v1599_v50 = vmul.f32 0.7978846, %v1593_v43  ;;  %v3924_v53 = vpop.eup %3923 }
 0x82a   :  { %v1610_v54 = vadd.f32 1.0, %v3924_v53 }
 0x82b   :  { %3925 = vtanh.f32 %v1599_v50 }
 0x82c   :  { %v1616_v63 = vmul.f32 %v1610_v54, %v1568_v59 }
 0x831   :  { %v3926_v35 = vpop.eup %3925 }
 0x832   :  { %v1611_v0 = vadd.f32 1.0, %v3926_v35  ;;  %v3755_v35 = vld [vmem:[%s5729_s3 + $0x18] sm:$0xff] }
 0x833   :  { %1901 = vmatpush.bf16.msra.mxu1 %v3755_v35 }
 0x834   :  { %v1617_v17 = vmul.f32 %v1611_v0, %v1569_v15  ;;  %v3754_v0 = vld [vmem:[%s5729_s3 + $0x10] sm:$0xff] }
 0x836   :  { %v1620_v40 = vpack.c.bf16 %v1617_v17, %v1616_v63 }
 0x837   :  { %1902 = vmatpush.bf16.msra.mxu1 %v3754_v0 }
 0x838   :  { %1705 = vmatmul.bf16.gmra.mxu3 %v1620_v40 }
 0x879   :  { %v1696_v13 = vpop.f32.mrf.mxu3 }
 0x87a   :  { %v1697_v58 = vadd.f32 %v3781_v55, %v1696_v13 }
 0x87c   :  { %v4877_v46 = vadd.f32 %v1697_v58, %v4732_v34 }
 0x87e   :  { %v1719_v37 = vsel %vm120_vm1, %v4877_v46, 0.0 }
 0x87f   :  { %1720 = vadd.xlane.f32.xlu1 %v1719_v37 }
 0x881   :  { %v1698_v49 = vpop.f32.mrf.mxu3 }
 0x882   :  { %v1699_v56 = vadd.f32 %v3781_v55, %v1698_v49 }
 0x884   :  { %v4882_v48 = vadd.f32 %v1699_v56, %v4737_v9 }
 0x886   :  { %v1722_v42 = vsel %vm120_vm1, %v4882_v48, 0.0 }
 0x887   :  { %1723 = vadd.xlane.f32.xlu0 %v1722_v42 }
 0x8ab   :  { %v1701_v44 = vpop.f32.mrf.mxu3 }
 0x8ac   :  { %v1702_v39 = vadd.f32 %v3781_v55, %v1701_v44 }
 0x8ae   :  { %v4887_v6 = vadd.f32 %v1702_v39, %v4742_v12 }
 0x8b0   :  { %v1725_v34 = vsel %vm120_vm1, %v4887_v6, 0.0 }
 0x8b1   :  { %1726 = vadd.xlane.f32.xlu2 %v1725_v34 }
 0x8b3   :  { %v1703_v1 = vpop.f32.mrf.mxu3 }
 0x8b4   :  { %v1704_v23 = vadd.f32 %v3781_v55, %v1703_v1 }
 0x8b6   :  { %v4892_v32 = vadd.f32 %v1704_v23, %v4747_v11 }
 0x8b8   :  { %v1728_v9 = vsel %vm120_vm1, %v4892_v32, 0.0 }
 0x8b9   :  { %1729 = vadd.xlane.f32.xlu1 %v1728_v9  ;;  %v4959_v9 = vld [vmem:[%s5728_s6 + $0xb] ss:$0 sm:$0xff] }
 0x8bb   :  { %v1706_v7 = vpop.f32.mrf.mxu3 }
 0x8bc   :  { %v1707_v3 = vadd.f32 %v3781_v55, %v1706_v7 }
 0x8be   :  { %v4897_v19 = vadd.f32 %v1707_v3, %v4752_v30 }
 0x8c0   :  { %v1731_v12 = vsel %vm120_vm1, %v4897_v19, 0.0 }
 0x8c1   :  { %1732 = vadd.xlane.f32.xlu0 %v1731_v12 }
 0x8c3   :  { %v1708_v16 = vpop.f32.mrf.mxu3 }
 0x8c4   :  { %v1709_v33 = vadd.f32 %v3781_v55, %v1708_v16  ;;  %v4965_v16 = vld [vmem:[%s5728_s6 + $0xc] ss:$0 sm:$0xff] }
 0x8c6   :  { %v4902_v10 = vadd.f32 %v1709_v33, %v4757_v2 }
 0x8c8   :  { %v1734_v11 = vsel %vm120_vm1, %v4902_v10, 0.0 }
 0x8c9   :  { %1735 = vadd.xlane.f32.xlu2 %v1734_v11 }
 0x8f2   :  { %v1721_v52 = vpop.xlane.xlu1 %1720 }
 0x8f3   :  { %v1737_v45 = vmul.f32 %v1721_v52, %v4186_v36 }
 0x8f5   :  { %v4908_v38 = vsub.f32 %v4877_v46, %v1737_v45 }
 0x8f7   :  { %v1749_v30 = vmul.f32 %v4908_v38, %v4908_v38 }
 0x8f9   :  { %v1755_v29 = vsel %vm120_vm1, %v1749_v30, 0.0 }
 0x8fa   :  { %v1724_v61 = vpop.xlane.xlu0 %1723  ;;  %1756 = vadd.xlane.f32.xlu1 %v1755_v29 }
 0x8fb   :  { %v1738_v2 = vmul.f32 %v1724_v61, %v4186_v36 }
 0x8fd   :  { %v4915_v25 = vsub.f32 %v4882_v48, %v1738_v2 }
 0x8ff   :  { %v1750_v20 = vmul.f32 %v4915_v25, %v4915_v25 }
 0x901   :  { %v1758_v4 = vsel %vm120_vm1, %v1750_v20, 0.0 }
 0x902   :  { %1759 = vadd.xlane.f32.xlu0 %v1758_v4 }
 0x924   :  { %v1727_v22 = vpop.xlane.xlu2 %1726 }
 0x925   :  { %v1739_v47 = vmul.f32 %v1727_v22, %v4186_v36 }
 0x927   :  { %v4922_v41 = vsub.f32 %v4887_v6, %v1739_v47 }
 0x929   :  { %v1751_v60 = vmul.f32 %v4922_v41, %v4922_v41 }
 0x92b   :  { %v1761_v18 = vsel %vm120_vm1, %v1751_v60, 0.0 }
 0x92c   :  { %v1730_v24 = vpop.xlane.xlu1 %1729  ;;  %1762 = vadd.xlane.f32.xlu2 %v1761_v18 }
 0x92d   :  { %v1740_v57 = vmul.f32 %v1730_v24, %v4186_v36 }
 0x92f   :  { %v4929_v8 = vsub.f32 %v4892_v32, %v1740_v57 }
 0x931   :  { %v1752_v31 = vmul.f32 %v4929_v8, %v4929_v8 }
 0x933   :  { %v1764_v5 = vsel %vm120_vm1, %v1752_v31, 0.0 }
 0x934   :  { %1765 = vadd.xlane.f32.xlu1 %v1764_v5  ;;  %v1733_v14 = vpop.xlane.xlu0 %1732 }
 0x935   :  { %v1741_v51 = vmul.f32 %v1733_v14, %v4186_v36 }
 0x937   :  { %v4936_v28 = vsub.f32 %v4897_v19, %v1741_v51 }
 0x939   :  { %v1753_v26 = vmul.f32 %v4936_v28, %v4936_v28 }
 0x93b   :  { %v1767_v21 = vsel %vm120_vm1, %v1753_v26, 0.0 }
 0x93c   :  { %1768 = vadd.xlane.f32.xlu0 %v1767_v21  ;;  %v1736_v27 = vpop.xlane.xlu2 %1735 }
 0x93d   :  { %v1742_v62 = vmul.f32 %v1736_v27, %v4186_v36 }
 0x93f   :  { %v4943_v43 = vsub.f32 %v4902_v10, %v1742_v62 }
 0x941   :  { %v1754_v50 = vmul.f32 %v4943_v43, %v4943_v43 }
 0x943   :  { %v1770_v53 = vsel %vm120_vm1, %v1754_v50, 0.0 }
 0x944   :  { %1771 = vadd.xlane.f32.xlu2 %v1770_v53 }
 0x96d   :  { %v1757_v54 = vpop.xlane.xlu1 %1756 }
 0x96e   :  { %v1773_v59 = vmul.f32 %v1757_v54, %v4186_v36 }
 0x970   :  { %v1779_v15 = vadd.f32 1e-06, %v1773_v59 }
 0x972   :  { %3927 = vrsqrt.f32 %v1779_v15  ;;  %vm1791_vm2 = vweird.f32 %v1779_v15 }
 0x975   :  { %v1760_v63 = vpop.xlane.xlu0 %1759 }
 0x976   :  { %v1774_v17 = vmul.f32 %v1760_v63, %v4186_v36 }
 0x978   :  { %v3928_v40 = vpop.eup %3927  ;;  %v1780_v55 = vadd.f32 1e-06, %v1774_v17 }
 0x979   :  { %v1786_v13 = vmul.f32 %v3928_v40, %v1779_v15  ;;  %vm1792_vm15 = vweird.f32 %v3928_v40 }
 0x97a   :  { %3929 = vrsqrt.f32 %v1780_v55  ;;  %vm1793_vm3 = vmor %vm1791_vm2, %vm1792_vm15  ;;  %vm1801_vm5 = vweird.f32 %v1780_v55 }
 0x97b   :  { %v1787_v58 = vmul.f32 %v3928_v40, %v1786_v13 }
 0x97d   :  { %v1788_v37 = vmul.f32 0.5, %v1787_v58 }
 0x97f   :  { %v1789_v49 = vsub.f32 1.5, %v1788_v37 }
 0x980   :  { %v3930_v56 = vpop.eup %3929 }
 0x981   :  { %v1790_v42 = vmul.f32 %v3928_v40, %v1789_v49  ;;  %v1796_v44 = vmul.f32 %v3930_v56, %v1780_v55  ;;  %vm1802_vm4 = vweird.f32 %v3930_v56 }
 0x982   :  { %vm1803_vm6 = vmor %vm1801_vm5, %vm1802_vm4 }
 0x983   :  { %v1797_v39 = vmul.f32 %v3930_v56, %v1796_v44  ;;  %v1794_v34 = vsel %vm1793_vm3, %v3928_v40, %v1790_v42 }
 0x984   :  { %v1845_v7 = vmul.f32 %v1794_v34, %v4908_v38 }
 0x985   :  { %v1798_v1 = vmul.f32 0.5, %v1797_v39 }
 0x986   :  { %v1852_v33 = vmul.f32 %v4959_v9, %v1845_v7 }
 0x987   :  { %v1799_v23 = vsub.f32 1.5, %v1798_v1 }
 0x988   :  { %v1859_v45 = vadd.f32 %v4965_v16, %v1852_v33 }
 0x989   :  { %v1800_v3 = vmul.f32 %v3930_v56, %v1799_v23 }
 0x98b   :  { %v1804_v12 = vsel %vm1803_vm6, %v3930_v56, %v1800_v3 }
 0x98c   :  { %v1846_v11 = vmul.f32 %v1804_v12, %v4915_v25 }
 0x98e   :  { %v1853_v52 = vmul.f32 %v4959_v9, %v1846_v11 }
 0x990   :  { %v1860_v30 = vadd.f32 %v4965_v16, %v1853_v52 }
 0x992   :  { %v1865_v38 = vpack.c.bf16 %v1860_v30, %v1859_v45 }
 0x994   :  { %3643 = vmatmul.msk.bf16.vlgmr.msra.gmra.mxu1 %vm120_vm1, %v1865_v38 }
 0x99f   :  { %v1763_v29 = vpop.xlane.xlu2 %1762 }
 0x9a0   :  { %v1775_v61 = vmul.f32 %v1763_v29, %v4186_v36 }
 0x9a2   :  { %v1781_v2 = vadd.f32 1e-06, %v1775_v61 }
 0x9a4   :  { %3931 = vrsqrt.f32 %v1781_v2  ;;  %vm1811_vm10 = vweird.f32 %v1781_v2 }
 0x9a7   :  { %v1766_v20 = vpop.xlane.xlu1 %1765 }
 0x9a8   :  { %v1776_v4 = vmul.f32 %v1766_v20, %v4186_v36 }
 0x9aa   :  { %v3932_v22 = vpop.eup %3931  ;;  %v1782_v47 = vadd.f32 1e-06, %v1776_v4 }
 0x9ab   :  { %v1806_v25 = vmul.f32 %v3932_v22, %v1781_v2  ;;  %vm1812_vm9 = vweird.f32 %v3932_v22 }
 0x9ac   :  { %3933 = vrsqrt.f32 %v1782_v47  ;;  %vm1813_vm11 = vmor %vm1811_vm10, %vm1812_vm9  ;;  %vm1821_vm13 = vweird.f32 %v1782_v47 }
 0x9ad   :  { %v1807_v60 = vmul.f32 %v3932_v22, %v1806_v25 }
 0x9af   :  { %v1808_v18 = vmul.f32 0.5, %v1807_v60  ;;  %v1769_v24 = vpop.xlane.xlu0 %1768 }
 0x9b0   :  { %v1777_v57 = vmul.f32 %v1769_v24, %v4186_v36 }
 0x9b1   :  { %v1809_v31 = vsub.f32 1.5, %v1808_v18 }
 0x9b2   :  { %v3934_v5 = vpop.eup %3933  ;;  %v1783_v14 = vadd.f32 1e-06, %v1777_v57 }
 0x9b3   :  { %v1810_v51 = vmul.f32 %v3932_v22, %v1809_v31  ;;  %v1816_v26 = vmul.f32 %v3934_v5, %v1782_v47  ;;  %vm1822_vm12 = vweird.f32 %v3934_v5 }
 0x9b4   :  { %3935 = vrsqrt.f32 %v1783_v14  ;;  %vm1823_vm14 = vmor %vm1821_vm13, %vm1822_vm12  ;;  %vm1831_vm2 = vweird.f32 %v1783_v14 }
 0x9b5   :  { %v1817_v21 = vmul.f32 %v3934_v5, %v1816_v26  ;;  %v1814_v27 = vsel %vm1813_vm11, %v3932_v22, %v1810_v51 }
 0x9b6   :  { %v1847_v59 = vmul.f32 %v1814_v27, %v4922_v41 }
 0x9b7   :  { %v1818_v62 = vmul.f32 0.5, %v1817_v21  ;;  %v1772_v50 = vpop.xlane.xlu2 %1771 }
 0x9b8   :  { %v1778_v53 = vmul.f32 %v1772_v50, %v4186_v36  ;;  %v1854_v13 = vmul.f32 %v4959_v9, %v1847_v59 }
 0x9b9   :  { %v1819_v54 = vsub.f32 1.5, %v1818_v62 }
 0x9ba   :  { %v3936_v35 = vpop.eup %3935  ;;  %v1784_v15 = vadd.f32 1e-06, %v1778_v53  ;;  %v1861_v42 = vadd.f32 %v4965_v16, %v1854_v13 }
 0x9bb   :  { %v1820_v0 = vmul.f32 %v3934_v5, %v1819_v54  ;;  %v1826_v63 = vmul.f32 %v3936_v35, %v1783_v14  ;;  %vm1832_vm15 = vweird.f32 %v3936_v35 }
 0x9bc   :  { %3937 = vrsqrt.f32 %v1784_v15  ;;  %vm1833_vm3 = vmor %vm1831_vm2, %vm1832_vm15  ;;  %vm1841_vm5 = vweird.f32 %v1784_v15 }
 0x9bd   :  { %v1824_v17 = vsel %vm1823_vm14, %v3934_v5, %v1820_v0  ;;  %v1827_v40 = vmul.f32 %v3936_v35, %v1826_v63 }
 0x9be   :  { %v1848_v55 = vmul.f32 %v1824_v17, %v4929_v8 }
 0x9bf   :  { %v1828_v58 = vmul.f32 0.5, %v1827_v40 }
 0x9c0   :  { %v1855_v37 = vmul.f32 %v4959_v9, %v1848_v55 }
 0x9c1   :  { %v1829_v49 = vsub.f32 1.5, %v1828_v58 }
 0x9c2   :  { %v3938_v56 = vpop.eup %3937  ;;  %v1862_v41 = vadd.f32 %v4965_v16, %v1855_v37 }
 0x9c3   :  { %v1830_v44 = vmul.f32 %v3936_v35, %v1829_v49  ;;  %v1836_v39 = vmul.f32 %v3938_v56, %v1784_v15  ;;  %vm1842_vm4 = vweird.f32 %v3938_v56 }
 0x9c4   :  { %v1866_v34 = vpack.c.bf16 %v1862_v41, %v1861_v42  ;;  %vm1843_vm6 = vmor %vm1841_vm5, %vm1842_vm4 }
 0x9c5   :  { %v1837_v1 = vmul.f32 %v3938_v56, %v1836_v39  ;;  %v1834_v8 = vsel %vm1833_vm3, %v3936_v35, %v1830_v44 }
 0x9c6   :  { %3644 = vmatmul.msk.bf16.gmra.mxu1 %vm120_vm1, %v1866_v34  ;;  %v1849_v3 = vmul.f32 %v1834_v8, %v4936_v28  ;;  %v3784_v28 = vld [vmem:[%s5728_s6 + $0xd] ss:$0 sm:$0xff] }
 0x9c7   :  { %v1838_v23 = vmul.f32 0.5, %v1837_v1 }
 0x9c8   :  { %v1856_v52 = vmul.f32 %v4959_v9, %v1849_v3 }
 0x9c9   :  { %v1839_v7 = vsub.f32 1.5, %v1838_v23 }
 0x9ca   :  { %v1863_v30 = vadd.f32 %v4965_v16, %v1856_v52 }
 0x9cb   :  { %v1840_v12 = vmul.f32 %v3938_v56, %v1839_v7 }
 0x9cd   :  { %v1844_v33 = vsel %vm1843_vm6, %v3938_v56, %v1840_v12 }
 0x9ce   :  { %v1850_v11 = vmul.f32 %v1844_v33, %v4943_v43 }
 0x9d0   :  { %v1857_v45 = vmul.f32 %v4959_v9, %v1850_v11 }
 0x9d2   :  { %v1864_v38 = vadd.f32 %v4965_v16, %v1857_v45 }
 0x9d4   :  { %v1867_v29 = vpack.c.bf16 %v1864_v38, %v1863_v30 }
 0x9d6   :  { %3645 = vmatmul.msk.bf16.gmra.mxu1 %vm120_vm1, %v1867_v29 }
 0xa11   :  { %v1904_v61 = vpop.f32.mrf.mxu1 }
 0xa12   :  { %v1905_v31 = vadd.f32 %v3784_v28, %v1904_v61 }
 0xa14   :  { %v5000_v51 = vpack.c.bf16 %v1905_v31, %v1905_v31 }
 0xa19   :  { %v1906_v2 = vpop.f32.mrf.mxu1 }
 0xa1a   :  { %v1907_v62 = vadd.f32 %v3784_v28, %v1906_v2 }
 0xa1c   :  { %v5008_v53 = vpack.c.bf16 %v1907_v62, %v1907_v62 }
 0xa43   :  { %v1909_v20 = vpop.f32.mrf.mxu1 }
 0xa44   :  { %v1910_v4 = vadd.f32 %v3784_v28, %v1909_v20 }
 0xa46   :  { %v1921_v43 = vpack.c.bf16 %v1910_v4, %v1910_v4 }
 0xa48   :  { %1935 = vrot.lane.b32.xlu1 %v1921_v43, %s4078_s10  ;;  %v1969_v25 = vunpack.c.l.b16 %v1921_v43 }
 0xa4b   :  { %v1911_v22 = vpop.f32.mrf.mxu1 }
 0xa4c   :  { %v1912_v9 = vadd.f32 %v3784_v28, %v1911_v22 }
 0xa4e   :  { %v1922_v47 = vpack.c.bf16 %v1912_v9, %v1912_v9 }
 0xa50   :  { %v1970_v60 = vunpack.c.l.b16 %v1922_v47  ;;  %1937 = vrot.lane.b32.xlu2 %v1922_v47, %s4078_s10 }
 0xa52   :  { %v4996_v16 = vpack.c.b16 %v1970_v60, %v1969_v25  ;;  %v1967_v25 = vunpack.c.l.b16 %v5000_v51 }
 0xa53   :  { %v1914_v18 = vpop.f32.mrf.mxu1 }
 0xa54   :  { %v1915_v24 = vadd.f32 %v3784_v28, %v1914_v18 }
 0xa56   :  { %v1923_v57 = vpack.c.bf16 %v1915_v24, %v1915_v24 }
 0xa58   :  { %1951 = vrot.lane.b32.xlu2 %v1923_v57, %s4079_s11  ;;  %1939 = vrot.lane.b32.xlu1 %v1923_v57, %s4078_s10  ;;  %v1971_v21 = vunpack.c.l.b16 %v1923_v57 }
 0xa5b   :  { %v1916_v5 = vpop.f32.mrf.mxu1 }
 0xa5c   :  { %v1917_v14 = vadd.f32 %v3784_v28, %v1916_v5 }
 0xa5e   :  { %v1924_v26 = vpack.c.bf16 %v1917_v14, %v1917_v14 }
 0xa60   :  { %1941 = vrot.lane.b32.xlu0 %v1924_v26, %s4078_s10  ;;  %1931 = vrot.lane.b32.xlu2 %v5000_v51, %s4078_s10  ;;  %v1972_v27 = vunpack.c.l.b16 %v1924_v26 }
 0xa61   :  { %1949 = vrot.lane.b32.xlu1 %v1922_v47, %s4079_s11 }
 0xa62   :  { %v5006_v50 = vpack.c.b16 %v1972_v27, %v1971_v21 }
 0xa68   :  { %1953 = vrot.lane.b32.xlu0 %v1924_v26, %s4079_s11  ;;  %1945 = vrot.lane.b32.xlu2 %v5008_v53, %s4079_s11 }
 0xa69   :  { %1943 = vrot.lane.b32.xlu1 %v5000_v51, %s4079_s11 }
 0xa70   :  { %1947 = vrot.lane.b32.xlu0 %v1921_v43, %s4079_s11  ;;  %1959 = vrot.lane.b32.xlu2 %v1921_v43, %s4080_s12  ;;  %v1968_v43 = vunpack.c.l.b16 %v5008_v53 }
 0xa71   :  { %1965 = vrot.lane.b32.xlu1 %v1924_v26, %s4080_s12 }
 0xa72   :  { %v1973_v31 = vpack.c.b16 %v1968_v43, %v1967_v25  ;;  %v5140_v25 = vld [vmem:[%s5730_s2 + $0x10] sm:$0xff] }
 0xa78   :  { %1933 = vrot.lane.b32.xlu0 %v5008_v53, %s4078_s10  ;;  %1957 = vrot.lane.b32.xlu2 %v5008_v53, %s4080_s12 }
 0xa79   :  { %1955 = vrot.lane.b32.xlu1 %v5000_v51, %s4080_s12 }
 0xa80   :  { %1963 = vrot.lane.b32.xlu0 %v1923_v57, %s4080_s12 }
 0xa88   :  { %1961 = vrot.lane.b32.xlu0 %v1922_v47, %s4080_s12 }
 0xaaa   :  { %v1938_v54 = vpop.permute.xlu2 %1937 }
 0xaab   :  { %v2027_v59 = vunpack.c.l.b16 %v1938_v54 }
 0xab2   :  { %v1952_v17 = vpop.permute.xlu2 %1951 }
 0xab3   :  { %v2085_v56 = vunpack.c.l.b16 %v1952_v17 }
 0xaba   :  { %v1936_v35 = vpop.permute.xlu1 %1935  ;;  %v1932_v42 = vpop.permute.xlu2 %1931 }
 0xabb   :  { %v2026_v15 = vunpack.c.l.b16 %v1936_v35  ;;  %v2024_v33 = vunpack.c.l.b16 %v1932_v42 }
 0xabd   :  { %v5026_v0 = vpack.c.b16 %v2027_v59, %v2026_v15 }
 0xabf   :  { %2035 = vrot.lane.b32.xlu2 %v5026_v0, %s4081_s13 }
 0xac2   :  { %v1946_v23 = vpop.permute.xlu2 %1945 }
 0xac3   :  { %v2082_v11 = vunpack.c.l.b16 %v1946_v23 }
 0xaca   :  { %v1940_v63 = vpop.permute.xlu1 %1939  ;;  %v1960_v29 = vpop.permute.xlu2 %1959 }
 0xacb   :  { %v2028_v55 = vunpack.c.l.b16 %v1940_v63  ;;  %v2140_v60 = vunpack.c.l.b16 %v1960_v29 }
 0xad2   :  { %v1942_v40 = vpop.permute.xlu0 %1941  ;;  %v1958_v22 = vpop.permute.xlu2 %1957 }
 0xad3   :  { %v2029_v13 = vunpack.c.l.b16 %v1942_v40  ;;  %v1950_v37 = vpop.permute.xlu1 %1949  ;;  %v2139_v24 = vunpack.c.l.b16 %v1958_v22 }
 0xad4   :  { %v2084_v34 = vunpack.c.l.b16 %v1950_v37 }
 0xad5   :  { %v5030_v58 = vpack.c.b16 %v2029_v13, %v2028_v55 }
 0xad7   :  { %2037 = vrot.lane.b32.xlu0 %v5030_v58, %s4081_s13 }
 0xada   :  { %v1954_v49 = vpop.permute.xlu0 %1953 }
 0xadb   :  { %v2086_v41 = vunpack.c.l.b16 %v1954_v49  ;;  %v1944_v1 = vpop.permute.xlu1 %1943 }
 0xadc   :  { %v2081_v3 = vunpack.c.l.b16 %v1944_v1 }
 0xadd   :  { %v5034_v44 = vpack.c.b16 %v2086_v41, %v2085_v56 }
 0xade   :  { %v5044_v45 = vpack.c.b16 %v2082_v11, %v2081_v3 }
 0xadf   :  { %2094 = vrot.lane.b32.xlu1 %v5034_v44, %s4081_s13 }
 0xae2   :  { %v1948_v39 = vpop.permute.xlu0 %1947 }
 0xae3   :  { %v2083_v8 = vunpack.c.l.b16 %v1948_v39  ;;  %v1966_v30 = vpop.permute.xlu1 %1965 }
 0xae4   :  { %v2143_v2 = vunpack.c.l.b16 %v1966_v30  ;;  %v4071_v30 = vld [vmem:[%s5730_s2] sm:$0xff] }
 0xae5   :  { %v5038_v7 = vpack.c.b16 %v2084_v34, %v2083_v8 }
 0xae7   :  { %2092 = vrot.lane.b32.xlu0 %v5038_v7, %s4081_s13  ;;  %1980 = vrot.lane.b32.xlu1 %v5006_v50, %s4081_s13 }
 0xaea   :  { %v1934_v12 = vpop.permute.xlu0 %1933 }
 0xaeb   :  { %v2025_v52 = vunpack.c.l.b16 %v1934_v12  ;;  %v1956_v4 = vpop.permute.xlu1 %1955 }
 0xaec   :  { %v2138_v9 = vunpack.c.l.b16 %v1956_v4 }
 0xaed   :  { %v2030_v38 = vpack.c.b16 %v2025_v52, %v2024_v33 }
 0xaee   :  { %v5059_v5 = vpack.c.b16 %v2139_v24, %v2138_v9 }
 0xaef   :  { %2033 = vrot.lane.b32.xlu2 %v2030_v38, %s4081_s13  ;;  %2090 = vrot.lane.b32.xlu0 %v5044_v45, %s4081_s13 }
 0xaf2   :  { %v1964_v61 = vpop.permute.xlu0 %1963 }
 0xaf3   :  { %v2142_v28 = vunpack.c.l.b16 %v1964_v61 }
 0xaf5   :  { %v5049_v20 = vpack.c.b16 %v2143_v2, %v2142_v28  ;;  %v5130_v2 = vld [vmem:[%s5730_s2 + $0x8] sm:$0xff] }
 0xaf7   :  { %2151 = vrot.lane.b32.xlu1 %v5049_v20, %s4081_s13  ;;  %1978 = vrot.lane.b32.xlu2 %v4996_v16, %s4081_s13 }
 0xafa   :  { %v1962_v47 = vpop.permute.xlu0 %1961 }
 0xafb   :  { %v2141_v18 = vunpack.c.l.b16 %v1962_v47 }
 0xafd   :  { %v5057_v57 = vpack.c.b16 %v2141_v18, %v2140_v60 }
 0xaff   :  { %1976 = vrot.lane.b32.xlu1 %v1973_v31, %s4081_s13  ;;  %2149 = vrot.lane.b32.xlu0 %v5057_v57, %s4081_s13 }
 0xb00   :  { %2147 = vrot.lane.b32.xlu2 %v5059_v5, %s4081_s13 }
 0xb07   :  { %2662 = vrot.lane.b32.xlu1 %v5038_v7, %s4082_s14  ;;  %2605 = vrot.lane.b32.xlu0 %v5026_v0, %s4082_s14 }
 0xb08   :  { %2664 = vrot.lane.b32.xlu2 %v5034_v44, %s4082_s14 }
 0xb0f   :  { %2603 = vrot.lane.b32.xlu1 %v2030_v38, %s4082_s14  ;;  %2548 = vrot.lane.b32.xlu0 %v4996_v16, %s4082_s14 }
 0xb10   :  { %2721 = vrot.lane.b32.xlu2 %v5049_v20, %s4082_s14 }
 0xb17   :  { %2550 = vrot.lane.b32.xlu1 %v5006_v50, %s4082_s14  ;;  %2719 = vrot.lane.b32.xlu0 %v5057_v57, %s4082_s14 }
 0xb19   :  { %v2036_v14 = vpop.permute.xlu2 %2035 }
 0xb1a   :  { %v2052_v53 = vsel %vm391_vm7, %v2036_v14, 0 }
 0xb1f   :  { %2660 = vrot.lane.b32.xlu1 %v5044_v45, %s4082_s14 }
 0xb27   :  { %2546 = vrot.lane.b32.xlu1 %v1973_v31, %s4082_s14 }
 0xb2f   :  { %2607 = vrot.lane.b32.xlu1 %v5030_v58, %s4082_s14 }
 0xb49   :  { %v2038_v51 = vpop.permute.xlu0 %2037  ;;  %v2034_v26 = vpop.permute.xlu2 %2033 }
 0xb4a   :  { %v2055_v21 = vsel %vm391_vm7, %v2038_v51, 0  ;;  %v2049_v15 = vsel %vm391_vm7, %v2034_v26, 0  ;;  %v5152_v26 = vld [vmem:[%s5730_s2 + $0x18] sm:$0xff] }
 0xb4b   :  { %2062 = vmatpush.bf16.xpose.msra.mxu2 %v2055_v21 }
 0xb51   :  { %v2095_v27 = vpop.permute.xlu1 %2094  ;;  %v1979_v62 = vpop.permute.xlu2 %1978 }
 0xb52   :  { %v2112_v54 = vsel %vm391_vm7, %v2095_v27, 0  ;;  %v1995_v13 = vsel %vm391_vm7, %v1979_v62, 0 }
 0xb53   :  { %2063 = vmatpush.bf16.xpose.msra.mxu2 %v2052_v53  ;;  %2119 = vmatpush.bf16.xpose.msra.mxu3 %v2112_v54 }
 0xb59   :  { %v2093_v35 = vpop.permute.xlu0 %2092  ;;  %v1981_v59 = vpop.permute.xlu1 %1980 }
 0xb5a   :  { %v2109_v63 = vsel %vm391_vm7, %v2093_v35, 0  ;;  %v1998_v17 = vsel %vm391_vm7, %v1981_v59, 0  ;;  %v2148_v40 = vpop.permute.xlu2 %2147 }
 0xb5b   :  { %2005 = vmatpush.bf16.xpose.msra.mxu0 %v1998_v17  ;;  %2064 = vmatpush.bf16.xpose.msra.mxu2 %v2049_v15  ;;  %v2163_v3 = vsel %vm391_vm7, %v2148_v40, 0  ;;  %v5165_v15 = vld [vmem:[%s5730_s2 + $0x20] sm:$0xff] }
 0xb5c   :  { %2120 = vmatpush.bf16.xpose.msra.mxu3 %v2109_v63 }
 0xb61   :  { %v2091_v55 = vpop.permute.xlu0 %2090 }
 0xb62   :  { %v2106_v37 = vsel %vm391_vm7, %v2091_v55, 0  ;;  %3649 = vmatmul.msk.bf16.vlgmr.msra.gmra.mxu2 %vm391_vm7, %v2030_v38  ;;  %v2665_v49 = vpop.permute.xlu2 %2664 }
 0xb63   :  { %2006 = vmatpush.bf16.xpose.msra.mxu0 %v1995_v13 }
 0xb64   :  { %2121 = vmatpush.bf16.xpose.msra.mxu3 %v2106_v37 }
 0xb69   :  { %v2152_v56 = vpop.permute.xlu1 %2151 }
 0xb6a   :  { %v2169_v42 = vsel %vm391_vm7, %v2152_v56, 0  ;;  %v2722_v12 = vpop.permute.xlu2 %2721 }
 0xb6b   :  { %3652 = vmatmul.msk.bf16.vlgmr.msra.gmra.mxu3 %vm391_vm7, %v5044_v45  ;;  %2176 = vmatpush.bf16.xpose.msrb.mxu1 %v2169_v42 }
 0xb6c   :  { %2683 = vmatpush.bf16.msrb.mxu3 %v2665_v49 }
 0xb71   :  { %v1977_v41 = vpop.permute.xlu1 %1976  ;;  %v2150_v39 = vpop.permute.xlu0 %2149 }
 0xb72   :  { %v1992_v34 = vsel %vm391_vm7, %v1977_v41, 0  ;;  %v2166_v1 = vsel %vm391_vm7, %v2150_v39, 0  ;;  %3650 = vmatmul.msk.bf16.gmra.mxu2 %vm391_vm7, %v5026_v0 }
 0xb73   :  { %2007 = vmatpush.bf16.xpose.msra.mxu0 %v1992_v34  ;;  %2177 = vmatpush.bf16.xpose.msrb.mxu1 %v2166_v1  ;;  %v5182_v34 = vld [vmem:[%s5730_s2 + $0x28] sm:$0xff] }
 0xb79   :  { %v2663_v8 = vpop.permute.xlu1 %2662  ;;  %v2606_v23 = vpop.permute.xlu0 %2605 }
 0xb7a   :  { %3646 = vmatmul.msk.bf16.vlgmr.msra.gmra.mxu0 %vm391_vm7, %v1973_v31  ;;  %2684 = vmatpush.bf16.msrb.mxu3 %v2663_v8 }
 0xb7b   :  { %3653 = vmatmul.msk.bf16.gmra.mxu3 %vm391_vm7, %v5038_v7  ;;  %2178 = vmatpush.bf16.xpose.msrb.mxu1 %v2163_v3 }
 0xb81   :  { %v2604_v33 = vpop.permute.xlu1 %2603  ;;  %v2549_v11 = vpop.permute.xlu0 %2548 }
 0xb82   :  { %3651 = vmatmul.msk.bf16.gmra.mxu2 %vm391_vm7, %v5030_v58  ;;  %3655 = vmatmul.msk.bf16.vlgmr.msrb.gmra.mxu1 %vm391_vm7, %v5059_v5 }
 0xb83   :  { %2740 = vmatpush.bf16.msra.mxu1 %v2722_v12 }
 0xb89   :  { %v2551_v0 = vpop.permute.xlu1 %2550  ;;  %v2720_v52 = vpop.permute.xlu0 %2719 }
 0xb8a   :  { %3647 = vmatmul.msk.bf16.gmra.mxu0 %vm391_vm7, %v4996_v16  ;;  %2741 = vmatpush.bf16.msra.mxu1 %v2720_v52 }
 0xb8b   :  { %3654 = vmatmul.msk.bf16.gmra.mxu3 %vm391_vm7, %v5034_v44  ;;  %2569 = vmatpush.bf16.msrb.mxu0 %v2551_v0 }
 0xb8f   :  { %2570 = vmatpush.bf16.msrb.mxu0 %v2549_v11 }
 0xb91   :  { %v2661_v7 = vpop.permute.xlu1 %2660 }
 0xb92   :  { %3656 = vmatmul.msk.bf16.gmra.mxu1 %vm391_vm7, %v5057_v57  ;;  %2685 = vmatpush.bf16.msrb.mxu3 %v2661_v7 }
 0xb99   :  { %v2547_v58 = vpop.permute.xlu1 %2546 }
 0xb9a   :  { %3648 = vmatmul.msk.bf16.gmra.mxu0 %vm391_vm7, %v5006_v50 }
 0xb9b   :  { %2571 = vmatpush.bf16.msrb.mxu0 %v2547_v58 }
 0xba1   :  { %v2608_v45 = vpop.permute.xlu1 %2607 }
 0xba2   :  { %3657 = vmatmul.msk.bf16.gmra.mxu1 %vm391_vm7, %v5049_v20  ;;  %2626 = vmatpush.bf16.msrb.mxu2 %v2608_v45 }
 0xba6   :  { %2627 = vmatpush.bf16.msrb.mxu2 %v2606_v23 }
 0xbaa   :  { %2628 = vmatpush.bf16.msrb.mxu2 %v2604_v33 }
 0xbe5   :  { %v2066_v43 = vpop.f32.mrf.mxu2 }
 0xbe6   :  { %v2201_v8 = vmul.f32 0.35355338, %v2066_v43 }
 0xbe8   :  { %v5193_v52 = vadd.f32 %v4071_v30, %v2201_v8 }
 0xbed   :  { %v2068_v14 = vpop.f32.mrf.mxu2 }
 0xbee   :  { %v2123_v9 = vpop.f32.mrf.mxu3  ;;  %v2202_v27 = vmul.f32 0.35355338, %v2068_v14 }
 0xbef   :  { %v2207_v23 = vmul.f32 0.35355338, %v2123_v9 }
 0xbf0   :  { %v5160_v54 = vadd.f32 %v5130_v2, %v2202_v27 }
 0xbf1   :  { %v5195_v7 = vadd.f32 %v4071_v30, %v2207_v23 }
 0xbf2   :  { %v2264_v55 = vsel %vm78_vm0, %v5160_v54, -inf }
 0xbf5   :  { %v2071_v56 = vpop.f32.mrf.mxu2 }
 0xbf6   :  { %v5147_v51 = vpop.f32.mrf.mxu3 }
 0xbf7   :  { %v2009_v16 = vpop.f32.mrf.mxu0 }
 0xbf8   :  { %v2195_v44 = vmul.f32 0.35355338, %v2009_v16 }
 0xbfa   :  { %v5123_v38 = vadd.f32 %v4071_v30, %v2195_v44 }
 0xbfc   :  { %v2243_v29 = vsel %vm78_vm0, %v5123_v38, -inf }
 0xbfd   :  { %2244 = vmax.xlane.f32.xlu1 %v2243_v29  ;;  %v2073_v16 = vpop.f32.mrf.mxu2  ;;  %v2261_v29 = vsel %vm78_vm0, %v5193_v52, -inf }
 0xbfe   :  { %v2128_v17 = vpop.f32.mrf.mxu3 }
 0xbff   :  { %v2011_v50 = vpop.f32.mrf.mxu0  ;;  %v2180_v4 = vpop.f32.mrf.mxu1  ;;  %v2209_v33 = vmul.f32 0.35355338, %v2128_v17 }
 0xc00   :  { %v2196_v61 = vmul.f32 0.35355338, %v2011_v50  ;;  %v2213_v40 = vmul.f32 0.35355338, %v2180_v4  ;;  %v2279_v50 = vsel %vm78_vm0, %v5195_v7, -inf }
 0xc01   :  { %v5198_v45 = vadd.f32 %v5140_v25, %v2209_v33 }
 0xc02   :  { %v5133_v28 = vadd.f32 %v5130_v2, %v2196_v61  ;;  %v5174_v42 = vadd.f32 %v4071_v30, %v2213_v40  ;;  %v2204_v61 = vmul.f32 0.35355338, %v2073_v16 }
 0xc04   :  { %v2246_v20 = vsel %vm78_vm0, %v5133_v28, -inf  ;;  %v2297_v12 = vsel %vm78_vm0, %v5174_v42, -inf  ;;  %v5210_v43 = vadd.f32 %v5152_v26, %v2204_v61 }
 0xc05   :  { %2247 = vmax.xlane.f32.xlu2 %v2246_v20  ;;  %v2285_v20 = vsel %vm78_vm0, %v5198_v45, -inf }
 0xc06   :  { %v2130_v0 = vpop.f32.mrf.mxu3 }
 0xc07   :  { %v2014_v22 = vpop.f32.mrf.mxu0  ;;  %v2182_v57 = vpop.f32.mrf.mxu1 }
 0xc08   :  { %v2197_v47 = vmul.f32 0.35355338, %v2014_v22  ;;  %v2214_v44 = vmul.f32 0.35355338, %v2182_v57 }
 0xc0a   :  { %v5143_v60 = vadd.f32 %v5140_v25, %v2197_v47  ;;  %v5207_v30 = vadd.f32 %v5130_v2, %v2214_v44 }
 0xc0c   :  { %v2249_v18 = vsel %vm78_vm0, %v5143_v60, -inf  ;;  %v2300_v9 = vsel %vm78_vm0, %v5207_v30, -inf }
 0xc0d   :  { %2250 = vmax.xlane.f32.xlu0 %v2249_v18  ;;  %v2270_v18 = vsel %vm78_vm0, %v5210_v43, -inf }
 0xc0e   :  { %v2133_v4 = vpop.f32.mrf.mxu3 }
 0xc0f   :  { %v2016_v24 = vpop.f32.mrf.mxu0  ;;  %v2185_v59 = vpop.f32.mrf.mxu1 }
 0xc10   :  { %v2198_v31 = vmul.f32 0.35355338, %v2016_v24  ;;  %v2215_v37 = vmul.f32 0.35355338, %v2185_v59 }
 0xc12   :  { %v5155_v21 = vadd.f32 %v5152_v26, %v2198_v31  ;;  %v5177_v39 = vadd.f32 %v5140_v25, %v2215_v37  ;;  %v2208_v37 = vmul.f32 0.35355338, %v5147_v51 }
 0xc14   :  { %v2252_v62 = vsel %vm78_vm0, %v5155_v21, -inf  ;;  %v2303_v11 = vsel %vm78_vm0, %v5177_v39, -inf }
 0xc15   :  { %2253 = vmax.xlane.f32.xlu1 %v2252_v62 }
 0xc16   :  { %v2135_v57 = vpop.f32.mrf.mxu3 }
 0xc17   :  { %v2019_v53 = vpop.f32.mrf.mxu0  ;;  %v2187_v58 = vpop.f32.mrf.mxu1  ;;  %v2212_v31 = vmul.f32 0.35355338, %v2135_v57 }
 0xc18   :  { %v2199_v35 = vmul.f32 0.35355338, %v2019_v53 }
 0xc19   :  { %v5222_v27 = vadd.f32 %v5182_v34, %v2212_v31 }
 0xc1a   :  { %v5168_v63 = vadd.f32 %v5165_v15, %v2199_v35 }
 0xc1b   :  { %v2294_v62 = vsel %vm78_vm0, %v5222_v27, -inf }
 0xc1c   :  { %v2255_v13 = vsel %vm78_vm0, %v5168_v63, -inf }
 0xc1d   :  { %2265 = vmax.xlane.f32.xlu1 %v2264_v55  ;;  %2256 = vmax.xlane.f32.xlu2 %v2255_v13 }
 0xc1f   :  { %v2021_v49 = vpop.f32.mrf.mxu0  ;;  %v2190_v22 = vpop.f32.mrf.mxu1 }
 0xc20   :  { %v2200_v41 = vmul.f32 0.35355338, %v2021_v49  ;;  %v2217_v47 = vmul.f32 0.35355338, %v2190_v22 }
 0xc22   :  { %v5185_v1 = vadd.f32 %v5182_v34, %v2200_v41  ;;  %v5217_v24 = vadd.f32 %v5165_v15, %v2217_v47  ;;  %v5234_v41 = vadd.f32 %v5130_v2, %v2208_v37 }
 0xc24   :  { %v2258_v3 = vsel %vm78_vm0, %v5185_v1, -inf  ;;  %v2309_v14 = vsel %vm78_vm0, %v5217_v24, -inf }
 0xc25   :  { %2259 = vmax.xlane.f32.xlu0 %v2258_v3  ;;  %2298 = vmax.xlane.f32.xlu2 %v2297_v12  ;;  %v2203_v3 = vmul.f32 0.35355338, %v2071_v56  ;;  %v2282_v12 = vsel %vm78_vm0, %v5234_v41, -inf }
 0xc26   :  { %2304 = vmax.xlane.f32.xlu1 %v2303_v11 }
 0xc27   :  { %v5244_v11 = vadd.f32 %v5140_v25, %v2203_v3  ;;  %v2192_v3 = vpop.f32.mrf.mxu1 }
 0xc2d   :  { %2262 = vmax.xlane.f32.xlu0 %v2261_v29  ;;  %2280 = vmax.xlane.f32.xlu2 %v2279_v50  ;;  %v2076_v29 = vpop.f32.mrf.mxu2 }
 0xc2e   :  { %2286 = vmax.xlane.f32.xlu1 %v2285_v20 }
 0xc35   :  { %2301 = vmax.xlane.f32.xlu0 %v2300_v9  ;;  %v2211_v9 = vmul.f32 0.35355338, %v2133_v4 }
 0xc36   :  { %2271 = vmax.xlane.f32.xlu1 %v2270_v18 }
 0xc3e   :  { %2310 = vmax.xlane.f32.xlu1 %v2309_v14  ;;  %v2078_v14 = vpop.f32.mrf.mxu2 }
 0xc46   :  { %2295 = vmax.xlane.f32.xlu1 %v2294_v62 }
 0xc70   :  { %v2245_v53 = vpop.xlane.xlu1 %2244 }
 0xc71   :  { %v2315_v35 = vsub.f32 %v5123_v38, %v2245_v53  ;;  %v2206_v53 = vmul.f32 0.35355338, %v2078_v14 }
 0xc73   :  { %v2339_v59 = vmul.f32 1.442695, %v2315_v35 }
 0xc75   :  { %3939 = vpow2.f32 %v2339_v59 }
 0xc78   :  { %v2248_v17 = vpop.xlane.xlu2 %2247 }
 0xc79   :  { %v2316_v40 = vsub.f32 %v5133_v28, %v2248_v17  ;;  %v2216_v28 = vmul.f32 0.35355338, %v2187_v58  ;;  %v2267_v58 = vsel %vm78_vm0, %v5244_v11, -inf  ;;  %v2205_v17 = vmul.f32 0.35355338, %v2076_v29 }
 0xc7b   :  { %v5228_v55 = vpop.eup %3939  ;;  %v2341_v13 = vmul.f32 1.442695, %v2316_v40  ;;  %v5247_v2 = vadd.f32 %v5152_v26, %v2216_v28 }
 0xc7c   :  { %v2387_v49 = vsel %vm78_vm0, %v5228_v55, 0.0 }
 0xc7d   :  { %3941 = vpow2.f32 %v2341_v13  ;;  %2388 = vadd.xlane.f32.xlu0 %v2387_v49  ;;  %v2306_v44 = vsel %vm78_vm0, %v5247_v2, -inf  ;;  %v5285_v49 = vadd.f32 %v5182_v34, %v2206_v53 }
 0xc80   :  { %v2251_v8 = vpop.xlane.xlu0 %2250 }
 0xc81   :  { %v2317_v23 = vsub.f32 %v5143_v60, %v2251_v8  ;;  %v2210_v60 = vmul.f32 0.35355338, %v2130_v0  ;;  %v5288_v8 = vadd.f32 %v5165_v15, %v2205_v17 }
 0xc83   :  { %v5236_v38 = vpop.eup %3941  ;;  %v2343_v33 = vmul.f32 1.442695, %v2317_v23  ;;  %v5255_v25 = vadd.f32 %v5152_v26, %v2210_v60  ;;  %v5267_v26 = vadd.f32 %v5165_v15, %v2211_v9 }
 0xc84   :  { %v2390_v51 = vsel %vm78_vm0, %v5236_v38, 0.0 }
 0xc85   :  { %2283 = vmax.xlane.f32.xlu0 %v2282_v12  ;;  %2391 = vadd.xlane.f32.xlu2 %v2390_v51  ;;  %3943 = vpow2.f32 %v2343_v33  ;;  %v2288_v18 = vsel %vm78_vm0, %v5255_v25, -inf  ;;  %v2291_v35 = vsel %vm78_vm0, %v5267_v26, -inf  ;;  %v2276_v51 = vsel %vm78_vm0, %v5285_v49, -inf }
 0xc86   :  { %v2218_v33 = vmul.f32 0.35355338, %v2192_v3 }
 0xc88   :  { %v2254_v16 = vpop.xlane.xlu1 %2253 }
 0xc89   :  { %v2318_v56 = vsub.f32 %v5155_v21, %v2254_v16  ;;  %v2273_v16 = vsel %vm78_vm0, %v5288_v8, -inf }
 0xc8b   :  { %v2345_v50 = vmul.f32 1.442695, %v2318_v56  ;;  %v5259_v22 = vpop.eup %3943 }
 0xc8c   :  { %v2393_v47 = vsel %vm78_vm0, %v5259_v22, 0.0 }
 0xc8d   :  { %2268 = vmax.xlane.f32.xlu0 %v2267_v58  ;;  %2307 = vmax.xlane.f32.xlu2 %v2306_v44  ;;  %3945 = vpow2.f32 %v2345_v50  ;;  %v5299_v44 = vadd.f32 %v5182_v34, %v2218_v33 }
 0xc8f   :  { %v2312_v50 = vsel %vm78_vm0, %v5299_v44, -inf }
 0xc90   :  { %v2266_v61 = vpop.xlane.xlu1 %2265  ;;  %v5257_v20 = vpop.xlane.xlu2 %2256 }
 0xc91   :  { %v2322_v21 = vsub.f32 %v5160_v54, %v2266_v61 }
 0xc93   :  { %v2353_v0 = vmul.f32 1.442695, %v2322_v21  ;;  %v5271_v54 = vpop.eup %3945 }
 0xc94   :  { %v2396_v13 = vsel %vm78_vm0, %v5271_v54, 0.0 }
 0xc95   :  { %3947 = vpow2.f32 %v2353_v0  ;;  %2394 = vadd.xlane.f32.xlu0 %v2393_v47  ;;  %2289 = vmax.xlane.f32.xlu2 %v2288_v18 }
 0xc98   :  { %v5269_v57 = vpop.xlane.xlu0 %2259  ;;  %v2299_v31 = vpop.xlane.xlu2 %2298 }
 0xc99   :  { %v2333_v62 = vsub.f32 %v5174_v42, %v2299_v31  ;;  %v5280_v40 = vpop.xlane.xlu1 %2304 }
 0xc9b   :  { %v5273_v4 = vpop.eup %3947  ;;  %v2375_v37 = vmul.f32 1.442695, %v2333_v62 }
 0xc9c   :  { %v2408_v59 = vsel %vm78_vm0, %v5273_v4, 0.0 }
 0xc9d   :  { %2292 = vmax.xlane.f32.xlu0 %v2291_v35  ;;  %2409 = vadd.xlane.f32.xlu1 %v2408_v59  ;;  %3949 = vpow2.f32 %v2375_v37 }
 0xc9e   :  { %2397 = vadd.xlane.f32.xlu2 %v2396_v13 }
 0xca0   :  { %v2263_v42 = vpop.xlane.xlu0 %2262  ;;  %v2281_v23 = vpop.xlane.xlu2 %2280 }
 0xca1   :  { %v2321_v28 = vsub.f32 %v5193_v52, %v2263_v42  ;;  %v2327_v12 = vsub.f32 %v5195_v7, %v2281_v23  ;;  %v2287_v56 = vpop.xlane.xlu1 %2286 }
 0xca2   :  { %v2329_v37 = vsub.f32 %v5198_v45, %v2287_v56 }
 0xca3   :  { %v2351_v60 = vmul.f32 1.442695, %v2321_v28  ;;  %v2363_v15 = vmul.f32 1.442695, %v2327_v12  ;;  %v5296_v58 = vpop.eup %3949 }
 0xca4   :  { %v2441_v29 = vsel %vm78_vm0, %v5296_v58, 0.0  ;;  %v2367_v28 = vmul.f32 1.442695, %v2329_v37 }
 0xca5   :  { %2277 = vmax.xlane.f32.xlu0 %v2276_v51  ;;  %3951 = vpow2.f32 %v2351_v60 }
 0xca6   :  { %2274 = vmax.xlane.f32.xlu2 %v2273_v16  ;;  %3953 = vpow2.f32 %v2363_v15 }
 0xca8   :  { %v2302_v52 = vpop.xlane.xlu0 %2301 }
 0xca9   :  { %v2334_v7 = vsub.f32 %v5207_v30, %v2302_v52  ;;  %v2272_v0 = vpop.xlane.xlu1 %2271 }
 0xcaa   :  { %v2324_v34 = vsub.f32 %v5210_v43, %v2272_v0 }
 0xcab   :  { %v2377_v61 = vmul.f32 1.442695, %v2334_v7  ;;  %v5306_v21 = vpop.eup %3951 }
 0xcac   :  { %v5308_v9 = vpop.eup %3953  ;;  %v2405_v30 = vsel %vm78_vm0, %v5306_v21, 0.0  ;;  %v2357_v18 = vmul.f32 1.442695, %v2324_v34 }
 0xcad   :  { %2442 = vadd.xlane.f32.xlu0 %v2441_v29  ;;  %3955 = vpow2.f32 %v2377_v61  ;;  %v2423_v47 = vsel %vm78_vm0, %v5308_v9, 0.0 }
 0xcae   :  { %2313 = vmax.xlane.f32.xlu2 %v2312_v50  ;;  %3957 = vpow2.f32 %v2357_v18 }
 0xcb3   :  { %v5315_v31 = vpop.eup %3955 }
 0xcb4   :  { %v2444_v14 = vsel %vm78_vm0, %v5315_v31, 0.0  ;;  %v5319_v62 = vpop.eup %3957 }
 0xcb5   :  { %2406 = vadd.xlane.f32.xlu0 %v2405_v30  ;;  %v2414_v43 = vsel %vm78_vm0, %v5319_v62, 0.0 }
 0xcb6   :  { %2424 = vadd.xlane.f32.xlu2 %v2423_v47 }
 0xcbe   :  { %2445 = vadd.xlane.f32.xlu2 %v2444_v14  ;;  %v2311_v14 = vpop.xlane.xlu1 %2310 }
 0xcc6   :  { %2415 = vadd.xlane.f32.xlu2 %v2414_v43 }
 0xcf0   :  { %v2389_v53 = vpop.xlane.xlu0 %2388 }
 0xcf1   :  { %3959 = vrcp.f32 %v2389_v53 }
 0xcf7   :  { %v3960_v17 = vpop.eup %3959 }
 0xcf8   :  { %v2284_v35 = vpop.xlane.xlu0 %2283  ;;  %v2392_v59 = vpop.xlane.xlu2 %2391  ;;  %v2483_v23 = vmul.f32 %v3960_v17, %v5228_v55 }
 0xcf9   :  { %v2328_v13 = vsub.f32 %v5234_v41, %v2284_v35  ;;  %3961 = vrcp.f32 %v2392_v59 }
 0xcfa   :  { %v2507_v12 = vpack.c.bf16 %v2483_v23, %v2483_v23 }
 0xcfb   :  { %v2365_v42 = vmul.f32 1.442695, %v2328_v13 }
 0xcfc   :  { %v2537_v56 = vunpack.c.l.b16 %v2507_v12 }
 0xcfd   :  { %3963 = vpow2.f32 %v2365_v42  ;;  %v2296_v42 = vpop.xlane.xlu1 %2295 }
 0xcfe   :  { %3965 = vpow2.f32 %v2367_v28 }
 0xcff   :  { %v3962_v3 = vpop.eup %3961 }
 0xd00   :  { %v2484_v51 = vmul.f32 %v3962_v3, %v5236_v38  ;;  %v2269_v33 = vpop.xlane.xlu0 %2268  ;;  %v2308_v16 = vpop.xlane.xlu2 %2307 }
 0xd01   :  { %v2323_v60 = vsub.f32 %v5244_v11, %v2269_v33  ;;  %v2336_v45 = vsub.f32 %v5247_v2, %v2308_v16  ;;  %v2335_v2 = vsub.f32 %v5177_v39, %v5280_v40 }
 0xd02   :  { %v2508_v15 = vpack.c.bf16 %v2484_v51, %v2484_v51  ;;  %v2319_v51 = vsub.f32 %v5168_v63, %v5257_v20 }
 0xd03   :  { %v5328_v52 = vpop.eup %3963  ;;  %v2355_v41 = vmul.f32 1.442695, %v2323_v60  ;;  %v2381_v38 = vmul.f32 1.442695, %v2336_v45  ;;  %v2379_v43 = vmul.f32 1.442695, %v2335_v2 }
 0xd04   :  { %v2538_v7 = vunpack.c.l.b16 %v2508_v15  ;;  %v2426_v55 = vsel %vm78_vm0, %v5328_v52, 0.0  ;;  %v5334_v61 = vpop.eup %3965  ;;  %v2332_v15 = vsub.f32 %v5222_v27, %v2296_v42 }
 0xd05   :  { %3967 = vpow2.f32 %v2355_v41  ;;  %2427 = vadd.xlane.f32.xlu0 %v2426_v55  ;;  %v2429_v18 = vsel %vm78_vm0, %v5334_v61, 0.0 }
 0xd06   :  { %v2543_v29 = vpack.c.b16 %v2538_v7, %v2537_v56  ;;  %3969 = vpow2.f32 %v2381_v38  ;;  %v2347_v56 = vmul.f32 1.442695, %v2319_v51  ;;  %v2373_v63 = vmul.f32 1.442695, %v2332_v15 }
 0xd07   :  { %v2337_v38 = vsub.f32 %v5217_v24, %v2311_v14 }
 0xd08   :  { %v2395_v50 = vpop.xlane.xlu0 %2394  ;;  %3658 = vmatmul.msk.bf16.vlgmr.msrb.gmra.mxu0 %vm78_vm0, %v2543_v29  ;;  %v2290_v11 = vpop.xlane.xlu2 %2289 }
 0xd09   :  { %v2330_v0 = vsub.f32 %v5255_v25, %v2290_v11  ;;  %3971 = vrcp.f32 %v2395_v50 }
 0xd0b   :  { %v5337_v34 = vpop.eup %3967  ;;  %v2369_v30 = vmul.f32 1.442695, %v2330_v0 }
 0xd0c   :  { %v2411_v47 = vsel %vm78_vm0, %v5337_v34, 0.0  ;;  %v5345_v53 = vpop.eup %3969 }
 0xd0d   :  { %3973 = vpow2.f32 %v2369_v30  ;;  %2412 = vadd.xlane.f32.xlu1 %v2411_v47  ;;  %2430 = vadd.xlane.f32.xlu0 %v2429_v18  ;;  %v2450_v17 = vsel %vm78_vm0, %v5345_v53, 0.0  ;;  %v2383_v30 = vmul.f32 1.442695, %v2337_v38 }
 0xd0f   :  { %v3972_v59 = vpop.eup %3971 }
 0xd10   :  { %v2293_v25 = vpop.xlane.xlu0 %2292  ;;  %v2485_v37 = vmul.f32 %v3972_v59, %v5259_v22  ;;  %v2410_v29 = vpop.xlane.xlu1 %2409 }
 0xd11   :  { %v2398_v35 = vpop.xlane.xlu2 %2397  ;;  %v2331_v40 = vsub.f32 %v5267_v26, %v2293_v25 }
 0xd12   :  { %3975 = vrcp.f32 %v2398_v35  ;;  %v2509_v26 = vpack.c.bf16 %v2485_v37, %v2485_v37 }
 0xd13   :  { %v5347_v39 = vpop.eup %3973  ;;  %3977 = vpow2.f32 %v2379_v43  ;;  %v2371_v23 = vmul.f32 1.442695, %v2331_v40 }
 0xd14   :  { %v2432_v13 = vsel %vm78_vm0, %v5347_v39, 0.0  ;;  %v2539_v7 = vunpack.c.l.b16 %v2509_v26 }
 0xd15   :  { %2451 = vadd.xlane.f32.xlu0 %v2450_v17  ;;  %2433 = vadd.xlane.f32.xlu2 %v2432_v13  ;;  %3979 = vpow2.f32 %v2371_v23 }
 0xd18   :  { %v3976_v3 = vpop.eup %3975  ;;  %v2278_v28 = vpop.xlane.xlu0 %2277 }
 0xd19   :  { %v5355_v12 = vpop.eup %3977  ;;  %v2486_v33 = vmul.f32 %v3976_v3, %v5271_v54  ;;  %v2326_v16 = vsub.f32 %v5285_v49, %v2278_v28  ;;  %v2275_v60 = vpop.xlane.xlu2 %2274 }
 0xd1a   :  { %v2447_v45 = vsel %vm78_vm0, %v5355_v12, 0.0  ;;  %v2325_v51 = vsub.f32 %v5288_v8, %v2275_v60 }
 0xd1b   :  { %v2510_v22 = vpack.c.bf16 %v2486_v33, %v2486_v33  ;;  %v2361_v41 = vmul.f32 1.442695, %v2326_v16  ;;  %v5366_v49 = vpop.eup %3979 }
 0xd1c   :  { %v2435_v2 = vsel %vm78_vm0, %v5366_v49, 0.0  ;;  %v2359_v26 = vmul.f32 1.442695, %v2325_v51 }
 0xd1d   :  { %v2540_v55 = vunpack.c.l.b16 %v2510_v22  ;;  %3981 = vpow2.f32 %v2361_v41  ;;  %2448 = vadd.xlane.f32.xlu2 %v2447_v45 }
 0xd1e   :  { %3983 = vpow2.f32 %v2347_v56 }
 0xd1f   :  { %v2544_v20 = vpack.c.b16 %v2540_v55, %v2539_v7  ;;  %3985 = vpow2.f32 %v2373_v63 }
 0xd20   :  { %v5364_v54 = vpop.xlane.xlu0 %2442  ;;  %3987 = vrcp.f32 %v2410_v29 }
 0xd21   :  { %3659 = vmatmul.msk.bf16.gmra.mxu0 %vm78_vm0, %v2544_v20  ;;  %v2314_v27 = vpop.xlane.xlu2 %2313 }
 0xd22   :  { %v2338_v11 = vsub.f32 %v5299_v44, %v2314_v27 }
 0xd23   :  { %v5370_v50 = vpop.eup %3981 }
 0xd24   :  { %v2420_v0 = vsel %vm78_vm0, %v5370_v50, 0.0  ;;  %v5379_v47 = vpop.eup %3983  ;;  %v2385_v24 = vmul.f32 1.442695, %v2338_v11 }
 0xd25   :  { %2421 = vadd.xlane.f32.xlu0 %v2420_v0  ;;  %2436 = vadd.xlane.f32.xlu2 %v2435_v2  ;;  %v5381_v18 = vpop.eup %3985  ;;  %v2399_v35 = vsel %vm78_vm0, %v5379_v47, 0.0 }
 0xd26   :  { %2717 = vrot.lane.b32.xlu1 %v5059_v5, %s4082_s14  ;;  %v3988_v43 = vpop.eup %3987  ;;  %v2438_v25 = vsel %vm78_vm0, %v5381_v18, 0.0 }
 0xd27   :  { %v2490_v44 = vmul.f32 %v3988_v43, %v5273_v4 }
 0xd28   :  { %v2407_v14 = vpop.xlane.xlu0 %2406 }
 0xd29   :  { %3989 = vrcp.f32 %v2407_v14  ;;  %v2514_v40 = vpack.c.bf16 %v2490_v44, %v2490_v44  ;;  %v2425_v8 = vpop.xlane.xlu2 %2424 }
 0xd2a   :  { %3991 = vpow2.f32 %v2383_v30 }
 0xd2b   :  { %3993 = vpow2.f32 %v2385_v24  ;;  %v2595_v42 = vunpack.c.l.b16 %v2514_v40 }
 0xd2c   :  { %3995 = vpow2.f32 %v2359_v26 }
 0xd2d   :  { %2439 = vadd.xlane.f32.xlu0 %v2438_v25  ;;  %2400 = vadd.xlane.f32.xlu2 %v2399_v35 }
 0xd2f   :  { %v3990_v5 = vpop.eup %3989 }
 0xd30   :  { %v5388_v59 = vpop.eup %3991  ;;  %v2489_v17 = vmul.f32 %v3990_v5, %v5306_v21  ;;  %v2320_v21 = vsub.f32 %v5185_v1, %v5269_v57 }
 0xd31   :  { %v5391_v13 = vpop.eup %3993  ;;  %v2453_v4 = vsel %vm78_vm0, %v5388_v59, 0.0  ;;  %v2446_v60 = vpop.xlane.xlu2 %2445 }
 0xd32   :  { %v2513_v37 = vpack.c.bf16 %v2489_v17, %v2489_v17  ;;  %v2456_v3 = vsel %vm78_vm0, %v5391_v13, 0.0  ;;  %v2349_v33 = vmul.f32 1.442695, %v2320_v21  ;;  %v5401_v16 = vpop.eup %3995 }
 0xd33   :  { %v2417_v15 = vsel %vm78_vm0, %v5401_v16, 0.0 }
 0xd34   :  { %v2594_v23 = vunpack.c.l.b16 %v2513_v37  ;;  %3997 = vpow2.f32 %v2349_v33 }
 0xd35   :  { %2454 = vadd.xlane.f32.xlu0 %v2453_v4  ;;  %2457 = vadd.xlane.f32.xlu2 %v2456_v3  ;;  %3999 = vrcp.f32 %v2425_v8 }
 0xd36   :  { %v2600_v28 = vpack.c.b16 %v2595_v42, %v2594_v23 }
 0xd38   :  { %3661 = vmatmul.msk.bf16.vlgmr.msrb.gmra.mxu2 %vm78_vm0, %v2600_v28 }
 0xd39   :  { %v2416_v45 = vpop.xlane.xlu2 %2415 }
 0xd3a   :  { %v5405_v22 = vpop.eup %3997 }
 0xd3b   :  { %v2402_v41 = vsel %vm78_vm0, %v5405_v22, 0.0  ;;  %v4000_v57 = vpop.eup %3999 }
 0xd3c   :  { %v2495_v56 = vmul.f32 %v4000_v57, %v5308_v9 }
 0xd3e   :  { %v2519_v55 = vpack.c.bf16 %v2495_v56, %v2495_v56 }
 0xd40   :  { %v2651_v11 = vunpack.c.l.b16 %v2519_v55 }
 0xd50   :  { %2418 = vadd.xlane.f32.xlu1 %v2417_v15 }
 0xd58   :  { %2403 = vadd.xlane.f32.xlu1 %v2402_v41 }
 0xd78   :  { %v2428_v1 = vpop.xlane.xlu0 %2427 }
 0xd79   :  { %4001 = vrcp.f32 %v2428_v1 }
 0xd7a   :  { %4003 = vrcp.f32 %v2416_v45 }
 0xd7f   :  { %v4002_v7 = vpop.eup %4001 }
 0xd80   :  { %v2496_v63 = vmul.f32 %v4002_v7, %v5328_v52  ;;  %v2413_v20 = vpop.xlane.xlu1 %2412  ;;  %v4004_v29 = vpop.eup %4003 }
 0xd81   :  { %4005 = vrcp.f32 %v2413_v20  ;;  %v2431_v27 = vpop.xlane.xlu0 %2430  ;;  %v2492_v0 = vmul.f32 %v4004_v29, %v5319_v62 }
 0xd82   :  { %v2520_v38 = vpack.c.bf16 %v2496_v63, %v2496_v63  ;;  %4007 = vrcp.f32 %v2431_v27 }
 0xd83   :  { %4009 = vrcp.f32 %v2446_v60  ;;  %v2516_v9 = vpack.c.bf16 %v2492_v0, %v2492_v0 }
 0xd84   :  { %v2652_v2 = vunpack.c.l.b16 %v2520_v38  ;;  %4011 = vrcp.f32 %v5364_v54 }
 0xd85   :  { %v2597_v35 = vunpack.c.l.b16 %v2516_v9 }
 0xd86   :  { %v2657_v30 = vpack.c.b16 %v2652_v2, %v2651_v11 }
 0xd87   :  { %v4006_v24 = vpop.eup %4005 }
 0xd88   :  { %v2491_v14 = vmul.f32 %v4006_v24, %v5337_v34  ;;  %3664 = vmatmul.msk.bf16.vlgmr.msrb.gmra.mxu3 %vm78_vm0, %v2657_v30  ;;  %v2434_v52 = vpop.xlane.xlu2 %2433  ;;  %v4008_v43 = vpop.eup %4007 }
 0xd89   :  { %4013 = vrcp.f32 %v2434_v52  ;;  %v4010_v25 = vpop.eup %4009  ;;  %v2497_v40 = vmul.f32 %v4008_v43, %v5334_v61  ;;  %v2452_v23 = vpop.xlane.xlu0 %2451 }
 0xd8a   :  { %v2515_v44 = vpack.c.bf16 %v2491_v14, %v2491_v14  ;;  %v4012_v62 = vpop.eup %4011  ;;  %v2502_v17 = vmul.f32 %v4010_v25, %v5315_v31 }
 0xd8b   :  { %v2501_v54 = vmul.f32 %v4012_v62, %v5296_v58  ;;  %v2521_v4 = vpack.c.bf16 %v2497_v40, %v2497_v40 }
 0xd8c   :  { %v2596_v5 = vunpack.c.l.b16 %v2515_v44  ;;  %v2526_v28 = vpack.c.bf16 %v2502_v17, %v2502_v17  ;;  %v2807_v17 = vld [vmem:[%s5725_s4 + $0x6c] sm:$0xf] }
 0xd8d   :  { %v2525_v26 = vpack.c.bf16 %v2501_v54, %v2501_v54  ;;  %v2653_v21 = vunpack.c.l.b16 %v2521_v4 }
 0xd8e   :  { %v2601_v37 = vpack.c.b16 %v2597_v35, %v2596_v5  ;;  %v2709_v61 = vunpack.c.l.b16 %v2526_v28 }
 0xd8f   :  { %v4014_v42 = vpop.eup %4013  ;;  %v2708_v15 = vunpack.c.l.b16 %v2525_v26 }
 0xd90   :  { %3662 = vmatmul.msk.bf16.gmra.mxu2 %vm78_vm0, %v2601_v37  ;;  %v2449_v34 = vpop.xlane.xlu2 %2448  ;;  %v2498_v3 = vmul.f32 %v4014_v42, %v5347_v39  ;;  %v2821_v37 = vsel %vm1183_vm8, %v2807_v17, 0 }
 0xd91   :  { %4015 = vrcp.f32 %v2449_v34  ;;  %v2714_v60 = vpack.c.b16 %v2709_v61, %v2708_v15  ;;  %2830 = vmatpush.bf16.msra.mxu2 %v2821_v37 }
 0xd92   :  { %v2522_v51 = vpack.c.bf16 %v2498_v3, %v2498_v3  ;;  %4017 = vrcp.f32 %v2452_v23 }
 0xd94   :  { %v2654_v33 = vunpack.c.l.b16 %v2522_v51 }
 0xd96   :  { %v2658_v31 = vpack.c.b16 %v2654_v33, %v2653_v21 }
 0xd97   :  { %v4016_v45 = vpop.eup %4015 }
 0xd98   :  { %v2718_v41 = vpop.permute.xlu1 %2717  ;;  %v2422_v8 = vpop.xlane.xlu0 %2421  ;;  %3665 = vmatmul.msk.bf16.gmra.mxu3 %vm78_vm0, %v2658_v31  ;;  %v2503_v1 = vmul.f32 %v4016_v45, %v5355_v12 }
 0xd99   :  { %v2437_v58 = vpop.xlane.xlu2 %2436  ;;  %2742 = vmatpush.bf16.msra.mxu1 %v2718_v41  ;;  %v4018_v39 = vpop.eup %4017 }
 0xd9a   :  { %4019 = vrcp.f32 %v2437_v58  ;;  %v2504_v57 = vmul.f32 %v4018_v39, %v5345_v53  ;;  %v2527_v63 = vpack.c.bf16 %v2503_v1, %v2503_v1  ;;  %v2573_v39 = vpop.f32.mrf.mxu0 }
 0xd9c   :  { %3667 = vmatmul.msk.bf16.vlgmr.msra.gmra.mxu1 %vm78_vm0, %v2714_v60  ;;  %v2528_v20 = vpack.c.bf16 %v2504_v57, %v2504_v57  ;;  %v2710_v27 = vunpack.c.l.b16 %v2527_v63 }
 0xd9e   :  { %v2711_v11 = vunpack.c.l.b16 %v2528_v20 }
 0xda0   :  { %v2440_v56 = vpop.xlane.xlu0 %2439  ;;  %v4020_v7 = vpop.eup %4019  ;;  %v2715_v53 = vpack.c.b16 %v2711_v11, %v2710_v27 }
 0xda1   :  { %4021 = vrcp.f32 %v2440_v56  ;;  %v2401_v55 = vpop.xlane.xlu2 %2400  ;;  %v2499_v29 = vmul.f32 %v4020_v7, %v5366_v49 }
 0xda3   :  { %v2523_v0 = vpack.c.bf16 %v2499_v29, %v2499_v29  ;;  %v2899_v29 = vld [vmem:[%s5725_s4 + $0x74] sm:$0xf] }
 0xda4   :  { %v2913_v27 = vsel %vm1183_vm8, %v2899_v29, 0 }
 0xda5   :  { %v2655_v9 = vunpack.c.l.b16 %v2523_v0  ;;  %2922 = vmatpush.bf16.msrb.mxu1 %v2913_v27 }
 0xda7   :  { %v4022_v38 = vpop.eup %4021 }
 0xda8   :  { %v2500_v2 = vmul.f32 %v4022_v38, %v5381_v18  ;;  %v2455_v30 = vpop.xlane.xlu0 %2454 }
 0xda9   :  { %4023 = vrcp.f32 %v2455_v30  ;;  %v2458_v24 = vpop.xlane.xlu2 %2457 }
 0xdaa   :  { %v2524_v12 = vpack.c.bf16 %v2500_v2, %v2500_v2  ;;  %4025 = vrcp.f32 %v2458_v24 }
 0xdab   :  { %4027 = vrcp.f32 %v2422_v8 }
 0xdac   :  { %v2656_v14 = vunpack.c.l.b16 %v2524_v12  ;;  %3668 = vmatmul.msk.bf16.gmra.mxu1 %vm78_vm0, %v2715_v53 }
 0xdae   :  { %v2659_v52 = vpack.c.b16 %v2656_v14, %v2655_v9 }
 0xdaf   :  { %v4024_v43 = vpop.eup %4023 }
 0xdb0   :  { %v4026_v44 = vpop.eup %4025  ;;  %v2505_v49 = vmul.f32 %v4024_v43, %v5388_v59  ;;  %3666 = vmatmul.msk.bf16.gmra.mxu3 %vm78_vm0, %v2659_v52 }
 0xdb1   :  { %v2506_v25 = vmul.f32 %v4026_v44, %v5391_v13  ;;  %v2760_v13 = vld [vmem:[%s5725_s4 + $0x68] sm:$0xf]  ;;  %v4028_v42 = vpop.eup %4027 }
 0xdb2   :  { %v2529_v18 = vpack.c.bf16 %v2505_v49, %v2505_v49  ;;  %v2774_v54 = vsel %vm1183_vm8, %v2760_v13, 0  ;;  %v2494_v23 = vmul.f32 %v4028_v42, %v5370_v50 }
 0xdb3   :  { %v2530_v35 = vpack.c.bf16 %v2506_v25, %v2506_v25  ;;  %2783 = vmatpush.bf16.msra.mxu0 %v2774_v54 }
 0xdb4   :  { %v2712_v5 = vunpack.c.l.b16 %v2529_v18  ;;  %v2518_v4 = vpack.c.bf16 %v2494_v23, %v2494_v23 }
 0xdb5   :  { %v2713_v62 = vunpack.c.l.b16 %v2530_v35 }
 0xdb6   :  { %v2599_v21 = vunpack.c.l.b16 %v2518_v4 }
 0xdb7   :  { %v2716_v40 = vpack.c.b16 %v2713_v62, %v2712_v5 }
 0xdbb   :  { %v2630_v50 = vpop.f32.mrf.mxu2 }
 0xdbc   :  { %3669 = vmatmul.msk.bf16.gmra.mxu1 %vm78_vm0, %v2716_v40 }
 0xdc3   :  { %v2419_v59 = vpop.xlane.xlu1 %2418  ;;  %v2632_v1 = vpop.f32.mrf.mxu2 }
 0xdc4   :  { %4029 = vrcp.f32 %v2419_v59  ;;  %v2808_v57 = vpack.c.bf16 %v2632_v1, %v2630_v50 }
 0xdc5   :  { %4031 = vrcp.f32 %v2401_v55 }
 0xdca   :  { %v4030_v34 = vpop.eup %4029 }
 0xdcb   :  { %v2493_v3 = vmul.f32 %v4030_v34, %v5401_v16  ;;  %v2404_v28 = vpop.xlane.xlu1 %2403  ;;  %v4032_v51 = vpop.eup %4031 }
 0xdcc   :  { %4033 = vrcp.f32 %v2404_v28  ;;  %v2487_v33 = vmul.f32 %v4032_v51, %v5379_v47  ;;  %v2575_v47 = vpop.f32.mrf.mxu0 }
 0xdcd   :  { %v2517_v26 = vpack.c.bf16 %v2493_v3, %v2493_v3  ;;  %v2761_v56 = vpack.c.bf16 %v2575_v47, %v2573_v39  ;;  %v3785_v3 = vld [vmem:[%s5728_s6 + $0xe] ss:$0 sm:$0xff] }
 0xdce   :  { %v2511_v41 = vpack.c.bf16 %v2487_v33, %v2487_v33 }
 0xdcf   :  { %v2598_v61 = vunpack.c.l.b16 %v2517_v26 }
 0xdd0   :  { %v2541_v60 = vunpack.c.l.b16 %v2511_v41 }
 0xdd1   :  { %v2602_v31 = vpack.c.b16 %v2599_v21, %v2598_v61 }
 0xdd2   :  { %v4034_v15 = vpop.eup %4033 }
 0xdd3   :  { %v2488_v8 = vmul.f32 %v4034_v15, %v5405_v22  ;;  %3663 = vmatmul.msk.bf16.gmra.mxu2 %vm78_vm0, %v2602_v31  ;;  %v2853_v22 = vld [vmem:[%s5725_s4 + $0x70] sm:$0xf] }
 0xdd4   :  { %v2578_v7 = vpop.f32.mrf.mxu0  ;;  %v2867_v55 = vsel %vm1183_vm8, %v2853_v22, 0 }
 0xdd5   :  { %v2512_v58 = vpack.c.bf16 %v2488_v8, %v2488_v8  ;;  %2876 = vmatpush.bf16.msra.mxu3 %v2867_v55 }
 0xdd7   :  { %v2542_v45 = vunpack.c.l.b16 %v2512_v58 }
 0xdd9   :  { %v2545_v16 = vpack.c.b16 %v2542_v45, %v2541_v60 }
 0xddb   :  { %3660 = vmatmul.msk.bf16.gmra.mxu0 %vm78_vm0, %v2545_v16 }
 0xddc   :  { %v2580_v63 = vpop.f32.mrf.mxu0 }
 0xddd   :  { %v2762_v20 = vpack.c.bf16 %v2580_v63, %v2578_v7 }
 0xde3   :  { %3673 = vmatmul.msk.bf16.vlgmr.msra.gmra.mxu2 %vm391_vm7, %v2808_v57 }
 0xdeb   :  { %3670 = vmatmul.msk.bf16.vlgmr.msra.gmra.mxu0 %vm391_vm7, %v2761_v56 }
 0xdfb   :  { %3671 = vmatmul.msk.bf16.gmra.mxu0 %vm391_vm7, %v2762_v20 }
 0xe0b   :  { %v2687_v38 = vpop.f32.mrf.mxu3 }
 0xe13   :  { %v2635_v11 = vpop.f32.mrf.mxu2  ;;  %v2689_v0 = vpop.f32.mrf.mxu3 }
 0xe14   :  { %v2854_v2 = vpack.c.bf16 %v2689_v0, %v2687_v38 }
 0xe16   :  { %3676 = vmatmul.msk.bf16.vlgmr.msra.gmra.mxu3 %vm391_vm7, %v2854_v2 }
 0xe19   :  { %v2744_v30 = vpop.f32.mrf.mxu1 }
 0xe1b   :  { %v2637_v24 = vpop.f32.mrf.mxu2  ;;  %v2692_v53 = vpop.f32.mrf.mxu3 }
 0xe1c   :  { %v2809_v12 = vpack.c.bf16 %v2637_v24, %v2635_v11 }
 0xe1e   :  { %3674 = vmatmul.msk.bf16.gmra.mxu2 %vm391_vm7, %v2809_v12 }
 0xe21   :  { %v2746_v9 = vpop.f32.mrf.mxu1 }
 0xe22   :  { %v2900_v14 = vpack.c.bf16 %v2746_v9, %v2744_v30 }
 0xe23   :  { %v2694_v52 = vpop.f32.mrf.mxu3 }
 0xe24   :  { %3679 = vmatmul.msk.bf16.vlgmr.msrb.gmra.mxu1 %vm391_vm7, %v2900_v14  ;;  %v2855_v43 = vpack.c.bf16 %v2694_v52, %v2692_v53 }
 0xe26   :  { %3677 = vmatmul.msk.bf16.gmra.mxu3 %vm391_vm7, %v2855_v43 }
 0xe29   :  { %v2749_v44 = vpop.f32.mrf.mxu1 }
 0xe31   :  { %v2751_v49 = vpop.f32.mrf.mxu1 }
 0xe32   :  { %v2901_v25 = vpack.c.bf16 %v2751_v49, %v2749_v44 }
 0xe33   :  { %v2697_v18 = vpop.f32.mrf.mxu3 }
 0xe34   :  { %3680 = vmatmul.msk.bf16.gmra.mxu1 %vm391_vm7, %v2901_v25 }
 0xe39   :  { %v2754_v35 = vpop.f32.mrf.mxu1 }
 0xe3b   :  { %v2699_v5 = vpop.f32.mrf.mxu3 }
 0xe3c   :  { %v2856_v62 = vpack.c.bf16 %v2699_v5, %v2697_v18 }
 0xe3e   :  { %3678 = vmatmul.msk.bf16.gmra.mxu3 %vm391_vm7, %v2856_v62 }
 0xe41   :  { %v2756_v40 = vpop.f32.mrf.mxu1 }
 0xe42   :  { %v2902_v17 = vpack.c.bf16 %v2756_v40, %v2754_v35 }
 0xe44   :  { %3681 = vmatmul.msk.bf16.gmra.mxu1 %vm391_vm7, %v2902_v17 }
 0xe56   :  { %v2640_v37 = vpop.f32.mrf.mxu2 }
 0xe58   :  { %v2583_v59 = vpop.f32.mrf.mxu0 }
 0xe5e   :  { %v2642_v13 = vpop.f32.mrf.mxu2 }
 0xe5f   :  { %v2810_v42 = vpack.c.bf16 %v2642_v13, %v2640_v37 }
 0xe60   :  { %v2585_v54 = vpop.f32.mrf.mxu0 }
 0xe61   :  { %v2763_v23 = vpack.c.bf16 %v2585_v54, %v2583_v59  ;;  %3675 = vmatmul.msk.bf16.gmra.mxu2 %vm391_vm7, %v2810_v42 }
 0xe63   :  { %3672 = vmatmul.msk.bf16.gmra.mxu0 %vm391_vm7, %v2763_v23 }
 0xe66   :  { %v2832_v4 = vpop.f32.mrf.mxu2 }
 0xe68   :  { %v2785_v34 = vpop.f32.mrf.mxu0 }
 0xe69   :  { %v2801_v51 = vadd.f32 %v3785_v3, %v2785_v34 }
 0xe6b   :  { %v2847_v21 = vadd.f32 %v2832_v4, %v2801_v51 }
 0xe6e   :  { %v2834_v33 = vpop.f32.mrf.mxu2 }
 0xe70   :  { %v2787_v26 = vpop.f32.mrf.mxu0 }
 0xe71   :  { %v2802_v41 = vadd.f32 %v3785_v3, %v2787_v26 }
 0xe73   :  { %v2848_v58 = vadd.f32 %v2834_v33, %v2802_v41 }
 0xe78   :  { %v2790_v45 = vpop.f32.mrf.mxu0 }
 0xe79   :  { %v2803_v56 = vadd.f32 %v3785_v3, %v2790_v45 }
 0xe80   :  { %v2792_v63 = vpop.f32.mrf.mxu0 }
 0xe81   :  { %v2804_v38 = vadd.f32 %v3785_v3, %v2792_v63 }
 0xe99   :  { %v2878_v28 = vpop.f32.mrf.mxu3 }
 0xe9a   :  { %v2893_v61 = vadd.f32 %v2878_v28, %v2847_v21 }
 0xea1   :  { %v2880_v31 = vpop.f32.mrf.mxu3  ;;  %v2924_v15 = vpop.f32.mrf.mxu1 }
 0xea2   :  { %v2939_v8 = vadd.f32 %v2924_v15, %v2893_v61  ;;  %v2894_v16 = vadd.f32 %v2880_v31, %v2848_v58  ;;  %v2837_v39 = vpop.f32.mrf.mxu2 }
 0xea3   :  { %v2849_v22 = vadd.f32 %v2837_v39, %v2803_v56 }
 0xea4   :  { %v5469_v50 = vadd.f32 %v2939_v8, %v4877_v46 }
 0xea6   :  { %v2953_v60 = vsel %vm120_vm1, %v5469_v50, 0.0 }
 0xea7   :  { %2954 = vadd.xlane.f32.xlu1 %v2953_v60 }
 0xea9   :  { %v2926_v1 = vpop.f32.mrf.mxu1  ;;  %v2883_v47 = vpop.f32.mrf.mxu3 }
 0xeaa   :  { %v2940_v57 = vadd.f32 %v2926_v1, %v2894_v16  ;;  %v2895_v55 = vadd.f32 %v2883_v47, %v2849_v22  ;;  %v2839_v27 = vpop.f32.mrf.mxu2 }
 0xeab   :  { %v2850_v2 = vadd.f32 %v2839_v27, %v2804_v38  ;;  %v3757_v27 = vld [vmem:[%s5731_s5 + $0x18] sm:$0xff] }
 0xeac   :  { %v5474_v7 = vadd.f32 %v2940_v57, %v4882_v48  ;;  %3135 = vmatpush.bf16.msrb.mxu0 %v3757_v27 }
 0xeae   :  { %v2956_v46 = vsel %vm120_vm1, %v5474_v7, 0.0 }
 0xeaf   :  { %2957 = vadd.xlane.f32.xlu0 %v2956_v46 }
 0xeb1   :  { %v2929_v20 = vpop.f32.mrf.mxu1  ;;  %v2885_v0 = vpop.f32.mrf.mxu3 }
 0xeb2   :  { %v2941_v29 = vadd.f32 %v2929_v20, %v2895_v55  ;;  %v2896_v30 = vadd.f32 %v2885_v0, %v2850_v2 }
 0xeb4   :  { %v5479_v11 = vadd.f32 %v2941_v29, %v4887_v6 }
 0xeb6   :  { %v2959_v48 = vsel %vm120_vm1, %v5479_v11, 0.0 }
 0xeb7   :  { %2960 = vadd.xlane.f32.xlu2 %v2959_v48  ;;  %v3756_v48 = vld [vmem:[%s5731_s5 + $0x10] sm:$0xff] }
 0xeb8   :  { %3136 = vmatpush.bf16.msrb.mxu0 %v3756_v48 }
 0xeb9   :  { %v2931_v24 = vpop.f32.mrf.mxu1 }
 0xeba   :  { %v2942_v12 = vadd.f32 %v2931_v24, %v2896_v30 }
 0xebc   :  { %v5484_v53 = vadd.f32 %v2942_v12, %v4892_v32 }
 0xebe   :  { %v2962_v9 = vsel %vm120_vm1, %v5484_v53, 0.0 }
 0xebf   :  { %2963 = vadd.xlane.f32.xlu1 %v2962_v9 }
 0xec1   :  { %v2888_v6 = vpop.f32.mrf.mxu3  ;;  %v2934_v49 = vpop.f32.mrf.mxu1 }
 0xec9   :  { %v2890_v37 = vpop.f32.mrf.mxu3  ;;  %v2936_v13 = vpop.f32.mrf.mxu1 }
 0xee0   :  { %v2795_v14 = vpop.f32.mrf.mxu0 }
 0xee1   :  { %v2805_v52 = vadd.f32 %v3785_v3, %v2795_v14 }
 0xee4   :  { %v2842_v43 = vpop.f32.mrf.mxu2 }
 0xee5   :  { %v2851_v44 = vadd.f32 %v2842_v43, %v2805_v52 }
 0xee7   :  { %v2897_v25 = vadd.f32 %v2888_v6, %v2851_v44 }
 0xee8   :  { %v2797_v18 = vpop.f32.mrf.mxu0 }
 0xee9   :  { %v2943_v35 = vadd.f32 %v2934_v49, %v2897_v25  ;;  %v2806_v5 = vadd.f32 %v3785_v3, %v2797_v18 }
 0xeeb   :  { %v5489_v62 = vadd.f32 %v2943_v35, %v4897_v19 }
 0xeec   :  { %v2844_v40 = vpop.f32.mrf.mxu2 }
 0xeed   :  { %v2852_v32 = vadd.f32 %v2844_v40, %v2806_v5  ;;  %v2965_v17 = vsel %vm120_vm1, %v5489_v62, 0.0 }
 0xeee   :  { %2966 = vadd.xlane.f32.xlu0 %v2965_v17 }
 0xeef   :  { %v2898_v59 = vadd.f32 %v2890_v37, %v2852_v32 }
 0xef1   :  { %v2944_v42 = vadd.f32 %v2936_v13, %v2898_v59 }
 0xef3   :  { %v5494_v54 = vadd.f32 %v2944_v42, %v4902_v10 }
 0xef5   :  { %v2968_v23 = vsel %vm120_vm1, %v5494_v54, 0.0 }
 0xef6   :  { %2969 = vadd.xlane.f32.xlu2 %v2968_v23  ;;  %v5553_v23 = vld [vmem:[%s5728_s6 + $0xf] ss:$0 sm:$0xff] }
 0xf1a   :  { %v2955_v34 = vpop.xlane.xlu1 %2954 }
 0xf1b   :  { %v2971_v19 = vmul.f32 %v2955_v34, %v4186_v36 }
 0xf1d   :  { %v5500_v4 = vsub.f32 %v5469_v50, %v2971_v19 }
 0xf1f   :  { %v2983_v3 = vmul.f32 %v5500_v4, %v5500_v4 }
 0xf21   :  { %v2989_v28 = vsel %vm120_vm1, %v2983_v3, 0.0 }
 0xf22   :  { %v2958_v51 = vpop.xlane.xlu0 %2957  ;;  %2990 = vadd.xlane.f32.xlu1 %v2989_v28 }
 0xf23   :  { %v2972_v10 = vmul.f32 %v2958_v51, %v4186_v36 }
 0xf25   :  { %v5507_v26 = vsub.f32 %v5474_v7, %v2972_v10 }
 0xf27   :  { %v2984_v21 = vmul.f32 %v5507_v26, %v5507_v26 }
 0xf29   :  { %v2992_v33 = vsel %vm120_vm1, %v2984_v21, 0.0  ;;  %v5559_v21 = vld [vmem:[%s5728_s6 + $0x10] ss:$0 sm:$0xff] }
 0xf2a   :  { %v2961_v61 = vpop.xlane.xlu2 %2960  ;;  %2993 = vadd.xlane.f32.xlu0 %v2992_v33 }
 0xf2b   :  { %v2973_v31 = vmul.f32 %v2961_v61, %v4186_v36 }
 0xf2d   :  { %v5514_v15 = vsub.f32 %v5479_v11, %v2973_v31 }
 0xf2f   :  { %v2985_v41 = vmul.f32 %v5514_v15, %v5514_v15 }
 0xf31   :  { %v2995_v8 = vsel %vm120_vm1, %v2985_v41, 0.0 }
 0xf32   :  { %v2964_v58 = vpop.xlane.xlu1 %2963  ;;  %2996 = vadd.xlane.f32.xlu2 %v2995_v8 }
 0xf33   :  { %v2974_v60 = vmul.f32 %v2964_v58, %v4186_v36 }
 0xf35   :  { %v5521_v45 = vsub.f32 %v5484_v53, %v2974_v60 }
 0xf37   :  { %v2986_v16 = vmul.f32 %v5521_v45, %v5521_v45 }
 0xf39   :  { %v2998_v39 = vsel %vm120_vm1, %v2986_v16, 0.0 }
 0xf3a   :  { %2999 = vadd.xlane.f32.xlu1 %v2998_v39 }
 0xf61   :  { %v2967_v1 = vpop.xlane.xlu0 %2966 }
 0xf62   :  { %v2975_v57 = vmul.f32 %v2967_v1, %v4186_v36 }
 0xf64   :  { %v5528_v47 = vsub.f32 %v5489_v62, %v2975_v57 }
 0xf66   :  { %v2987_v56 = vmul.f32 %v5528_v47, %v5528_v47 }
 0xf68   :  { %v3001_v22 = vsel %vm120_vm1, %v2987_v56, 0.0 }
 0xf69   :  { %3002 = vadd.xlane.f32.xlu0 %v3001_v22  ;;  %v2970_v46 = vpop.xlane.xlu2 %2969 }
 0xf6a   :  { %v2976_v55 = vmul.f32 %v2970_v46, %v4186_v36 }
 0xf6c   :  { %v5535_v63 = vsub.f32 %v5494_v54, %v2976_v55 }
 0xf6e   :  { %v2988_v20 = vmul.f32 %v5535_v63, %v5535_v63 }
 0xf70   :  { %v3004_v29 = vsel %vm120_vm1, %v2988_v20, 0.0 }
 0xf71   :  { %3005 = vadd.xlane.f32.xlu2 %v3004_v29 }
 0xf95   :  { %v2991_v38 = vpop.xlane.xlu1 %2990 }
 0xf96   :  { %v3007_v0 = vmul.f32 %v2991_v38, %v4186_v36 }
 0xf98   :  { %v3013_v2 = vadd.f32 1e-06, %v3007_v0 }
 0xf9a   :  { %4035 = vrsqrt.f32 %v3013_v2  ;;  %vm3025_vm7 = vweird.f32 %v3013_v2 }
 0xf9d   :  { %v2994_v30 = vpop.xlane.xlu0 %2993 }
 0xf9e   :  { %v3008_v24 = vmul.f32 %v2994_v30, %v4186_v36 }
 0xfa0   :  { %v4036_v12 = vpop.eup %4035  ;;  %v3014_v9 = vadd.f32 1e-06, %v3008_v24 }
 0xfa1   :  { %v3020_v14 = vmul.f32 %v4036_v12, %v3013_v2  ;;  %vm3026_vm0 = vweird.f32 %v4036_v12 }
 0xfa2   :  { %4037 = vrsqrt.f32 %v3014_v9  ;;  %vm3027_vm8 = vmor %vm3025_vm7, %vm3026_vm0  ;;  %vm3035_vm10 = vweird.f32 %v3014_v9 }
 0xfa3   :  { %v3021_v52 = vmul.f32 %v4036_v12, %v3020_v14 }
 0xfa5   :  { %v3022_v6 = vmul.f32 0.5, %v3021_v52  ;;  %v2997_v43 = vpop.xlane.xlu2 %2996 }
 0xfa6   :  { %v3009_v44 = vmul.f32 %v2997_v43, %v4186_v36 }
 0xfa7   :  { %v3023_v49 = vsub.f32 1.5, %v3022_v6 }
 0xfa8   :  { %v4038_v25 = vpop.eup %4037  ;;  %v3015_v18 = vadd.f32 1e-06, %v3009_v44 }
 0xfa9   :  { %v3024_v35 = vmul.f32 %v4036_v12, %v3023_v49  ;;  %v3030_v5 = vmul.f32 %v4038_v25, %v3014_v9  ;;  %vm3036_vm9 = vweird.f32 %v4038_v25 }
 0xfaa   :  { %4039 = vrsqrt.f32 %v3015_v18  ;;  %vm3037_vm11 = vmor %vm3035_vm10, %vm3036_vm9  ;;  %vm3045_vm13 = vweird.f32 %v3015_v18 }
 0xfab   :  { %v3031_v40 = vmul.f32 %v4038_v25, %v3030_v5  ;;  %v3028_v32 = vsel %vm3027_vm8, %v4036_v12, %v3024_v35 }
 0xfac   :  { %v3079_v34 = vmul.f32 %v3028_v32, %v5500_v4 }
 0xfad   :  { %v3032_v17 = vmul.f32 0.5, %v3031_v40  ;;  %v3000_v37 = vpop.xlane.xlu1 %2999 }
 0xfae   :  { %v3010_v59 = vmul.f32 %v3000_v37, %v4186_v36  ;;  %v3086_v33 = vmul.f32 %v5553_v23, %v3079_v34 }
 0xfaf   :  { %v3033_v13 = vsub.f32 1.5, %v3032_v17 }
 0xfb0   :  { %v4040_v42 = vpop.eup %4039  ;;  %v3016_v19 = vadd.f32 1e-06, %v3010_v59  ;;  %v3093_v58 = vadd.f32 %v5559_v21, %v3086_v33  ;;  %v3759_v33 = vld [vmem:[%s5725_s4 + $0x80] sm:$0xff] }
 0xfb1   :  { %v3034_v3 = vmul.f32 %v4038_v25, %v3033_v13  ;;  %v3040_v28 = vmul.f32 %v4040_v42, %v3015_v18  ;;  %vm3046_vm12 = vweird.f32 %v4040_v42 }
 0xfb2   :  { %4041 = vrsqrt.f32 %v3016_v19  ;;  %vm3047_vm14 = vmor %vm3045_vm13, %vm3046_vm12  ;;  %vm3055_vm2 = vweird.f32 %v3016_v19 }
 0xfb3   :  { %v3038_v51 = vsel %vm3037_vm11, %v4038_v25, %v3034_v3  ;;  %v3041_v10 = vmul.f32 %v4040_v42, %v3040_v28 }
 0xfb4   :  { %v3080_v61 = vmul.f32 %v3038_v51, %v5507_v26  ;;  %v3762_v51 = vld [vmem:[%s5725_s4 + $0x98] sm:$0xff] }
 0xfb5   :  { %v3042_v31 = vmul.f32 0.5, %v3041_v10  ;;  %v3761_v10 = vld [vmem:[%s5725_s4 + $0x90] sm:$0xff] }
 0xfb6   :  { %v3087_v4 = vmul.f32 %v5553_v23, %v3080_v61  ;;  %v3788_v61 = vld [vmem:[%s5728_s6 + $0x11] ss:$0 sm:$0xff] }
 0xfb7   :  { %v3043_v41 = vsub.f32 1.5, %v3042_v31  ;;  %v3758_v31 = vld [vmem:[%s5725_s4 + $0x78] sm:$0xff] }
 0xfb8   :  { %v4042_v8 = vpop.eup %4041  ;;  %v3094_v60 = vadd.f32 %v5559_v21, %v3087_v4 }
 0xfb9   :  { %v3044_v16 = vmul.f32 %v4040_v42, %v3043_v41  ;;  %v3050_v39 = vmul.f32 %v4042_v8, %v3016_v19  ;;  %vm3056_vm15 = vweird.f32 %v4042_v8 }
 0xfba   :  { %v3099_v1 = vpack.c.bf16 %v3094_v60, %v3093_v58  ;;  %vm3057_vm3 = vmor %vm3055_vm2, %vm3056_vm15 }
 0xfbb   :  { %v3051_v57 = vmul.f32 %v4042_v8, %v3050_v39  ;;  %v3048_v56 = vsel %vm3047_vm14, %v4040_v42, %v3044_v16 }
 0xfbc   :  { %3690 = vmatmul.msk.bf16.vlgmr.msrb.gmra.mxu0 %vm120_vm1, %v3099_v1  ;;  %v3081_v46 = vmul.f32 %v3048_v56, %v5514_v15 }
 0xfbd   :  { %v3052_v26 = vmul.f32 0.5, %v3051_v57 }
 0xfbe   :  { %v3088_v27 = vmul.f32 %v5553_v23, %v3081_v46 }
 0xfbf   :  { %v3053_v22 = vsub.f32 1.5, %v3052_v26 }
 0xfc0   :  { %v3095_v0 = vadd.f32 %v5559_v21, %v3088_v27 }
 0xfc1   :  { %v3054_v55 = vmul.f32 %v4042_v8, %v3053_v22 }
 0xfc3   :  { %v3058_v20 = vsel %vm3057_vm3, %v4042_v8, %v3054_v55 }
 0xfc4   :  { %v3082_v29 = vmul.f32 %v3058_v20, %v5521_v45 }
 0xfc6   :  { %v3089_v38 = vmul.f32 %v5553_v23, %v3082_v29 }
 0xfc8   :  { %v3096_v2 = vadd.f32 %v5559_v21, %v3089_v38 }
 0xfca   :  { %v3100_v48 = vpack.c.bf16 %v3096_v2, %v3095_v0 }
 0xfcc   :  { %3691 = vmatmul.msk.bf16.gmra.mxu0 %vm120_vm1, %v3100_v48 }
 0xfdc   :  { %v3003_v30 = vpop.xlane.xlu0 %3002 }
 0xfdd   :  { %v3011_v15 = vmul.f32 %v3003_v30, %v4186_v36 }
 0xfdf   :  { %v3017_v24 = vadd.f32 1e-06, %v3011_v15 }
 0xfe1   :  { %4043 = vrsqrt.f32 %v3017_v24  ;;  %vm3065_vm5 = vweird.f32 %v3017_v24 }
 0xfe4   :  { %v3006_v12 = vpop.xlane.xlu2 %3005 }
 0xfe5   :  { %v3012_v9 = vmul.f32 %v3006_v12, %v4186_v36 }
 0xfe7   :  { %v4044_v45 = vpop.eup %4043  ;;  %v3018_v14 = vadd.f32 1e-06, %v3012_v9 }
 0xfe8   :  { %v3060_v52 = vmul.f32 %v4044_v45, %v3017_v24  ;;  %vm3066_vm4 = vweird.f32 %v4044_v45 }
 0xfe9   :  { %4045 = vrsqrt.f32 %v3018_v14  ;;  %vm3067_vm6 = vmor %vm3065_vm5, %vm3066_vm4  ;;  %vm3075_vm7 = vweird.f32 %v3018_v14 }
 0xfea   :  { %v3061_v6 = vmul.f32 %v4044_v45, %v3060_v52 }
 0xfec   :  { %v3062_v43 = vmul.f32 0.5, %v3061_v6 }
 0xfee   :  { %v3063_v44 = vsub.f32 1.5, %v3062_v43 }
 0xfef   :  { %v4046_v49 = vpop.eup %4045 }
 0xff0   :  { %v3064_v25 = vmul.f32 %v4044_v45, %v3063_v44  ;;  %v3070_v18 = vmul.f32 %v4046_v49, %v3018_v14  ;;  %vm3076_vm0 = vweird.f32 %v4046_v49 }
 0xff1   :  { %vm3077_vm8 = vmor %vm3075_vm7, %vm3076_vm0 }
 0xff2   :  { %v3071_v35 = vmul.f32 %v4046_v49, %v3070_v18  ;;  %v3068_v5 = vsel %vm3067_vm6, %v4044_v45, %v3064_v25 }
 0xff3   :  { %v3083_v17 = vmul.f32 %v3068_v5, %v5528_v47  ;;  %v3765_v47 = vld [vmem:[%s5725_s4 + $0xb0] sm:$0xff] }
 0xff4   :  { %v3072_v40 = vmul.f32 0.5, %v3071_v35  ;;  %3276 = vmatpush.bf16.msrb.mxu2 %v3765_v47 }
 0xff5   :  { %v3090_v42 = vmul.f32 %v5553_v23, %v3083_v17 }
 0xff6   :  { %v3073_v32 = vsub.f32 1.5, %v3072_v40 }
 0xff7   :  { %v3097_v19 = vadd.f32 %v5559_v21, %v3090_v42 }
 0xff8   :  { %v3074_v37 = vmul.f32 %v4046_v49, %v3073_v32 }
 0xffa   :  { %v3078_v59 = vsel %vm3077_vm8, %v4046_v49, %v3074_v37 }
 0xffb   :  { %v3084_v13 = vmul.f32 %v3078_v59, %v5535_v63  ;;  %v3764_v63 = vld [vmem:[%s5725_s4 + $0xa8] sm:$0xff] }
 0xffc   :  { %3277 = vmatpush.bf16.msrb.mxu2 %v3764_v63 }
 0xffd   :  { %v3091_v34 = vmul.f32 %v5553_v23, %v3084_v13  ;;  %v3763_v23 = vld [vmem:[%s5725_s4 + $0xa0] sm:$0xff] }
 0xfff   :  { %v3098_v3 = vadd.f32 %v5559_v21, %v3091_v34  ;;  %v3760_v21 = vld [vmem:[%s5725_s4 + $0x88] sm:$0xff] }
0x1000   :  { %3278 = vmatpush.bf16.msrb.mxu2 %v3763_v23 }
0x1001   :  { %v3101_v28 = vpack.c.bf16 %v3098_v3, %v3097_v19 }
0x1003   :  { %3692 = vmatmul.msk.bf16.gmra.mxu0 %vm120_vm1, %v3101_v28 }
0x1004   :  { %3279 = vmatpush.bf16.msrb.mxu2 %v3762_v51 }
0x1008   :  { %3280 = vmatpush.bf16.msrb.mxu2 %v3761_v10 }
0x100c   :  { %3281 = vmatpush.bf16.msrb.mxu2 %v3760_v21 }
0x1010   :  { %3282 = vmatpush.bf16.msrb.mxu2 %v3759_v33 }
0x1014   :  { %3283 = vmatpush.bf16.msrb.mxu2 %v3758_v31 }
0x1039   :  { %v3138_v4 = vpop.f32.mrf.mxu0 }
0x103a   :  { %v3139_v41 = vadd.f32 %v3788_v61, %v3138_v4 }
0x103c   :  { %v3159_v8 = vmul.f32 0.044715, %v3139_v41  ;;  %v3153_v45 = vmul.f32 0.5, %v3139_v41 }
0x103e   :  { %v3165_v58 = vmul.f32 %v3159_v8, %v3139_v41 }
0x1040   :  { %v3171_v60 = vmul.f32 %v3165_v58, %v3139_v41 }
0x1041   :  { %v3140_v16 = vpop.f32.mrf.mxu0 }
0x1042   :  { %v3177_v39 = vadd.f32 %v3171_v60, %v3139_v41  ;;  %v3141_v1 = vadd.f32 %v3788_v61, %v3140_v16 }
0x1044   :  { %v3160_v57 = vmul.f32 0.044715, %v3141_v1  ;;  %v3183_v56 = vmul.f32 0.7978846, %v3177_v39  ;;  %v3154_v14 = vmul.f32 0.5, %v3141_v1 }
0x1046   :  { %v3166_v26 = vmul.f32 %v3160_v57, %v3141_v1  ;;  %4047 = vtanh.f32 %v3183_v56 }
0x1048   :  { %v3172_v22 = vmul.f32 %v3166_v26, %v3141_v1 }
0x1049   :  { %v3143_v46 = vpop.f32.mrf.mxu0 }
0x104a   :  { %v3178_v55 = vadd.f32 %v3172_v22, %v3141_v1  ;;  %v3144_v20 = vadd.f32 %v3788_v61, %v3143_v46 }
0x104c   :  { %v3184_v29 = vmul.f32 0.7978846, %v3178_v55  ;;  %v3161_v27 = vmul.f32 0.044715, %v3144_v20  ;;  %v4048_v0 = vpop.eup %4047  ;;  %v3155_v37 = vmul.f32 0.5, %v3144_v20 }
0x104d   :  { %v3195_v24 = vadd.f32 1.0, %v4048_v0 }
0x104e   :  { %4049 = vtanh.f32 %v3184_v29  ;;  %v3167_v38 = vmul.f32 %v3161_v27, %v3144_v20 }
0x104f   :  { %v3201_v44 = vmul.f32 %v3195_v24, %v3153_v45 }
0x1050   :  { %v3173_v2 = vmul.f32 %v3167_v38, %v3144_v20 }
0x1051   :  { %v3145_v48 = vpop.f32.mrf.mxu0 }
0x1052   :  { %v3146_v30 = vadd.f32 %v3788_v61, %v3145_v48  ;;  %v3179_v15 = vadd.f32 %v3173_v2, %v3144_v20 }
0x1054   :  { %v4050_v12 = vpop.eup %4049  ;;  %v3162_v9 = vmul.f32 0.044715, %v3146_v30  ;;  %v3185_v43 = vmul.f32 0.7978846, %v3179_v15  ;;  %v3156_v59 = vmul.f32 0.5, %v3146_v30 }
0x1055   :  { %v3196_v52 = vadd.f32 1.0, %v4050_v12 }
0x1056   :  { %v3168_v6 = vmul.f32 %v3162_v9, %v3146_v30  ;;  %4051 = vtanh.f32 %v3185_v43 }
0x1057   :  { %v3202_v49 = vmul.f32 %v3196_v52, %v3154_v14 }
0x1058   :  { %v3174_v25 = vmul.f32 %v3168_v6, %v3146_v30 }
0x1059   :  { %v3207_v18 = vpack.c.bf16 %v3202_v49, %v3201_v44 }
0x105a   :  { %v3180_v35 = vadd.f32 %v3174_v25, %v3146_v30 }
0x105b   :  { %3284 = vmatmul.bf16.vlgmr.msrb.gmra.mxu2 %v3207_v18 }
0x105c   :  { %v3186_v5 = vmul.f32 0.7978846, %v3180_v35  ;;  %v4052_v40 = vpop.eup %4051 }
0x105d   :  { %v3197_v32 = vadd.f32 1.0, %v4052_v40 }
0x105e   :  { %4053 = vtanh.f32 %v3186_v5 }
0x105f   :  { %v3203_v42 = vmul.f32 %v3197_v32, %v3155_v37 }
0x1064   :  { %v4054_v17 = vpop.eup %4053 }
0x1065   :  { %v3198_v13 = vadd.f32 1.0, %v4054_v17 }
0x1067   :  { %v3204_v34 = vmul.f32 %v3198_v13, %v3156_v59 }
0x1069   :  { %v3208_v19 = vpack.c.bf16 %v3204_v34, %v3203_v42 }
0x106b   :  { %3289 = vmatmul.bf16.gmra.mxu2 %v3208_v19 }
0x1080   :  { %v3148_v3 = vpop.f32.mrf.mxu0 }
0x1081   :  { %v3149_v28 = vadd.f32 %v3788_v61, %v3148_v3 }
0x1083   :  { %v3163_v47 = vmul.f32 0.044715, %v3149_v28  ;;  %v3157_v1 = vmul.f32 0.5, %v3149_v28 }
0x1085   :  { %v3169_v63 = vmul.f32 %v3163_v47, %v3149_v28 }
0x1087   :  { %v3175_v23 = vmul.f32 %v3169_v63, %v3149_v28 }
0x1088   :  { %v3150_v51 = vpop.f32.mrf.mxu0 }
0x1089   :  { %v3151_v10 = vadd.f32 %v3788_v61, %v3150_v51  ;;  %v3181_v21 = vadd.f32 %v3175_v23, %v3149_v28  ;;  %v3789_v61 = vld [vmem:[%s5728_s6 + $0x12] ss:$0 sm:$0xff] }
0x108b   :  { %v3164_v33 = vmul.f32 0.044715, %v3151_v10  ;;  %v3187_v4 = vmul.f32 0.7978846, %v3181_v21  ;;  %v3158_v57 = vmul.f32 0.5, %v3151_v10 }
0x108d   :  { %v3170_v31 = vmul.f32 %v3164_v33, %v3151_v10  ;;  %4055 = vtanh.f32 %v3187_v4 }
0x108f   :  { %v3176_v41 = vmul.f32 %v3170_v31, %v3151_v10 }
0x1091   :  { %v3182_v8 = vadd.f32 %v3176_v41, %v3151_v10 }
0x1093   :  { %v3188_v58 = vmul.f32 0.7978846, %v3182_v8  ;;  %v4056_v60 = vpop.eup %4055 }
0x1094   :  { %v3199_v16 = vadd.f32 1.0, %v4056_v60 }
0x1095   :  { %4057 = vtanh.f32 %v3188_v58 }
0x1096   :  { %v3205_v26 = vmul.f32 %v3199_v16, %v3157_v1  ;;  %v3767_v16 = vld [vmem:[%s5731_s5 + $0x28] sm:$0xff] }
0x1097   :  { %3490 = vmatpush.bf16.msrb.mxu3 %v3767_v16 }
0x109b   :  { %v4058_v39 = vpop.eup %4057 }
0x109c   :  { %v3200_v56 = vadd.f32 1.0, %v4058_v39 }
0x109e   :  { %v3206_v22 = vmul.f32 %v3200_v56, %v3158_v57  ;;  %v3766_v56 = vld [vmem:[%s5731_s5 + $0x20] sm:$0xff] }
0x109f   :  { %3491 = vmatpush.bf16.msrb.mxu3 %v3766_v56 }
0x10a0   :  { %v3209_v46 = vpack.c.bf16 %v3206_v22, %v3205_v26 }
0x10a2   :  { %3294 = vmatmul.bf16.gmra.mxu2 %v3209_v46 }
0x10de   :  { %v3285_v55 = vpop.f32.mrf.mxu2 }
0x10df   :  { %v3286_v20 = vadd.f32 %v3789_v61, %v3285_v55 }
0x10e1   :  { %v3300_v29 = vadd.f32 %v3286_v20, %v5469_v50 }
0x10e3   :  { %v3308_v27 = vsel %vm120_vm1, %v3300_v29, 0.0 }
0x10e4   :  { %3309 = vadd.xlane.f32.xlu1 %v3308_v27 }
0x10e6   :  { %v3287_v38 = vpop.f32.mrf.mxu2 }
0x10e7   :  { %v3288_v0 = vadd.f32 %v3789_v61, %v3287_v38 }
0x10e9   :  { %v3301_v2 = vadd.f32 %v3288_v0, %v5474_v7 }
0x10eb   :  { %v3311_v48 = vsel %vm120_vm1, %v3301_v2, 0.0 }
0x10ec   :  { %3312 = vadd.xlane.f32.xlu0 %v3311_v48 }
0x10ee   :  { %v3290_v30 = vpop.f32.mrf.mxu2 }
0x10ef   :  { %v3291_v15 = vadd.f32 %v3789_v61, %v3290_v30 }
0x10f1   :  { %v3302_v24 = vadd.f32 %v3291_v15, %v5479_v11 }
0x10f3   :  { %v3314_v12 = vsel %vm120_vm1, %v3302_v24, 0.0 }
0x10f4   :  { %3315 = vadd.xlane.f32.xlu2 %v3314_v12 }
0x10f6   :  { %v3292_v9 = vpop.f32.mrf.mxu2 }
0x10f7   :  { %v3293_v45 = vadd.f32 %v3789_v61, %v3292_v9 }
0x10f9   :  { %v3303_v50 = vadd.f32 %v3293_v45, %v5484_v53 }
0x10fb   :  { %v3317_v14 = vsel %vm120_vm1, %v3303_v50, 0.0 }
0x10fc   :  { %3318 = vadd.xlane.f32.xlu1 %v3317_v14 }
0x1125   :  { %v3295_v52 = vpop.f32.mrf.mxu2 }
0x1126   :  { %v3296_v6 = vadd.f32 %v3789_v61, %v3295_v52 }
0x1128   :  { %v3304_v7 = vadd.f32 %v3296_v6, %v5489_v62  ;;  %v5674_v6 = vld [vmem:[%s5728_s6] ss:$0 sm:$0xff] }
0x112a   :  { %v3320_v43 = vsel %vm120_vm1, %v3304_v7, 0.0 }
0x112b   :  { %3321 = vadd.xlane.f32.xlu0 %v3320_v43 }
0x112d   :  { %v3297_v44 = vpop.f32.mrf.mxu2 }
0x112e   :  { %v3298_v49 = vadd.f32 %v3789_v61, %v3297_v44 }
0x1130   :  { %v3305_v11 = vadd.f32 %v3298_v49, %v5494_v54 }
0x1132   :  { %v3323_v25 = vsel %vm120_vm1, %v3305_v11, 0.0 }
0x1133   :  { %3324 = vadd.xlane.f32.xlu2 %v3323_v25 }
0x1157   :  { %v3310_v18 = vpop.xlane.xlu1 %3309 }
0x1158   :  { %v3326_v53 = vmul.f32 %v3310_v18, %v4186_v36  ;;  %v5680_v18 = vld [vmem:[%s5728_s6 + $0x1] ss:$0 sm:$0xff] }
0x115a   :  { %v5626_v35 = vsub.f32 %v3300_v29, %v3326_v53 }
0x115c   :  { %v3338_v5 = vmul.f32 %v5626_v35, %v5626_v35 }
0x115e   :  { %v3344_v62 = vsel %vm120_vm1, %v3338_v5, 0.0 }
0x115f   :  { %v3313_v40 = vpop.xlane.xlu0 %3312  ;;  %3345 = vadd.xlane.f32.xlu1 %v3344_v62 }
0x1160   :  { %v3327_v32 = vmul.f32 %v3313_v40, %v4186_v36 }
0x1162   :  { %v5632_v17 = vsub.f32 %v3301_v2, %v3327_v32 }
0x1164   :  { %v3339_v54 = vmul.f32 %v5632_v17, %v5632_v17 }
0x1166   :  { %v3347_v37 = vsel %vm120_vm1, %v3339_v54, 0.0 }
0x1167   :  { %3348 = vadd.xlane.f32.xlu0 %v3347_v37  ;;  %v3316_v59 = vpop.xlane.xlu2 %3315 }
0x1168   :  { %v3328_v13 = vmul.f32 %v3316_v59, %v4186_v36 }
0x116a   :  { %v5638_v42 = vsub.f32 %v3302_v24, %v3328_v13 }
0x116c   :  { %v3340_v34 = vmul.f32 %v5638_v42, %v5638_v42 }
0x116e   :  { %v3350_v19 = vsel %vm120_vm1, %v3340_v34, 0.0 }
0x116f   :  { %v3319_v3 = vpop.xlane.xlu1 %3318  ;;  %3351 = vadd.xlane.f32.xlu2 %v3350_v19 }
0x1170   :  { %v3329_v28 = vmul.f32 %v3319_v3, %v4186_v36 }
0x1172   :  { %v5644_v47 = vsub.f32 %v3303_v50, %v3329_v28 }
0x1174   :  { %v3341_v63 = vmul.f32 %v5644_v47, %v5644_v47 }
0x1176   :  { %v3353_v23 = vsel %vm120_vm1, %v3341_v63, 0.0 }
0x1177   :  { %3354 = vadd.xlane.f32.xlu1 %v3353_v23 }
0x119e   :  { %v3322_v51 = vpop.xlane.xlu0 %3321 }
0x119f   :  { %v3330_v10 = vmul.f32 %v3322_v51, %v4186_v36 }
0x11a1   :  { %v5650_v21 = vsub.f32 %v3304_v7, %v3330_v10 }
0x11a3   :  { %v3342_v33 = vmul.f32 %v5650_v21, %v5650_v21 }
0x11a5   :  { %v3356_v31 = vsel %vm120_vm1, %v3342_v33, 0.0 }
0x11a6   :  { %3357 = vadd.xlane.f32.xlu0 %v3356_v31  ;;  %v3325_v4 = vpop.xlane.xlu2 %3324 }
0x11a7   :  { %v3331_v41 = vmul.f32 %v3325_v4, %v4186_v36 }
0x11a9   :  { %v5656_v8 = vsub.f32 %v3305_v11, %v3331_v41 }
0x11ab   :  { %v3343_v58 = vmul.f32 %v5656_v8, %v5656_v8 }
0x11ad   :  { %v3359_v60 = vsel %vm120_vm1, %v3343_v58, 0.0 }
0x11ae   :  { %3360 = vadd.xlane.f32.xlu2 %v3359_v60 }
0x11d2   :  { %v3346_v39 = vpop.xlane.xlu1 %3345 }
0x11d3   :  { %v3362_v1 = vmul.f32 %v3346_v39, %v4186_v36 }
0x11d5   :  { %v3368_v57 = vadd.f32 1e-06, %v3362_v1 }
0x11d7   :  { %4059 = vrsqrt.f32 %v3368_v57  ;;  %vm3380_vm10 = vweird.f32 %v3368_v57 }
0x11da   :  { %v3349_v26 = vpop.xlane.xlu0 %3348 }
0x11db   :  { %v3363_v22 = vmul.f32 %v3349_v26, %v4186_v36 }
0x11dd   :  { %v4060_v46 = vpop.eup %4059  ;;  %v3369_v61 = vadd.f32 1e-06, %v3363_v22 }
0x11de   :  { %v3375_v55 = vmul.f32 %v4060_v46, %v3368_v57  ;;  %vm3381_vm9 = vweird.f32 %v4060_v46 }
0x11df   :  { %4061 = vrsqrt.f32 %v3369_v61  ;;  %vm3382_vm11 = vmor %vm3380_vm10, %vm3381_vm9  ;;  %vm3390_vm13 = vweird.f32 %v3369_v61 }
0x11e0   :  { %v3376_v20 = vmul.f32 %v4060_v46, %v3375_v55 }
0x11e2   :  { %v3377_v29 = vmul.f32 0.5, %v3376_v20  ;;  %v3352_v27 = vpop.xlane.xlu2 %3351 }
0x11e3   :  { %v3364_v38 = vmul.f32 %v3352_v27, %v4186_v36 }
0x11e4   :  { %v3378_v0 = vsub.f32 1.5, %v3377_v29 }
0x11e5   :  { %v4062_v2 = vpop.eup %4061  ;;  %v3370_v48 = vadd.f32 1e-06, %v3364_v38 }
0x11e6   :  { %v3379_v30 = vmul.f32 %v4060_v46, %v3378_v0  ;;  %v3385_v15 = vmul.f32 %v4062_v2, %v3369_v61  ;;  %vm3391_vm12 = vweird.f32 %v4062_v2 }
0x11e7   :  { %4063 = vrsqrt.f32 %v3370_v48  ;;  %vm3392_vm14 = vmor %vm3390_vm13, %vm3391_vm12  ;;  %vm3400_vm2 = vweird.f32 %v3370_v48 }
0x11e8   :  { %v3386_v24 = vmul.f32 %v4062_v2, %v3385_v15  ;;  %v3383_v12 = vsel %vm3382_vm11, %v4060_v46, %v3379_v30 }
0x11e9   :  { %v3434_v7 = vmul.f32 %v3383_v12, %v5626_v35 }
0x11ea   :  { %v3387_v9 = vmul.f32 0.5, %v3386_v24  ;;  %v3355_v45 = vpop.xlane.xlu1 %3354 }
0x11eb   :  { %v3365_v50 = vmul.f32 %v3355_v45, %v4186_v36  ;;  %v3441_v53 = vmul.f32 %v5674_v6, %v3434_v7 }
0x11ec   :  { %v3388_v14 = vsub.f32 1.5, %v3387_v9 }
0x11ed   :  { %v4064_v52 = vpop.eup %4063  ;;  %v3371_v43 = vadd.f32 1e-06, %v3365_v50  ;;  %v3448_v54 = vadd.f32 %v5680_v18, %v3441_v53 }
0x11ee   :  { %v3389_v44 = vmul.f32 %v4062_v2, %v3388_v14  ;;  %v3395_v49 = vmul.f32 %v4064_v52, %v3370_v48  ;;  %vm3401_vm15 = vweird.f32 %v4064_v52 }
0x11ef   :  { %4065 = vrsqrt.f32 %v3371_v43  ;;  %vm3402_vm3 = vmor %vm3400_vm2, %vm3401_vm15  ;;  %vm3410_vm5 = vweird.f32 %v3371_v43 }
0x11f0   :  { %v3393_v11 = vsel %vm3392_vm14, %v4062_v2, %v3389_v44  ;;  %v3396_v25 = vmul.f32 %v4064_v52, %v3395_v49 }
0x11f1   :  { %v3435_v5 = vmul.f32 %v3393_v11, %v5632_v17 }
0x11f2   :  { %v3397_v62 = vmul.f32 0.5, %v3396_v25 }
0x11f3   :  { %v3442_v35 = vmul.f32 %v5674_v6, %v3435_v5 }
0x11f4   :  { %v3398_v40 = vsub.f32 1.5, %v3397_v62 }
0x11f5   :  { %v4066_v32 = vpop.eup %4065  ;;  %v3449_v37 = vadd.f32 %v5680_v18, %v3442_v35 }
0x11f6   :  { %v3399_v59 = vmul.f32 %v4064_v52, %v3398_v40  ;;  %v3405_v13 = vmul.f32 %v4066_v32, %v3371_v43  ;;  %vm3411_vm4 = vweird.f32 %v4066_v32 }
0x11f7   :  { %v3458_v34 = vpack.c.bf16 %v3449_v37, %v3448_v54  ;;  %vm3412_vm6 = vmor %vm3410_vm5, %vm3411_vm4 }
0x11f8   :  { %v3406_v19 = vmul.f32 %v4066_v32, %v3405_v13  ;;  %v3403_v3 = vsel %vm3402_vm3, %v4064_v52, %v3399_v59 }
0x11f9   :  { %3733 = vmatmul.msk.bf16.vlgmr.msrb.gmra.mxu3 %vm120_vm1, %v3458_v34  ;;  %v3436_v63 = vmul.f32 %v3403_v3, %v5638_v42 }
0x11fa   :  { %v3407_v17 = vmul.f32 0.5, %v3406_v19 }
0x11fb   :  { %v3443_v33 = vmul.f32 %v5674_v6, %v3436_v63 }
0x11fc   :  { %v3408_v28 = vsub.f32 1.5, %v3407_v17 }
0x11fd   :  { %v3450_v4 = vadd.f32 %v5680_v18, %v3443_v33 }
0x11fe   :  { %v3409_v23 = vmul.f32 %v4066_v32, %v3408_v28 }
0x1200   :  { %v3413_v51 = vsel %vm3412_vm6, %v4066_v32, %v3409_v23 }
0x1201   :  { %v3437_v10 = vmul.f32 %v3413_v51, %v5644_v47 }
0x1203   :  { %v3444_v31 = vmul.f32 %v5674_v6, %v3437_v10 }
0x1205   :  { %v3451_v41 = vadd.f32 %v5680_v18, %v3444_v31 }
0x1207   :  { %v3459_v58 = vpack.c.bf16 %v3451_v41, %v3450_v4 }
0x1209   :  { %3734 = vmatmul.msk.bf16.gmra.mxu3 %vm120_vm1, %v3459_v58 }
0x1219   :  { %v3358_v60 = vpop.xlane.xlu0 %3357 }
0x121a   :  { %v3366_v42 = vmul.f32 %v3358_v60, %v4186_v36 }
0x121c   :  { %v3372_v16 = vadd.f32 1e-06, %v3366_v42 }
0x121e   :  { %4067 = vrsqrt.f32 %v3372_v16  ;;  %vm3420_vm7 = vweird.f32 %v3372_v16 }
0x1221   :  { %v3361_v39 = vpop.xlane.xlu2 %3360 }
0x1222   :  { %v3367_v1 = vmul.f32 %v3361_v39, %v4186_v36 }
0x1224   :  { %v4068_v47 = vpop.eup %4067  ;;  %v3373_v57 = vadd.f32 1e-06, %v3367_v1 }
0x1225   :  { %v3415_v56 = vmul.f32 %v4068_v47, %v3372_v16  ;;  %vm3421_vm0 = vweird.f32 %v4068_v47 }
0x1226   :  { %4069 = vrsqrt.f32 %v3373_v57  ;;  %vm3422_vm8 = vmor %vm3420_vm7, %vm3421_vm0  ;;  %vm3430_vm10 = vweird.f32 %v3373_v57 }
0x1227   :  { %v3416_v26 = vmul.f32 %v4068_v47, %v3415_v56 }
0x1229   :  { %v3417_v22 = vmul.f32 0.5, %v3416_v26 }
0x122b   :  { %v3418_v46 = vsub.f32 1.5, %v3417_v22 }
0x122c   :  { %v4070_v61 = vpop.eup %4069 }
0x122d   :  { %v3419_v55 = vmul.f32 %v4068_v47, %v3418_v46  ;;  %v3425_v20 = vmul.f32 %v4070_v61, %v3373_v57  ;;  %vm3431_vm9 = vweird.f32 %v4070_v61 }
0x122e   :  { %vm3432_vm11 = vmor %vm3430_vm10, %vm3431_vm9 }
0x122f   :  { %v3426_v29 = vmul.f32 %v4070_v61, %v3425_v20  ;;  %v3423_v27 = vsel %vm3422_vm8, %v4068_v47, %v3419_v55 }
0x1230   :  { %v3438_v36 = vmul.f32 %v3423_v27, %v5650_v21  ;;  %v3792_v21 = vld [vmem:[%s5728_s6 + $0x2] ss:$0 sm:$0xff] }
0x1231   :  { %v3427_v38 = vmul.f32 0.5, %v3426_v29 }
0x1232   :  { %v3445_v15 = vmul.f32 %v5674_v6, %v3438_v36 }
0x1233   :  { %v3428_v0 = vsub.f32 1.5, %v3427_v38 }
0x1234   :  { %v3452_v12 = vadd.f32 %v5680_v18, %v3445_v15 }
0x1235   :  { %v3429_v2 = vmul.f32 %v4070_v61, %v3428_v0 }
0x1237   :  { %v3433_v48 = vsel %vm3432_vm11, %v4070_v61, %v3429_v2 }
0x1238   :  { %v3439_v30 = vmul.f32 %v3433_v48, %v5656_v8 }
0x123a   :  { %v3446_v24 = vmul.f32 %v5674_v6, %v3439_v30 }
0x123c   :  { %v3453_v9 = vadd.f32 %v5680_v18, %v3446_v24 }
0x123e   :  { %v3460_v45 = vpack.c.bf16 %v3453_v9, %v3452_v12 }
0x1240   :  { %3735 = vmatmul.msk.bf16.gmra.mxu3 %vm120_vm1, %v3460_v45 }
0x127c   :  { %v3493_v50 = vpop.f32.mrf.mxu3 }
0x127d   :  { %v3494_v14 = vadd.f32 %v3792_v21, %v3493_v50 }
0x127f   :  { %3508 = vst [vmem:[%s5732_s7] sm:$0xff] %v3494_v14 }
0x1284   :  { %v3495_v8 = vpop.f32.mrf.mxu3 }
0x1285   :  { %v3496_v52 = vadd.f32 %v3792_v21, %v3495_v8 }
0x1287   :  { %3509 = vst [vmem:[%s5732_s7 + $0x8] sm:$0xff] %v3496_v52 }
0x128c   :  { %v3498_v6 = vpop.f32.mrf.mxu3 }
0x128d   :  { %v3499_v7 = vadd.f32 %v3792_v21, %v3498_v6 }
0x128f   :  { %3510 = vst [vmem:[%s5732_s7 + $0x10] sm:$0xff] %v3499_v7 }
0x1294   :  { %v3500_v43 = vpop.f32.mrf.mxu3 }
0x1295   :  { %v3501_v44 = vadd.f32 %v3792_v21, %v3500_v43 }
0x1297   :  { %3511 = vst [vmem:[%s5732_s7 + $0x18] sm:$0xff] %v3501_v44 }
0x12c3   :  { %v3503_v49 = vpop.f32.mrf.mxu3 }
0x12c4   :  { %v3504_v11 = vadd.f32 %v3792_v21, %v3503_v49 }
0x12c6   :  { %3512 = vst [vmem:[%s5732_s7 + $0x20] sm:$0xff] %v3504_v11 }
0x12cb   :  { %v3505_v25 = vpop.f32.mrf.mxu3 }
0x12cc   :  { %v3506_v18 = vadd.f32 %v3792_v21, %v3505_v25 }
0x12ce   :  { %3513 = vst [vmem:[%s5732_s7 + $0x28] sm:$0xff] %v3506_v18 }

</bundles_post_ra>
